<compile_context>
chip_gen: v6e
topology: v6e:2x2x1
jax: 0.10.0
libtpu: 0.0.40
codegen_flags: <defaults>
</compile_context>

<pallas_src>
import functools

import jax
import jax.numpy as jnp
from jax.experimental import pallas as pl
from jax.experimental.pallas import tpu as pltpu

# Matmul operand dtype for the 1x1-conv / fc1 / fc2 dots (f32 accumulation).
MXU_DTYPE = jnp.bfloat16
VMEM_LIMIT = 32 * 1024 * 1024


# ----------------------------- in-kernel helpers ----------------------------

def _erf_f32(x):
    # TODO(synk): lax.erf has no guaranteed Mosaic lowering; use the
    # Abramowitz-Stegun 7.1.26 rational approximation (|abs err| < 1.5e-7).
    # exp and the approx reciprocal both go to the EUP, off the VALU slot.
    p = 0.3275911
    a1, a2, a3, a4, a5 = (0.254829592, -0.284496736, 1.421413741,
                          -1.453152027, 1.061405429)
    ax = jnp.abs(x)
    t = pl.reciprocal(1.0 + p * ax, approx=True)
    poly = ((((a5 * t + a4) * t + a3) * t + a2) * t + a1) * t
    y = 1.0 - poly * jnp.exp(-ax * ax)
    return jnp.where(x < 0.0, -y, y)


def _gelu_exact(x):
    # torch.nn.functional.gelu default = exact erf-based GELU (approximated).
    return 0.5 * x * (1.0 + _erf_f32(x * 0.7071067811865476))


# ------------------------------ Pallas kernels ------------------------------

def _fc0_kernel(x_ref, g_ref, wt_ref, b_ref, o_ref):
    # Channels-first fc0: out[c, n] = u[n]*w[0,c] + gx[n]*w[1,c] + gy[n]*w[2,c] + b[c]
    # Three lane-dense VPU FMAs (outer-product broadcasts), no MXU pass.
    x = x_ref[...]                               # (1, tn)
    g = g_ref[...]                               # (2, tn)  rows = gridx, gridy
    wt = wt_ref[...]                             # (width, 3)
    o_ref[...] = (wt[:, 0:1] * x + wt[:, 1:2] * g[0:1, :] + wt[:, 2:3] * g[1:2, :]
                  + b_ref[...]).astype(o_ref.dtype)


def _fourier_layer_kernel(spec_ref, x_ref, wt_ref, b_ref, o_ref, *, apply_gelu):
    # spectral branch + 1x1-conv branch (wT @ x) + bias [+ GELU], all (C, tn)
    # lane-dense.  wt_ref is pre-cast bf16; activations are cast at the dot.
    y = (spec_ref[...]
         + jnp.dot(wt_ref[...], x_ref[...].astype(MXU_DTYPE),
                   preferred_element_type=jnp.float32)
         + b_ref[...])
    if apply_gelu:
        y = _gelu_exact(y)
    o_ref[...] = y.astype(o_ref.dtype)


def _head_kernel(x_ref, w1t_ref, b1_ref, w2t_ref, b2_ref, o_ref):
    # Fused fc1 -> GELU -> fc2 in channels-first layout; the fc1 activation
    # stays in vregs (no VMEM scratch round trip).  Output row (1, tn) is
    # lane-dense.
    h = (jnp.dot(w1t_ref[...], x_ref[...].astype(MXU_DTYPE),
                 preferred_element_type=jnp.float32) + b1_ref[...])
    hg = _gelu_exact(h).astype(MXU_DTYPE)
    o_ref[...] = (jnp.dot(w2t_ref[...], hg, preferred_element_type=jnp.float32)
                  + b2_ref[...]).astype(o_ref.dtype)


def _complex_mix_kernel(x_ref, w_ref, o_ref):
    # One mode-group per grid step: x (1, B, G*2Ci) [real|imag per mode],
    # w (1, G*2Ci, G*2Co) block-diagonal packed [[wr,wi],[-wi,wr]] blocks.
    # Kept in f32: FLOPs are negligible, FFT coefficients have wide range.
    o_ref[0] = jnp.dot(x_ref[0], w_ref[0], preferred_element_type=jnp.float32)


# ------------------------------- call wrappers -------------------------------

def _lane_tile(n, max_tn):
    """Lane tile: multiple of 128, at least 2 grid steps when possible."""
    half = -(-n // 2)
    tn = -(-half // 128) * 128
    return max(128, min(tn, max_tn))


def _pad_lanes(a, tn):
    pad = (-a.shape[-1]) % tn
    if pad:
        a = jnp.pad(a, [(0, 0)] * (a.ndim - 1) + [(0, pad)])
    return a


def fc0_pallas(xrow, grid_rows, wt, b_, max_tn=4096):
    """xrow: (1, N); grid_rows: (2, N) -> (width, N) channels-first."""
    n = xrow.shape[1]
    width = wt.shape[0]
    tn = _lane_tile(n, max_tn)
    xp = _pad_lanes(xrow, tn)
    gp = _pad_lanes(grid_rows, tn)
    npad = xp.shape[1]
    out = pl.pallas_call(
        _fc0_kernel,
        out_shape=jax.ShapeDtypeStruct((width, npad), jnp.float32),
        grid_spec=pltpu.PrefetchScalarGridSpec(
            num_scalar_prefetch=0,
            grid=(npad // tn,),
            in_specs=[pl.BlockSpec((1, tn), lambda i: (0, i)),
                      pl.BlockSpec((2, tn), lambda i: (0, i)),
                      pl.BlockSpec((width, 3), lambda i: (0, 0)),
                      pl.BlockSpec((width, 1), lambda i: (0, 0))],
            out_specs=pl.BlockSpec((width, tn), lambda i: (0, i))),
        compiler_params=pltpu.CompilerParams(
            dimension_semantics=("parallel",), vmem_limit_bytes=VMEM_LIMIT),
    )(xp, gp, wt, b_)
    return out[:, :n]


def fourier_layer_pallas(spec, x, wt, b_, apply_gelu, max_tn=4096):
    """spec, x: (C, N) f32; wt: (C, C) bf16; b: (C, 1) -> (C, N) [+ GELU]."""
    c, n = x.shape
    tn = _lane_tile(n, max_tn)
    sp = _pad_lanes(spec, tn)
    xp = _pad_lanes(x, tn)
    npad = xp.shape[1]
    kernel = functools.partial(_fourier_layer_kernel, apply_gelu=apply_gelu)
    out = pl.pallas_call(
        kernel,
        out_shape=jax.ShapeDtypeStruct((c, npad), jnp.float32),
        grid_spec=pltpu.PrefetchScalarGridSpec(
            num_scalar_prefetch=0,
            grid=(npad // tn,),
            in_specs=[pl.BlockSpec((c, tn), lambda i: (0, i)),
                      pl.BlockSpec((c, tn), lambda i: (0, i)),
                      pl.BlockSpec((c, c), lambda i: (0, 0)),
                      pl.BlockSpec((c, 1), lambda i: (0, 0))],
            out_specs=pl.BlockSpec((c, tn), lambda i: (0, i))),
        compiler_params=pltpu.CompilerParams(
            dimension_semantics=("parallel",), vmem_limit_bytes=VMEM_LIMIT),
    )(sp, xp, wt, b_)
    return out[:, :n]


def head_pallas(x, w1t, b1, w2t, b2, max_tn=256):
    """Fused fc1 -> GELU -> fc2. x: (C, N) -> (1, N) lane-dense row."""
    c, n = x.shape
    hid = w1t.shape[0]
    tn = _lane_tile(n, max_tn)          # small tile keeps fc1 act in vregs
    xp = _pad_lanes(x, tn)
    npad = xp.shape[1]
    out = pl.pallas_call(
        _head_kernel,
        out_shape=jax.ShapeDtypeStruct((1, npad), jnp.float32),
        grid_spec=pltpu.PrefetchScalarGridSpec(
            num_scalar_prefetch=0,
            grid=(npad // tn,),
            in_specs=[pl.BlockSpec((c, tn), lambda i: (0, i)),
                      pl.BlockSpec((hid, c), lambda i: (0, 0)),
                      pl.BlockSpec((hid, 1), lambda i: (0, 0)),
                      pl.BlockSpec((1, hid), lambda i: (0, 0)),
                      pl.BlockSpec((1, 1), lambda i: (0, 0))],
            out_specs=pl.BlockSpec((1, tn), lambda i: (0, i))),
        compiler_params=pltpu.CompilerParams(
            dimension_semantics=("parallel",), vmem_limit_bytes=VMEM_LIMIT),
    )(xp, w1t, b1, w2t, b2)
    return out[:, :n]


def complex_mix_pallas(xg, wg):
    """xg: (NG, B, G*2Cin) f32; wg: (NG, G*2Cin, G*2Cout) -> (NG, B, G*2Cout)."""
    ng, b, ci2g = xg.shape
    co2g = wg.shape[2]
    return pl.pallas_call(
        _complex_mix_kernel,
        out_shape=jax.ShapeDtypeStruct((ng, b, co2g), jnp.float32),
        grid_spec=pltpu.PrefetchScalarGridSpec(
            num_scalar_prefetch=0,
            grid=(ng,),
            in_specs=[pl.BlockSpec((1, b, ci2g), lambda i: (i, 0, 0)),
                      pl.BlockSpec((1, ci2g, co2g), lambda i: (i, 0, 0))],
            out_specs=pl.BlockSpec((1, b, co2g), lambda i: (i, 0, 0))),
        compiler_params=pltpu.CompilerParams(
            dimension_semantics=("parallel",), vmem_limit_bytes=VMEM_LIMIT),
    )(xg, wg)


# ------------------------------ model components ----------------------------

def spectral_conv2d(h, wg, m1, m2, bsz, sx, sy):
    """SpectralConv2d_fast in channels-first layout.

    h: (Cin, N) with N = B*X*Y; wg: pre-packed block-diagonal real weights
    (M//G, G*2Cin, G*2Cout).  Returns the spectral branch (Cout, N).
    """
    cin, n = h.shape
    ng, gci2, gco2 = wg.shape
    g = gci2 // (2 * cin)
    co = gco2 // (2 * g)
    m_total = ng * g                                  # = 2*m1*m2

    h4 = h.reshape(cin, bsz, sx, sy)
    # TODO(synk): rfft2 / irfft2 have no Pallas primitive; kept in XLA.
    x_ft = jnp.fft.rfft2(h4, axes=(2, 3))             # (Cin, B, X, Y//2+1) c64

    top = x_ft[:, :, :m1, :m2]
    bot = x_ft[:, :, sx - m1:, :m2]
    xm = jnp.concatenate([top, bot], axis=2)          # (Cin, B, 2m1, m2)
    xm = jnp.transpose(xm, (2, 3, 1, 0)).reshape(m_total, bsz, cin)
    xr = jnp.concatenate([jnp.real(xm), jnp.imag(xm)], axis=-1)  # (M, B, 2Cin)
    xg = xr.reshape(ng, g, bsz, 2 * cin)
    xg = jnp.transpose(xg, (0, 2, 1, 3)).reshape(ng, bsz, g * 2 * cin)

    out = complex_mix_pallas(xg, wg)                  # (NG, B, G*2Cout) f32
    out = out.reshape(ng, bsz, g, 2 * co)
    out = jnp.transpose(out, (0, 2, 1, 3)).reshape(m_total, bsz, 2 * co)
    oc = jax.lax.complex(out[..., :co], out[..., co:])            # (M, B, Co)
    oc = jnp.transpose(oc.reshape(2 * m1, m2, bsz, co), (3, 2, 0, 1))

    out_ft = jnp.zeros((co, bsz, sx, sy // 2 + 1), jnp.complex64)
    out_ft = out_ft.at[:, :, :m1, :m2].set(oc[:, :, :m1])
    out_ft = out_ft.at[:, :, sx - m1:, :m2].set(oc[:, :, m1:])
    spec = jnp.fft.irfft2(out_ft, s=(sx, sy), axes=(2, 3))        # (Co,B,X,Y)
    return spec.reshape(co, n).astype(h.dtype)


def init_params(key, width=32, modes1=4, modes2=4, hidden=128):
    """Deterministic synthetic parameters matching the torch module's shapes.

    * 1x1-conv / fc1 / fc2 matmul weights are pre-transposed (channels-first)
      and pre-cast to bf16 once here (no per-forward casts).
    * Spectral weights are pre-packed once into the block-diagonal real form
      used by the complex-mix kernel and kept in f32.
    """
    keys = iter(jax.random.split(key, 16))
    m_total = 2 * modes1 * modes2
    group = 4 if m_total % 4 == 0 else (2 if m_total % 2 == 0 else 1)

    def dense(k, cin, cout, cast_bf16):
        bound = 1.0 / float(cin) ** 0.5
        kw, kb = jax.random.split(k)
        w = jax.random.uniform(kw, (cin, cout), jnp.float32, -bound, bound)
        b_ = jax.random.uniform(kb, (cout,), jnp.float32, -bound, bound)
        wt = w.T                                       # (cout, cin) for wT @ x
        if cast_bf16:
            wt = wt.astype(MXU_DTYPE)
        return wt, b_.reshape(cout, 1)

    def pack_spectral(k, cin, cout, m1, m2, g):
        scale = 1.0 / (cin * cout)
        kk = jax.random.split(k, 4)
        wr1, wi1, wr2, wi2 = [scale * jax.random.uniform(
            kk[j], (cin, cout, m1, m2), jnp.float32) for j in range(4)]

        def to_mio(w):                                 # (Ci,Co,m1,m2)->(m1*m2,Ci,Co)
            return jnp.transpose(w, (2, 3, 0, 1)).reshape(m1 * m2, cin, cout)

        wr = jnp.concatenate([to_mio(wr1), to_mio(wr2)], axis=0)   # (M, Ci, Co)
        wi = jnp.concatenate([to_mio(wi1), to_mio(wi2)], axis=0)
        top = jnp.concatenate([wr, wi], axis=2)                    # (M, Ci, 2Co)
        bot = jnp.concatenate([-wi, wr], axis=2)
        wm = jnp.concatenate([top, bot], axis=1)                   # (M, 2Ci, 2Co)
        # Block-diagonal group packing -> (M//G, G*2Ci, G*2Co) for lane-dense
        # grouped matmuls on the mode-group grid axis.
        mt = 2 * m1 * m2
        ng = mt // g
        wmg = wm.reshape(ng, g, 2 * cin, 2 * cout)
        wg = jnp.zeros((ng, g * 2 * cin, g * 2 * cout), jnp.float32)
        for j in range(g):
            wg = wg.at[:, j * 2 * cin:(j + 1) * 2 * cin,
                       j * 2 * cout:(j + 1) * 2 * cout].set(wmg[:, j])
        return wg

    params = {"fc0": dense(next(keys), 3, width, cast_bf16=False)}  # used on VPU
    for layer in range(4):
        params[f"conv{layer}"] = pack_spectral(next(keys), width, width,
                                               modes1, modes2, group)
        params[f"w{layer}"] = dense(next(keys), width, width, cast_bf16=True)
    params["fc1"] = dense(next(keys), width, hidden, cast_bf16=True)
    params["fc2"] = dense(next(keys), hidden, 1, cast_bf16=True)
    return params


def fno2d_forward(params, x, modes1, modes2):
    """x: (B, X, Y, 1) -> (B, X, Y, 1), matching FNO2d.forward semantics."""
    b, sx, sy, _ = x.shape
    n = b * sx * sy
    w0t, b0 = params["fc0"]

    # Exact integer-derived grid features, built once in XLA as a tiny (2, N).
    idx = jnp.arange(n, dtype=jnp.int32)
    iy = idx % sy
    ix = (idx // sy) % sx
    grid_rows = jnp.stack([ix.astype(jnp.float32) / float(sx - 1),
                           iy.astype(jnp.float32) / float(sy - 1)], axis=0)

    # fc0 (channels-first, lane-dense).
    h = fc0_pallas(x.reshape(1, n), grid_rows, w0t, b0)     # (width, N)

    for layer in range(4):
        spec = spectral_conv2d(h, params[f"conv{layer}"], modes1, modes2,
                               b, sx, sy)
        wlt, bl = params[f"w{layer}"]
        h = fourier_layer_pallas(spec, h, wlt, bl, apply_gelu=(layer < 3))

    w1t, b1 = params["fc1"]
    w2t, b2 = params["fc2"]
    out = head_pallas(h, w1t, b1, w2t, b2)                  # (1, N)
    return out.reshape(b, sx, sy, 1)


# ------------------------------------ main -----------------------------------

if __name__ == "__main__":
    B, X, Y = 2, 16, 16
    MODES1, MODES2, WIDTH = 4, 4, 32

    key = jax.random.PRNGKey(0)
    kx, kp = jax.random.split(key)
    x = jax.random.normal(kx, (B, X, Y, 1), jnp.float32)
    params = init_params(kp, width=WIDTH, modes1=MODES1, modes2=MODES2)

    fwd = jax.jit(functools.partial(fno2d_forward, modes1=MODES1, modes2=MODES2))
    out = fwd(params, x)
    jax.block_until_ready(out)
    assert out.shape == (B, X, Y, 1) and out.dtype == jnp.float32
    print("KERNEL_OK")
</pallas_src>

<mosaic_0001>
module attributes {stable_mosaic.version = 11 : i64} {
  func.func @_fc0_kernel(%arg0: i32, %arg1: memref<1x256xf32, #tpu.memory_space<vmem>>, %arg2: memref<2x256xf32, #tpu.memory_space<vmem>>, %arg3: memref<32x3xf32, #tpu.memory_space<vmem>>, %arg4: memref<32x1xf32, #tpu.memory_space<vmem>>, %arg5: memref<32x256xf32, #tpu.memory_space<vmem>>) attributes {dimension_semantics = [#tpu.dimension_semantics<parallel>], iteration_bounds = array<i64: 2>, scalar_prefetch = 0 : i64, scratch_operands = 0 : i64, tpu.core_type = #tpu.core_type<tc>, window_params = [{transform_indices = @transform_0, window_bounds = array<i64: 1, 256>}, {transform_indices = @transform_1, window_bounds = array<i64: 2, 256>}, {pipeline_mode = #tpu.pipeline_mode<synchronous>, transform_indices = @transform_2, window_bounds = array<i64: 32, 3>}, {pipeline_mode = #tpu.pipeline_mode<synchronous>, transform_indices = @transform_3, window_bounds = array<i64: 32, 1>}, {transform_indices = @transform_4, window_bounds = array<i64: 32, 256>}]} {
    %c0 = arith.constant 0 : index
    %c0_0 = arith.constant 0 : index
    %0 = vector.load %arg1[%c0, %c0_0] : memref<1x256xf32, #tpu.memory_space<vmem>>, vector<1x256xf32>
    %c0_1 = arith.constant 0 : index
    %c0_2 = arith.constant 0 : index
    %1 = vector.load %arg2[%c0_1, %c0_2] : memref<2x256xf32, #tpu.memory_space<vmem>>, vector<2x256xf32>
    %c0_3 = arith.constant 0 : index
    %c0_4 = arith.constant 0 : index
    %2 = vector.load %arg3[%c0_3, %c0_4] : memref<32x3xf32, #tpu.memory_space<vmem>>, vector<32x3xf32>
    %3 = vector.extract_strided_slice %2 {offsets = [0, 0], sizes = [32, 1], strides = [1, 1]} : vector<32x3xf32> to vector<32x1xf32>
    %4 = vector.broadcast %3 : vector<32x1xf32> to vector<32x256xf32>
    %5 = vector.broadcast %0 : vector<1x256xf32> to vector<32x256xf32>
    %6 = arith.mulf %4, %5 : vector<32x256xf32>
    %7 = vector.extract_strided_slice %2 {offsets = [0, 1], sizes = [32, 1], strides = [1, 1]} : vector<32x3xf32> to vector<32x1xf32>
    %8 = vector.extract_strided_slice %1 {offsets = [0, 0], sizes = [1, 256], strides = [1, 1]} : vector<2x256xf32> to vector<1x256xf32>
    %9 = vector.broadcast %7 : vector<32x1xf32> to vector<32x256xf32>
    %10 = vector.broadcast %8 : vector<1x256xf32> to vector<32x256xf32>
    %11 = arith.mulf %9, %10 : vector<32x256xf32>
    %12 = arith.addf %6, %11 : vector<32x256xf32>
    %13 = vector.extract_strided_slice %2 {offsets = [0, 2], sizes = [32, 1], strides = [1, 1]} : vector<32x3xf32> to vector<32x1xf32>
    %14 = vector.extract_strided_slice %1 {offsets = [1, 0], sizes = [1, 256], strides = [1, 1]} : vector<2x256xf32> to vector<1x256xf32>
    %15 = vector.broadcast %13 : vector<32x1xf32> to vector<32x256xf32>
    %16 = vector.broadcast %14 : vector<1x256xf32> to vector<32x256xf32>
    %17 = arith.mulf %15, %16 : vector<32x256xf32>
    %18 = arith.addf %12, %17 : vector<32x256xf32>
    %c0_5 = arith.constant 0 : index
    %c0_6 = arith.constant 0 : index
    %19 = vector.load %arg4[%c0_5, %c0_6] : memref<32x1xf32, #tpu.memory_space<vmem>>, vector<32x1xf32>
    %20 = vector.broadcast %19 : vector<32x1xf32> to vector<32x256xf32>
    %21 = arith.addf %18, %20 : vector<32x256xf32>
    %c0_7 = arith.constant 0 : index
    %c0_8 = arith.constant 0 : index
    %22 = vector.load %arg5[%c0_7, %c0_8] : memref<32x256xf32, #tpu.memory_space<vmem>>, vector<32x256xf32>
    tpu.vector_store %arg5[%c0_7, %c0_8], %21 {strides = array<i32>} : memref<32x256xf32, #tpu.memory_space<vmem>>, vector<32x256xf32>,
    return
  }
  func.func @transform_0(%arg0: i32) -> (i32, i32) {
    %c0_i32 = arith.constant 0 : i32
    %c0_i32_0 = arith.constant 0 : i32
    return %c0_i32, %arg0 : i32, i32
  }
  func.func @transform_1(%arg0: i32) -> (i32, i32) {
    %c0_i32 = arith.constant 0 : i32
    %c0_i32_0 = arith.constant 0 : i32
    return %c0_i32, %arg0 : i32, i32
  }
  func.func @transform_2(%arg0: i32) -> (i32, i32) {
    %c0_i32 = arith.constant 0 : i32
    %c0_i32_0 = arith.constant 0 : i32
    %c0_i32_1 = arith.constant 0 : i32
    return %c0_i32, %c0_i32_0 : i32, i32
  }
  func.func @transform_3(%arg0: i32) -> (i32, i32) {
    %c0_i32 = arith.constant 0 : i32
    %c0_i32_0 = arith.constant 0 : i32
    %c0_i32_1 = arith.constant 0 : i32
    return %c0_i32, %c0_i32_0 : i32, i32
  }
  func.func @transform_4(%arg0: i32) -> (i32, i32) {
    %c0_i32 = arith.constant 0 : i32
    %c0_i32_0 = arith.constant 0 : i32
    return %c0_i32, %arg0 : i32, i32
  }
}

module attributes {stable_mosaic.version = 11 : i64} {
  func.func @_complex_mix_kernel(%arg0: i32, %arg1: memref<1x2x256xf32, #tpu.memory_space<vmem>>, %arg2: memref<1x256x256xf32, #tpu.memory_space<vmem>>, %arg3: memref<1x2x256xf32, #tpu.memory_space<vmem>>) attributes {dimension_semantics = [#tpu.dimension_semantics<parallel>], iteration_bounds = array<i64: 8>, scalar_prefetch = 0 : i64, scratch_operands = 0 : i64, tpu.core_type = #tpu.core_type<tc>, window_params = [{transform_indices = @transform_0, window_bounds = array<i64: 1, 2, 256>}, {transform_indices = @transform_1, window_bounds = array<i64: 1, 256, 256>}, {transform_indices = @transform_2, window_bounds = array<i64: 1, 2, 256>}]} {
    %c0 = arith.constant 0 : index
    %c0_0 = arith.constant 0 : index
    %c0_1 = arith.constant 0 : index
    %0 = vector.load %arg1[%c0, %c0_0, %c0_1] : memref<1x2x256xf32, #tpu.memory_space<vmem>>, vector<1x2x256xf32>
    %1 = vector.shape_cast %0 : vector<1x2x256xf32> to vector<2x256xf32>
    %c0_2 = arith.constant 0 : index
    %c0_3 = arith.constant 0 : index
    %c0_4 = arith.constant 0 : index
    %2 = vector.load %arg2[%c0_2, %c0_3, %c0_4] : memref<1x256x256xf32, #tpu.memory_space<vmem>>, vector<1x256x256xf32>
    %3 = vector.shape_cast %2 : vector<1x256x256xf32> to vector<256x256xf32>
    %cst = arith.constant dense<0.000000e+00> : vector<2x256xf32>
    %4 = tpu.matmul %1, %3, %cst {dimension_numbers = #tpu.dot_dimension_numbers<[1], [0], [0], [1], [0, 0, 1, 1], [], []>} : vector<2x256xf32>, vector<256x256xf32>, vector<2x256xf32> -> vector<2x256xf32>
    %c0_5 = arith.constant 0 : index
    %c0_6 = arith.constant 0 : index
    %c0_7 = arith.constant 0 : index
    %5 = vector.load %arg3[%c0_5, %c0_6, %c0_7] : memref<1x2x256xf32, #tpu.memory_space<vmem>>, vector<1x2x256xf32>
    %6 = vector.shape_cast %5 : vector<1x2x256xf32> to vector<2x256xf32>
    %7 = vector.shape_cast %4 : vector<2x256xf32> to vector<1x2x256xf32>
    tpu.vector_store %arg3[%c0_5, %c0_6, %c0_7], %7 {strides = array<i32>} : memref<1x2x256xf32, #tpu.memory_space<vmem>>, vector<1x2x256xf32>,
    return
  }
  func.func @transform_0(%arg0: i32) -> (i32, i32, i32) {
    %c0_i32 = arith.constant 0 : i32
    %c0_i32_0 = arith.constant 0 : i32
    %c0_i32_1 = arith.constant 0 : i32
    return %arg0, %c0_i32, %c0_i32_0 : i32, i32, i32
  }
  func.func @transform_1(%arg0: i32) -> (i32, i32, i32) {
    %c0_i32 = arith.constant 0 : i32
    %c0_i32_0 = arith.constant 0 : i32
    %c0_i32_1 = arith.constant 0 : i32
    return %arg0, %c0_i32, %c0_i32_0 : i32, i32, i32
  }
  func.func @transform_2(%arg0: i32) -> (i32, i32, i32) {
    %c0_i32 = arith.constant 0 : i32
    %c0_i32_0 = arith.constant 0 : i32
    %c0_i32_1 = arith.constant 0 : i32
    return %arg0, %c0_i32, %c0_i32_0 : i32, i32, i32
  }
}

module attributes {stable_mosaic.version = 11 : i64} {
  func.func @_fourier_layer_kernel(%arg0: i32, %arg1: memref<32x256xf32, #tpu.memory_space<vmem>>, %arg2: memref<32x256xf32, #tpu.memory_space<vmem>>, %arg3: memref<32x32xbf16, #tpu.memory_space<vmem>>, %arg4: memref<32x1xf32, #tpu.memory_space<vmem>>, %arg5: memref<32x256xf32, #tpu.memory_space<vmem>>) attributes {dimension_semantics = [#tpu.dimension_semantics<parallel>], iteration_bounds = array<i64: 2>, scalar_prefetch = 0 : i64, scratch_operands = 0 : i64, tpu.core_type = #tpu.core_type<tc>, window_params = [{transform_indices = @transform_0, window_bounds = array<i64: 32, 256>}, {transform_indices = @transform_1, window_bounds = array<i64: 32, 256>}, {pipeline_mode = #tpu.pipeline_mode<synchronous>, transform_indices = @transform_2, window_bounds = array<i64: 32, 32>}, {pipeline_mode = #tpu.pipeline_mode<synchronous>, transform_indices = @transform_3, window_bounds = array<i64: 32, 1>}, {transform_indices = @transform_4, window_bounds = array<i64: 32, 256>}]} {
    %c0 = arith.constant 0 : index
    %c0_0 = arith.constant 0 : index
    %0 = vector.load %arg1[%c0, %c0_0] : memref<32x256xf32, #tpu.memory_space<vmem>>, vector<32x256xf32>
    %c0_1 = arith.constant 0 : index
    %c0_2 = arith.constant 0 : index
    %1 = vector.load %arg3[%c0_1, %c0_2] : memref<32x32xbf16, #tpu.memory_space<vmem>>, vector<32x32xbf16>
    %c0_3 = arith.constant 0 : index
    %c0_4 = arith.constant 0 : index
    %2 = vector.load %arg2[%c0_3, %c0_4] : memref<32x256xf32, #tpu.memory_space<vmem>>, vector<32x256xf32>
    %3 = arith.truncf %2 : vector<32x256xf32> to vector<32x256xbf16>
    %cst = arith.constant dense<0.000000e+00> : vector<32x256xf32>
    %4 = tpu.matmul %1, %3, %cst {dimension_numbers = #tpu.dot_dimension_numbers<[1], [0], [0], [1], [0, 0, 1, 1], [], []>} : vector<32x32xbf16>, vector<32x256xbf16>, vector<32x256xf32> -> vector<32x256xf32>
    %5 = arith.addf %0, %4 : vector<32x256xf32>
    %c0_5 = arith.constant 0 : index
    %c0_6 = arith.constant 0 : index
    %6 = vector.load %arg4[%c0_5, %c0_6] : memref<32x1xf32, #tpu.memory_space<vmem>>, vector<32x1xf32>
    %7 = vector.broadcast %6 : vector<32x1xf32> to vector<32x256xf32>
    %8 = arith.addf %5, %7 : vector<32x256xf32>
    %cst_7 = arith.constant 5.000000e-01 : f32
    %9 = vector.broadcast %cst_7 : f32 to vector<32x256xf32>
    %10 = arith.mulf %9, %8 : vector<32x256xf32>
    %cst_8 = arith.constant 0.707106769 : f32
    %11 = vector.broadcast %cst_8 : f32 to vector<32x256xf32>
    %12 = arith.mulf %8, %11 : vector<32x256xf32>
    %13 = math.absf %12 : vector<32x256xf32>
    %cst_9 = arith.constant 0.327591091 : f32
    %14 = vector.broadcast %cst_9 : f32 to vector<32x256xf32>
    %15 = arith.mulf %14, %13 : vector<32x256xf32>
    %cst_10 = arith.constant 1.000000e+00 : f32
    %16 = vector.broadcast %cst_10 : f32 to vector<32x256xf32>
    %17 = arith.addf %16, %15 : vector<32x256xf32>
    %18 = tpu.reciprocal %17 {approx = true} : vector<32x256xf32> -> vector<32x256xf32>
    %cst_11 = arith.constant 1.06140542 : f32
    %19 = vector.broadcast %cst_11 : f32 to vector<32x256xf32>
    %20 = arith.mulf %19, %18 : vector<32x256xf32>
    %cst_12 = arith.constant -1.45315206 : f32
    %21 = vector.broadcast %cst_12 : f32 to vector<32x256xf32>
    %22 = arith.addf %20, %21 : vector<32x256xf32>
    %23 = arith.mulf %22, %18 : vector<32x256xf32>
    %cst_13 = arith.constant 1.42141378 : f32
    %24 = vector.broadcast %cst_13 : f32 to vector<32x256xf32>
    %25 = arith.addf %23, %24 : vector<32x256xf32>
    %26 = arith.mulf %25, %18 : vector<32x256xf32>
    %cst_14 = arith.constant -0.284496725 : f32
    %27 = vector.broadcast %cst_14 : f32 to vector<32x256xf32>
    %28 = arith.addf %26, %27 : vector<32x256xf32>
    %29 = arith.mulf %28, %18 : vector<32x256xf32>
    %cst_15 = arith.constant 0.254829586 : f32
    %30 = vector.broadcast %cst_15 : f32 to vector<32x256xf32>
    %31 = arith.addf %29, %30 : vector<32x256xf32>
    %32 = arith.mulf %31, %18 : vector<32x256xf32>
    %cst_16 = arith.constant 0.000000e+00 : f32
    %33 = vector.broadcast %cst_16 : f32 to vector<32x256xf32>
    %34 = arith.subf %33, %13 : vector<32x256xf32>
    %35 = arith.mulf %34, %13 : vector<32x256xf32>
    %36 = math.exp %35 : vector<32x256xf32>
    %37 = arith.mulf %32, %36 : vector<32x256xf32>
    %cst_17 = arith.constant 1.000000e+00 : f32
    %38 = vector.broadcast %cst_17 : f32 to vector<32x256xf32>
    %39 = arith.subf %38, %37 : vector<32x256xf32>
    %cst_18 = arith.constant 0.000000e+00 : f32
    %40 = vector.broadcast %cst_18 : f32 to vector<32x256xf32>
    %41 = arith.cmpf olt, %12, %40 : vector<32x256xf32>
    %cst_19 = arith.constant 0.000000e+00 : f32
    %42 = vector.broadcast %cst_19 : f32 to vector<32x256xf32>
    %43 = arith.subf %42, %39 : vector<32x256xf32>
    %44 = arith.select %41, %43, %39 : vector<32x256xi1>, vector<32x256xf32>
    %cst_20 = arith.constant 1.000000e+00 : f32
    %45 = vector.broadcast %cst_20 : f32 to vector<32x256xf32>
    %46 = arith.addf %45, %44 : vector<32x256xf32>
    %47 = arith.mulf %10, %46 : vector<32x256xf32>
    %c0_21 = arith.constant 0 : index
    %c0_22 = arith.constant 0 : index
    %48 = vector.load %arg5[%c0_21, %c0_22] : memref<32x256xf32, #tpu.memory_space<vmem>>, vector<32x256xf32>
    tpu.vector_store %arg5[%c0_21, %c0_22], %47 {strides = array<i32>} : memref<32x256xf32, #tpu.memory_space<vmem>>, vector<32x256xf32>,
    return
  }
  func.func @transform_0(%arg0: i32) -> (i32, i32) {
    %c0_i32 = arith.constant 0 : i32
    %c0_i32_0 = arith.constant 0 : i32
    return %c0_i32, %arg0 : i32, i32
  }
  func.func @transform_1(%arg0: i32) -> (i32, i32) {
    %c0_i32 = arith.constant 0 : i32
    %c0_i32_0 = arith.constant 0 : i32
    return %c0_i32, %arg0 : i32, i32
  }
  func.func @transform_2(%arg0: i32) -> (i32, i32) {
    %c0_i32 = arith.constant 0 : i32
    %c0_i32_0 = arith.constant 0 : i32
    %c0_i32_1 = arith.constant 0 : i32
    return %c0_i32, %c0_i32_0 : i32, i32
  }
  func.func @transform_3(%arg0: i32) -> (i32, i32) {
    %c0_i32 = arith.constant 0 : i32
    %c0_i32_0 = arith.constant 0 : i32
    %c0_i32_1 = arith.constant 0 : i32
    return %c0_i32, %c0_i32_0 : i32, i32
  }
  func.func @transform_4(%arg0: i32) -> (i32, i32) {
    %c0_i32 = arith.constant 0 : i32
    %c0_i32_0 = arith.constant 0 : i32
    return %c0_i32, %arg0 : i32, i32
  }
}

module attributes {stable_mosaic.version = 11 : i64} {
  func.func @_fourier_layer_kernel(%arg0: i32, %arg1: memref<32x256xf32, #tpu.memory_space<vmem>>, %arg2: memref<32x256xf32, #tpu.memory_space<vmem>>, %arg3: memref<32x32xbf16, #tpu.memory_space<vmem>>, %arg4: memref<32x1xf32, #tpu.memory_space<vmem>>, %arg5: memref<32x256xf32, #tpu.memory_space<vmem>>) attributes {dimension_semantics = [#tpu.dimension_semantics<parallel>], iteration_bounds = array<i64: 2>, scalar_prefetch = 0 : i64, scratch_operands = 0 : i64, tpu.core_type = #tpu.core_type<tc>, window_params = [{transform_indices = @transform_0, window_bounds = array<i64: 32, 256>}, {transform_indices = @transform_1, window_bounds = array<i64: 32, 256>}, {pipeline_mode = #tpu.pipeline_mode<synchronous>, transform_indices = @transform_2, window_bounds = array<i64: 32, 32>}, {pipeline_mode = #tpu.pipeline_mode<synchronous>, transform_indices = @transform_3, window_bounds = array<i64: 32, 1>}, {transform_indices = @transform_4, window_bounds = array<i64: 32, 256>}]} {
    %c0 = arith.constant 0 : index
    %c0_0 = arith.constant 0 : index
    %0 = vector.load %arg1[%c0, %c0_0] : memref<32x256xf32, #tpu.memory_space<vmem>>, vector<32x256xf32>
    %c0_1 = arith.constant 0 : index
    %c0_2 = arith.constant 0 : index
    %1 = vector.load %arg3[%c0_1, %c0_2] : memref<32x32xbf16, #tpu.memory_space<vmem>>, vector<32x32xbf16>
    %c0_3 = arith.constant 0 : index
    %c0_4 = arith.constant 0 : index
    %2 = vector.load %arg2[%c0_3, %c0_4] : memref<32x256xf32, #tpu.memory_space<vmem>>, vector<32x256xf32>
    %3 = arith.truncf %2 : vector<32x256xf32> to vector<32x256xbf16>
    %cst = arith.constant dense<0.000000e+00> : vector<32x256xf32>
    %4 = tpu.matmul %1, %3, %cst {dimension_numbers = #tpu.dot_dimension_numbers<[1], [0], [0], [1], [0, 0, 1, 1], [], []>} : vector<32x32xbf16>, vector<32x256xbf16>, vector<32x256xf32> -> vector<32x256xf32>
    %5 = arith.addf %0, %4 : vector<32x256xf32>
    %c0_5 = arith.constant 0 : index
    %c0_6 = arith.constant 0 : index
    %6 = vector.load %arg4[%c0_5, %c0_6] : memref<32x1xf32, #tpu.memory_space<vmem>>, vector<32x1xf32>
    %7 = vector.broadcast %6 : vector<32x1xf32> to vector<32x256xf32>
    %8 = arith.addf %5, %7 : vector<32x256xf32>
    %c0_7 = arith.constant 0 : index
    %c0_8 = arith.constant 0 : index
    %9 = vector.load %arg5[%c0_7, %c0_8] : memref<32x256xf32, #tpu.memory_space<vmem>>, vector<32x256xf32>
    tpu.vector_store %arg5[%c0_7, %c0_8], %8 {strides = array<i32>} : memref<32x256xf32, #tpu.memory_space<vmem>>, vector<32x256xf32>,
    return
  }
  func.func @transform_0(%arg0: i32) -> (i32, i32) {
    %c0_i32 = arith.constant 0 : i32
    %c0_i32_0 = arith.constant 0 : i32
    return %c0_i32, %arg0 : i32, i32
  }
  func.func @transform_1(%arg0: i32) -> (i32, i32) {
    %c0_i32 = arith.constant 0 : i32
    %c0_i32_0 = arith.constant 0 : i32
    return %c0_i32, %arg0 : i32, i32
  }
  func.func @transform_2(%arg0: i32) -> (i32, i32) {
    %c0_i32 = arith.constant 0 : i32
    %c0_i32_0 = arith.constant 0 : i32
    %c0_i32_1 = arith.constant 0 : i32
    return %c0_i32, %c0_i32_0 : i32, i32
  }
  func.func @transform_3(%arg0: i32) -> (i32, i32) {
    %c0_i32 = arith.constant 0 : i32
    %c0_i32_0 = arith.constant 0 : i32
    %c0_i32_1 = arith.constant 0 : i32
    return %c0_i32, %c0_i32_0 : i32, i32
  }
  func.func @transform_4(%arg0: i32) -> (i32, i32) {
    %c0_i32 = arith.constant 0 : i32
    %c0_i32_0 = arith.constant 0 : i32
    return %c0_i32, %arg0 : i32, i32
  }
}

module attributes {stable_mosaic.version = 11 : i64} {
  func.func @_head_kernel(%arg0: i32, %arg1: memref<32x256xf32, #tpu.memory_space<vmem>>, %arg2: memref<128x32xbf16, #tpu.memory_space<vmem>>, %arg3: memref<128x1xf32, #tpu.memory_space<vmem>>, %arg4: memref<1x128xbf16, #tpu.memory_space<vmem>>, %arg5: memref<1x1xf32, #tpu.memory_space<vmem>>, %arg6: memref<1x256xf32, #tpu.memory_space<vmem>>) attributes {dimension_semantics = [#tpu.dimension_semantics<parallel>], iteration_bounds = array<i64: 2>, scalar_prefetch = 0 : i64, scratch_operands = 0 : i64, tpu.core_type = #tpu.core_type<tc>, window_params = [{transform_indices = @transform_0, window_bounds = array<i64: 32, 256>}, {pipeline_mode = #tpu.pipeline_mode<synchronous>, transform_indices = @transform_1, window_bounds = array<i64: 128, 32>}, {pipeline_mode = #tpu.pipeline_mode<synchronous>, transform_indices = @transform_2, window_bounds = array<i64: 128, 1>}, {pipeline_mode = #tpu.pipeline_mode<synchronous>, transform_indices = @transform_3, window_bounds = array<i64: 1, 128>}, {pipeline_mode = #tpu.pipeline_mode<synchronous>, transform_indices = @transform_4, window_bounds = array<i64: 1, 1>}, {transform_indices = @transform_5, window_bounds = array<i64: 1, 256>}]} {
    %c0 = arith.constant 0 : index
    %c0_0 = arith.constant 0 : index
    %0 = vector.load %arg2[%c0, %c0_0] : memref<128x32xbf16, #tpu.memory_space<vmem>>, vector<128x32xbf16>
    %c0_1 = arith.constant 0 : index
    %c0_2 = arith.constant 0 : index
    %1 = vector.load %arg1[%c0_1, %c0_2] : memref<32x256xf32, #tpu.memory_space<vmem>>, vector<32x256xf32>
    %2 = arith.truncf %1 : vector<32x256xf32> to vector<32x256xbf16>
    %cst = arith.constant dense<0.000000e+00> : vector<128x256xf32>
    %3 = tpu.matmul %0, %2, %cst {dimension_numbers = #tpu.dot_dimension_numbers<[1], [0], [0], [1], [0, 0, 1, 1], [], []>} : vector<128x32xbf16>, vector<32x256xbf16>, vector<128x256xf32> -> vector<128x256xf32>
    %c0_3 = arith.constant 0 : index
    %c0_4 = arith.constant 0 : index
    %4 = vector.load %arg3[%c0_3, %c0_4] : memref<128x1xf32, #tpu.memory_space<vmem>>, vector<128x1xf32>
    %5 = vector.broadcast %4 : vector<128x1xf32> to vector<128x256xf32>
    %6 = arith.addf %3, %5 : vector<128x256xf32>
    %cst_5 = arith.constant 5.000000e-01 : f32
    %7 = vector.broadcast %cst_5 : f32 to vector<128x256xf32>
    %8 = arith.mulf %7, %6 : vector<128x256xf32>
    %cst_6 = arith.constant 0.707106769 : f32
    %9 = vector.broadcast %cst_6 : f32 to vector<128x256xf32>
    %10 = arith.mulf %6, %9 : vector<128x256xf32>
    %11 = math.absf %10 : vector<128x256xf32>
    %cst_7 = arith.constant 0.327591091 : f32
    %12 = vector.broadcast %cst_7 : f32 to vector<128x256xf32>
    %13 = arith.mulf %12, %11 : vector<128x256xf32>
    %cst_8 = arith.constant 1.000000e+00 : f32
    %14 = vector.broadcast %cst_8 : f32 to vector<128x256xf32>
    %15 = arith.addf %14, %13 : vector<128x256xf32>
    %16 = tpu.reciprocal %15 {approx = true} : vector<128x256xf32> -> vector<128x256xf32>
    %cst_9 = arith.constant 1.06140542 : f32
    %17 = vector.broadcast %cst_9 : f32 to vector<128x256xf32>
    %18 = arith.mulf %17, %16 : vector<128x256xf32>
    %cst_10 = arith.constant -1.45315206 : f32
    %19 = vector.broadcast %cst_10 : f32 to vector<128x256xf32>
    %20 = arith.addf %18, %19 : vector<128x256xf32>
    %21 = arith.mulf %20, %16 : vector<128x256xf32>
    %cst_11 = arith.constant 1.42141378 : f32
    %22 = vector.broadcast %cst_11 : f32 to vector<128x256xf32>
    %23 = arith.addf %21, %22 : vector<128x256xf32>
    %24 = arith.mulf %23, %16 : vector<128x256xf32>
    %cst_12 = arith.constant -0.284496725 : f32
    %25 = vector.broadcast %cst_12 : f32 to vector<128x256xf32>
    %26 = arith.addf %24, %25 : vector<128x256xf32>
    %27 = arith.mulf %26, %16 : vector<128x256xf32>
    %cst_13 = arith.constant 0.254829586 : f32
    %28 = vector.broadcast %cst_13 : f32 to vector<128x256xf32>
    %29 = arith.addf %27, %28 : vector<128x256xf32>
    %30 = arith.mulf %29, %16 : vector<128x256xf32>
    %cst_14 = arith.constant 0.000000e+00 : f32
    %31 = vector.broadcast %cst_14 : f32 to vector<128x256xf32>
    %32 = arith.subf %31, %11 : vector<128x256xf32>
    %33 = arith.mulf %32, %11 : vector<128x256xf32>
    %34 = math.exp %33 : vector<128x256xf32>
    %35 = arith.mulf %30, %34 : vector<128x256xf32>
    %cst_15 = arith.constant 1.000000e+00 : f32
    %36 = vector.broadcast %cst_15 : f32 to vector<128x256xf32>
    %37 = arith.subf %36, %35 : vector<128x256xf32>
    %cst_16 = arith.constant 0.000000e+00 : f32
    %38 = vector.broadcast %cst_16 : f32 to vector<128x256xf32>
    %39 = arith.cmpf olt, %10, %38 : vector<128x256xf32>
    %cst_17 = arith.constant 0.000000e+00 : f32
    %40 = vector.broadcast %cst_17 : f32 to vector<128x256xf32>
    %41 = arith.subf %40, %37 : vector<128x256xf32>
    %42 = arith.select %39, %41, %37 : vector<128x256xi1>, vector<128x256xf32>
    %cst_18 = arith.constant 1.000000e+00 : f32
    %43 = vector.broadcast %cst_18 : f32 to vector<128x256xf32>
    %44 = arith.addf %43, %42 : vector<128x256xf32>
    %45 = arith.mulf %8, %44 : vector<128x256xf32>
    %46 = arith.truncf %45 : vector<128x256xf32> to vector<128x256xbf16>
    %c0_19 = arith.constant 0 : index
    %c0_20 = arith.constant 0 : index
    %47 = vector.load %arg4[%c0_19, %c0_20] : memref<1x128xbf16, #tpu.memory_space<vmem>>, vector<1x128xbf16>
    %cst_21 = arith.constant dense<0.000000e+00> : vector<1x256xf32>
    %48 = tpu.matmul %47, %46, %cst_21 {dimension_numbers = #tpu.dot_dimension_numbers<[1], [0], [0], [1], [0, 0, 1, 1], [], []>} : vector<1x128xbf16>, vector<128x256xbf16>, vector<1x256xf32> -> vector<1x256xf32>
    %c0_22 = arith.constant 0 : index
    %c0_23 = arith.constant 0 : index
    %49 = vector.load %arg5[%c0_22, %c0_23] : memref<1x1xf32, #tpu.memory_space<vmem>>, vector<1x1xf32>
    %50 = vector.broadcast %49 : vector<1x1xf32> to vector<1x256xf32>
    %51 = arith.addf %48, %50 : vector<1x256xf32>
    %c0_24 = arith.constant 0 : index
    %c0_25 = arith.constant 0 : index
    %52 = vector.load %arg6[%c0_24, %c0_25] : memref<1x256xf32, #tpu.memory_space<vmem>>, vector<1x256xf32>
    tpu.vector_store %arg6[%c0_24, %c0_25], %51 {strides = array<i32>} : memref<1x256xf32, #tpu.memory_space<vmem>>, vector<1x256xf32>,
    return
  }
  func.func @transform_0(%arg0: i32) -> (i32, i32) {
    %c0_i32 = arith.constant 0 : i32
    %c0_i32_0 = arith.constant 0 : i32
    return %c0_i32, %arg0 : i32, i32
  }
  func.func @transform_1(%arg0: i32) -> (i32, i32) {
    %c0_i32 = arith.constant 0 : i32
    %c0_i32_0 = arith.constant 0 : i32
    %c0_i32_1 = arith.constant 0 : i32
    return %c0_i32, %c0_i32_0 : i32, i32
  }
  func.func @transform_2(%arg0: i32) -> (i32, i32) {
    %c0_i32 = arith.constant 0 : i32
    %c0_i32_0 = arith.constant 0 : i32
    %c0_i32_1 = arith.constant 0 : i32
    return %c0_i32, %c0_i32_0 : i32, i32
  }
  func.func @transform_3(%arg0: i32) -> (i32, i32) {
    %c0_i32 = arith.constant 0 : i32
    %c0_i32_0 = arith.constant 0 : i32
    %c0_i32_1 = arith.constant 0 : i32
    return %c0_i32, %c0_i32_0 : i32, i32
  }
  func.func @transform_4(%arg0: i32) -> (i32, i32) {
    %c0_i32 = arith.constant 0 : i32
    %c0_i32_0 = arith.constant 0 : i32
    %c0_i32_1 = arith.constant 0 : i32
    return %c0_i32, %c0_i32_0 : i32, i32
  }
  func.func @transform_5(%arg0: i32) -> (i32, i32) {
    %c0_i32 = arith.constant 0 : i32
    %c0_i32_0 = arith.constant 0 : i32
    return %c0_i32, %arg0 : i32, i32
  }
}

</mosaic_0001>

<bundles_post_ra>
// kernel: fno2d_forward.10
= control target key start
LH: loop header
LB: loop body
LE: loop exit
PB: predicated region body
PF: predicated region fallthrough
CT: control target
= control target key end

     0   :  { %s601_s15 = smov 0   ;;  %s603_s16 = smov 0   ;;  %s700_s0 = inlined_call_operand.vmem [shape: f32[1,512], index: 0, kind: input, shape index: {}]   ;;  %s701_s1 = inlined_call_operand.vmem [shape: f32[2,512], index: 1, kind: input, shape index: {}]   ;;  %s702_s2 = inlined_call_operand.vmem [shape: f32[32,3], index: 2, kind: input, shape index: {}]   ;;  %s703_s3 = inlined_call_operand.vmem [shape: f32[32,1], index: 3, kind: input, shape index: {}]   ;;  %s704_s4 = inlined_call_operand.vmem [shape: f32[32,512], index: 4, kind: output, shape index: {}]  }
   0x1   :  { %s605_s17 = smov 0  }
   0x2 LB: > { %s614_s18 = sadd.s32 4294967295, %s571_s17   ;;  %s616_s19 = sadd.s32 1, %s571_s17   ;;  %s571_s17 = sphi %s605_s17, %s708_s17   ;;  %s567_s16 = sphi %s603_s16, %s707_s16   ;;  %s563_s15 = sphi %s601_s15, %s706_s15  }
   0x3   : > { %s112_s20 = ssub.s32 %s571_s17, %s616_s19  ;;  %s115_s21 = sadd.s32 1, %s567_s16 }
   0x4   : > { %p113_p0 = scmp.eq.s32.totalorder %s112_s20, 0  ;;  %p125_p1 = scmp.ne.s32.totalorder %s567_s16, %s563_s15 }
   0x5   : > { %p126_p2 = scmp.eq.s32.totalorder %s614_s18, 1  ;;  %p504_p3 = scmp.ge.s32.totalorder %s571_s17, 1 }
   0x6   : > { %s624_s22 = scalar_select %p113_p0, %s567_s16, %s115_s21  }
   0x7   : > { %p626_p4 = por %p126_p2, %p125_p1  ;;  %p173_p5 = scmp.lt.s32.totalorder %s571_s17, 3 }
   0x9   : > { %p174_p6 = pnand %p504_p3, %p173_p5 }
   0xa   : > { %s506_s14 = sshll.u32 (!%p174_p6), %s614_s18, 1  ;;  %s199_s28 = sand.u32 (!%p174_p6), 1, %s563_s15  }
   0xb   : > { %177 = sbr.rel (%p174_p6) target bundleno = 188 (0xbc), region = 36  ;;  %p203_p7 = scmp.lt.s32.totalorder (!%p174_p6), %s506_s14, 3 }
   0xc   : > { %s505_s29 = sshll.u32 (!%p174_p6), %s199_s28, 6 }
   0xd   : > { %s664_s15 = scalar_lea.vmem (!%p174_p6), [#allocation2], %s505_s29 }
  0x10   : > { %v218_v0 = vld [vmem:[%s702_s2 + $0x10] sm:$0xff]  ;;  %v216_v1 = vld [vmem:[%s702_s2] sm:$0xff]  ;;  %v573_v2 = vmov 1   ;;  %v574_v3 = vmov 0   ;;  %v219_v4 = vld [vmem:[%s702_s2 + $0x18] sm:$0xff]  ;;  %v575_v6 = vmov 2   ;;  %v241_v11 = vlaneseq }
  0x11   : > { %543 = vset.pattern.permute.xlu0 %v573_v2  ;;  %542 = vset.pattern.permute.xlu1 %v574_v3  ;;  %v217_v5 = vld [vmem:[%s702_s2 + $0x8] sm:$0xff]  ;;  %v360_v7 = vld [vmem:[%s703_s3] sm:$0xff]  ;;  %v363_v8 = vld [vmem:[%s703_s3 + $0x18] sm:$0xff]  ;;  %s710_s14 = smov (!%p203_p7, %s506_s14), 3  ;;  %s514_s30 = sshll.u32 (%p626_p4), %s614_s18, 4 }
  0x12   : > { %232 = vperm.xlu1 %542, %v218_v0   ;;  %260 = vperm.xlu0 %543, %v216_v1   ;;  %v361_v9 = vld [vmem:[%s703_s3 + $0x8] sm:$0xff]  ;;  %v362_v10 = vld [vmem:[%s703_s3 + $0x10] sm:$0xff]  ;;  %s508_s17 = sshll.u32 %s710_s14, 1  ;;  %v242_v14 = vshrl.u32 %v241_v11, 7  ;;  %s205_s27 = scalar_lea.vmem %s700_s0, %s710_s14 }
  0x13   : > { %s211_s24 = scalar_lea.vmem %s701_s1, %s508_s17  ;;  %v214_v24 = vld [vmem:[%s205_s27] sm:$0x3]  ;;  %s409_s7 = scalar_lea.vmem (%p626_p4), %s704_s4, %s514_s30 }
  0x14   : > { %v282_v17 = vsub.s32 2, %v242_v14  ;;  %v215_v18 = vld [vmem:[%s211_s24] sm:$0xf]  ;;  %v332_v19 = vsub.s32 3, %v242_v14  ;;  %v243_v20 = vsub.s32 0, %v242_v14  ;;  %v247_v21 = vsub.s32 1, %v242_v14 }
  0x16   : > { %237 = vperm.xlu1 %542, %v219_v4   ;;  %272 = vperm.xlu0 %543, %v219_v4   ;;  %v279_v25 = vrot.slane %v215_v18, %v243_v20  ;;  %v283_v26 = vrot.slane %v215_v18, %v282_v17  ;;  %v329_v27 = vrot.slane %v215_v18, %v247_v21 }
  0x17   : > { %v333_v28 = vrot.slane %v215_v18, %v332_v19  ;;  %v244_v29 = vrot.slane %v214_v24, %v243_v20  ;;  %v248_v30 = vrot.slane %v214_v24, %v247_v21 }
  0x18   : > { %v289_v32 = vrot.slane %v279_v25, %v243_v20  ;;  %v293_v33 = vrot.slane %v283_v26, %v243_v20  ;;  %v339_v35 = vrot.slane %v329_v27, %v247_v21 }
  0x19   : > { %v343_v36 = vrot.slane %v333_v28, %v247_v21 }
  0x1a   : > { %544 = vset.pattern.permute.xlu1 %v573_v2  ;;  %546 = vset.pattern.permute.xlu0 %v575_v6 }
  0x1b   : > { %264 = vperm.xlu1 %544, %v217_v5   ;;  %315 = vperm.xlu0 %546, %v217_v5  }
  0x1f   : > { %268 = vperm.xlu1 %544, %v218_v0   ;;  %547 = vset.pattern.permute.xlu0 %v574_v3 }
  0x20   : > { %222 = vperm.xlu0 %547, %v216_v1  }
  0x23   : > { %545 = vset.pattern.permute.xlu1 %v575_v6 }
  0x24   : > { %311 = vperm.xlu1 %545, %v216_v1   ;;  %227 = vperm.xlu0 %547, %v217_v5  }
  0x28   : > { %319 = vperm.xlu1 %545, %v218_v0   ;;  %366 = vperm.xlu0 %547, %v360_v7  }
  0x2c   : > { %323 = vperm.xlu1 %545, %v219_v4   ;;  %381 = vperm.xlu0 %547, %v363_v8  }
  0x30   : > { %548 = vset.pattern.permute.xlu1 %v574_v3 }
  0x31   : > { %371 = vperm.xlu1 %548, %v361_v9  }
  0x35   : > { %376 = vperm.xlu1 %548, %v362_v10  }
  0x8d   : > { %v655_v12 = vpop.permute.xlu1 %232  ;;  %v261_v13 = vpop.permute.xlu0 %260 }
  0x8e   : > { %v294_v39 = vmul.f32 %v289_v32, %v261_v13  ;;  %v295_v40 = vmul.f32 %v293_v33, %v261_v13  ;;  %v255_v8 = vmul.f32 %v244_v29, %v655_v12  ;;  %v256_v9 = vmul.f32 %v248_v30, %v655_v12 }
  0x91   : > { %v238_v15 = vpop.permute.xlu1 %237  ;;  %v273_v16 = vpop.permute.xlu0 %272 }
  0x92   : > { %v257_v49 = vmul.f32 %v244_v29, %v238_v15  ;;  %v258_v50 = vmul.f32 %v248_v30, %v238_v15  ;;  %v300_v55 = vmul.f32 %v289_v32, %v273_v16  ;;  %v301_v56 = vmul.f32 %v293_v33, %v273_v16 }
  0x94   : > { %v308_v0 = vadd.f32 %v300_v55, %v257_v49  ;;  %v309_v1 = vadd.f32 %v301_v56, %v258_v50 }
  0x96   : > { %v265_v22 = vpop.permute.xlu1 %264  ;;  %v316_v23 = vpop.permute.xlu0 %315 }
  0x97   : > { %v296_v59 = vmul.f32 %v289_v32, %v265_v22  ;;  %v297_v60 = vmul.f32 %v293_v33, %v265_v22  ;;  %v346_v4 = vmul.f32 %v339_v35, %v316_v23  ;;  %v347_v5 = vmul.f32 %v343_v36, %v316_v23 }
  0x9a   : > { %v269_v31 = vpop.permute.xlu1 %268 }
  0x9b   : > { %v223_v34 = vpop.permute.xlu0 %222  ;;  %v298_v6 = vmul.f32 %v289_v32, %v269_v31  ;;  %v299_v7 = vmul.f32 %v293_v33, %v269_v31 }
  0x9c   : > { %v251_v37 = vmul.f32 %v244_v29, %v223_v34  ;;  %v252_v38 = vmul.f32 %v248_v30, %v223_v34 }
  0x9d   : > { %v306_v21 = vadd.f32 %v298_v6, %v255_v8  ;;  %v307_v22 = vadd.f32 %v299_v7, %v256_v9 }
  0x9e   : > { %v302_v43 = vadd.f32 %v294_v39, %v251_v37  ;;  %v303_v44 = vadd.f32 %v295_v40, %v252_v38 }
  0x9f   : > { %v312_v41 = vpop.permute.xlu1 %311  ;;  %v228_v42 = vpop.permute.xlu0 %227 }
  0xa0   : > { %v344_v45 = vmul.f32 %v339_v35, %v312_v41  ;;  %v345_v46 = vmul.f32 %v343_v36, %v312_v41  ;;  %v253_v51 = vmul.f32 %v244_v29, %v228_v42  ;;  %v254_v52 = vmul.f32 %v248_v30, %v228_v42 }
  0xa2   : > { %v352_v47 = vadd.f32 %v344_v45, %v302_v43  ;;  %v353_v48 = vadd.f32 %v345_v46, %v303_v44  ;;  %v304_v61 = vadd.f32 %v296_v59, %v253_v51  ;;  %v305_v62 = vadd.f32 %v297_v60, %v254_v52 }
  0xa3   : > { %v320_v53 = vpop.permute.xlu1 %319  ;;  %v367_v54 = vpop.permute.xlu0 %366 }
  0xa4   : > { %v384_v57 = vadd.f32 %v367_v54, %v352_v47  ;;  %v385_v58 = vadd.f32 %v367_v54, %v353_v48  ;;  %v348_v13 = vmul.f32 %v339_v35, %v320_v53  ;;  %v349_v14 = vmul.f32 %v343_v36, %v320_v53 }
  0xa5   : > { %v354_v16 = vadd.f32 %v346_v4, %v304_v61  ;;  %v355_v17 = vadd.f32 %v347_v5, %v305_v62 }
  0xa6   : > { %392 = vst [vmem:[%s664_s15] sm:$0xff] %v384_v57  ;;  %393 = vst [vmem:[%s664_s15 + $0x8] sm:$0xff] %v385_v58  ;;  %v356_v12 = vadd.f32 %v348_v13, %v306_v21  ;;  %v357_v25 = vadd.f32 %v349_v14, %v307_v22 }
  0xa7   : > { %v324_v63 = vpop.permute.xlu1 %323  ;;  %v382_v15 = vpop.permute.xlu0 %381 }
  0xa8   : > { %v350_v2 = vmul.f32 %v339_v35, %v324_v63  ;;  %v351_v3 = vmul.f32 %v343_v36, %v324_v63 }
  0xaa   : > { %v358_v10 = vadd.f32 %v350_v2, %v308_v0  ;;  %v359_v11 = vadd.f32 %v351_v3, %v309_v1 }
  0xac   : > { %v390_v18 = vadd.f32 %v382_v15, %v358_v10  ;;  %v391_v19 = vadd.f32 %v382_v15, %v359_v11  ;;  %v372_v20 = vpop.permute.xlu1 %371 }
  0xad   : > { %v386_v23 = vadd.f32 %v372_v20, %v354_v16  ;;  %v387_v24 = vadd.f32 %v372_v20, %v355_v17  ;;  %v422_v29 = vld [vmem:[%s664_s15] sm:$0xff] (%p626_p4)  ;;  %v424_v30 = vld [vmem:[%s664_s15 + $0x8] sm:$0xff] (%p626_p4) }
  0xae   : > { %398 = vst [vmem:[%s664_s15 + $0x30] sm:$0xff] %v390_v18  ;;  %399 = vst [vmem:[%s664_s15 + $0x38] sm:$0xff] %v391_v19 }
  0xaf   : > { %394 = vst [vmem:[%s664_s15 + $0x10] sm:$0xff] %v386_v23  ;;  %395 = vst [vmem:[%s664_s15 + $0x18] sm:$0xff] %v387_v24  ;;  %406 = sbr.rel (!%p626_p4) target bundleno = 188 (0xbc), region = 40 }
  0xb0   : > { %v377_v26 = vpop.permute.xlu1 %376  ;;  %423 = vst [vmem:[%s409_s7] sm:$0xff] (%p626_p4), %v422_v29  ;;  %425 = vst [vmem:[%s409_s7 + $0x8] sm:$0xff] (%p626_p4), %v424_v30 }
  0xb1   : > { %v388_v27 = vadd.f32 %v377_v26, %v356_v12  ;;  %v389_v28 = vadd.f32 %v377_v26, %v357_v25 }
  0xb3   : > { %396 = vst [vmem:[%s664_s15 + $0x20] sm:$0xff] %v388_v27  ;;  %397 = vst [vmem:[%s664_s15 + $0x28] sm:$0xff] %v389_v28 }
  0xb5   : > { %v434_v35 = vld [vmem:[%s664_s15 + $0x30] sm:$0xff]  ;;  %v436_v36 = vld [vmem:[%s664_s15 + $0x38] sm:$0xff] }
  0xb6   : > { %v426_v31 = vld [vmem:[%s664_s15 + $0x10] sm:$0xff]  ;;  %v428_v32 = vld [vmem:[%s664_s15 + $0x18] sm:$0xff]  ;;  %435 = vst [vmem:[%s409_s7 + $0x60] sm:$0xff] %v434_v35  ;;  %437 = vst [vmem:[%s409_s7 + $0x68] sm:$0xff] %v436_v36 }
  0xb7   : > { %427 = vst [vmem:[%s409_s7 + $0x20] sm:$0xff] %v426_v31  ;;  %429 = vst [vmem:[%s409_s7 + $0x28] sm:$0xff] %v428_v32 }
  0xba   : > { %v430_v33 = vld [vmem:[%s664_s15 + $0x20] sm:$0xff]  ;;  %v432_v34 = vld [vmem:[%s664_s15 + $0x28] sm:$0xff] }
  0xbb   : > { %431 = vst [vmem:[%s409_s7 + $0x40] sm:$0xff] %v430_v33  ;;  %433 = vst [vmem:[%s409_s7 + $0x48] sm:$0xff] %v432_v34 }
  0xbc PF: > { %p11_p8 = scmp.ge.s32.totalorder %s616_s19, 4   ;;  %s706_s15 = smov %s567_s16 }
  0xbd   : > { %s707_s16 = smov %s624_s22  ;;  %s708_s17 = smov %s616_s19 }
  0xbe   :  { %13 = sbr.rel (!%p11_p8) target bundleno = 2 (0x2), region = 92 }

// kernel: fno2d_forward.11
= control target key start
LH: loop header
LB: loop body
LE: loop exit
PB: predicated region body
PF: predicated region fallthrough
CT: control target
= control target key end

     0   :  { %s439_s9 = smov 0   ;;  %s538_s0 = inlined_call_operand.vmem [shape: f32[8,2,256], index: 0, kind: input, shape index: {}]   ;;  %s539_s1 = inlined_call_operand.vmem [shape: f32[8,256,256], index: 1, kind: input, shape index: {}]   ;;  %s540_s2 = inlined_call_operand.vmem [shape: f32[8,2,256], index: 2, kind: output, shape index: {}]  }
   0x1 LB: > { %s390_s10 = sadd.s32 4294967295, %s422_s9   ;;  %p394_p0 = scmp.ge.s32.totalorder %s422_s9, 1  ;;  %s422_s9 = sphi %s439_s9, %s12_s9  }
   0x2   : > { %p122_p1 = scmp.lt.s32.totalorder %s422_s9, 9 }
   0x4   : > { %p123_p2 = pnand %p394_p0, %p122_p1 }
   0x5   : > { %p149_p3 = scmp.lt.s32.totalorder (!%p123_p2), %s390_s10, 7 }
   0x6   : > { %126 = sbr.rel (%p123_p2) target bundleno = 277 (0x115), region = 28 }
   0xb   : > { %s542_s10 = smov (!%p149_p3, %s390_s10), 7 }
   0xc   : > { %s406_s11 = sshll.u32 %s542_s10, 9  ;;  %s405_s15 = sshll.u32 %s542_s10, 2 }
   0xd   : > { %s453_s14 = scalar_lea.vmem %s539_s1, %s406_s11  ;;  %s153_s18 = scalar_lea.vmem %s538_s0, %s405_s15 }
   0xe   : > { %v196_v0 = vld [vmem:[%s453_s14 + $0xf8] sm:$0xff]  ;;  %v195_v1 = vld [vmem:[%s453_s14 + $0xf0] sm:$0xff]  ;;  %v194_v2 = vld [vmem:[%s453_s14 + $0xe8] sm:$0xff]  ;;  %s163_s21 = scalar_lea.vmem %s540_s2, %s405_s15 }
   0xf   : > { %240 = vmatprep.subr.mxu0 %v196_v0  ;;  %v193_v3 = vld [vmem:[%s453_s14 + $0xe0] sm:$0xff]  ;;  %v192_v4 = vld [vmem:[%s453_s14 + $0xd8] sm:$0xff]  ;;  %v191_v5 = vld [vmem:[%s453_s14 + $0xd0] sm:$0xff] }
  0x10   : > { %241 = vmatpush1.msra.mxu0 %v195_v1  ;;  %v190_v6 = vld [vmem:[%s453_s14 + $0xc8] sm:$0xff]  ;;  %v189_v7 = vld [vmem:[%s453_s14 + $0xc0] sm:$0xff]  ;;  %v188_v8 = vld [vmem:[%s453_s14 + $0xb8] sm:$0xff] }
  0x11   : > { %242 = vmatprep.subr.mxu0 %v194_v2  ;;  %v187_v9 = vld [vmem:[%s453_s14 + $0xb0] sm:$0xff]  ;;  %v186_v10 = vld [vmem:[%s453_s14 + $0xa8] sm:$0xff]  ;;  %v185_v11 = vld [vmem:[%s453_s14 + $0xa0] sm:$0xff] }
  0x12   : > { %243 = vmatpush1.msra.mxu0 %v193_v3  ;;  %v184_v12 = vld [vmem:[%s453_s14 + $0x98] sm:$0xff]  ;;  %v183_v13 = vld [vmem:[%s453_s14 + $0x90] sm:$0xff]  ;;  %v182_v14 = vld [vmem:[%s453_s14 + $0x88] sm:$0xff] }
  0x13   : > { %244 = vmatprep.subr.mxu0 %v192_v4  ;;  %v181_v15 = vld [vmem:[%s453_s14 + $0x80] sm:$0xff]  ;;  %v180_v16 = vld [vmem:[%s453_s14 + $0x78] sm:$0xff]  ;;  %v179_v17 = vld [vmem:[%s453_s14 + $0x70] sm:$0xff] }
  0x14   : > { %245 = vmatpush1.msra.mxu0 %v191_v5  ;;  %v178_v18 = vld [vmem:[%s453_s14 + $0x68] sm:$0xff]  ;;  %v177_v19 = vld [vmem:[%s453_s14 + $0x60] sm:$0xff]  ;;  %v176_v20 = vld [vmem:[%s453_s14 + $0x58] sm:$0xff] }
  0x15   : > { %246 = vmatprep.subr.mxu0 %v190_v6  ;;  %v175_v21 = vld [vmem:[%s453_s14 + $0x50] sm:$0xff]  ;;  %v174_v22 = vld [vmem:[%s453_s14 + $0x48] sm:$0xff]  ;;  %v173_v23 = vld [vmem:[%s453_s14 + $0x40] sm:$0xff] }
  0x16   : > { %247 = vmatpush1.msra.mxu0 %v189_v7  ;;  %v485_v24 = vld.sshfl [vmem:[%s153_s18] sm:$0x33 pattern:$0x76325410]  ;;  %v172_v25 = vld [vmem:[%s453_s14 + $0x38] sm:$0xff]  ;;  %v171_v27 = vld [vmem:[%s453_s14 + $0x30] sm:$0xff] }
  0x17   : > { %248 = vmatprep.subr.mxu0 %v188_v8  ;;  %v237_v26 = vcombine.high %v485_v24, %v485_v24  ;;  %v170_v28 = vld [vmem:[%s453_s14 + $0x28] sm:$0xff]  ;;  %v169_v29 = vld [vmem:[%s453_s14 + $0x20] sm:$0xff]  ;;  %v168_v30 = vld [vmem:[%s453_s14 + $0x18] sm:$0xff] }
  0x18   : > { %249 = vmatpush1.msra.mxu0 %v187_v9  ;;  %v167_v31 = vld [vmem:[%s453_s14 + $0x10] sm:$0xff]  ;;  %v166_v32 = vld [vmem:[%s453_s14 + $0x8] sm:$0xff]  ;;  %v165_v33 = vld [vmem:[%s453_s14] sm:$0xff] }
  0x19   : > { %250 = vmatprep.subr.mxu0 %v186_v10  ;;  %304 = vmatprep.mubr.f32.mxu0 %v237_v26  ;;  %v228_v34 = vld [vmem:[%s453_s14 + $0x1f8] sm:$0xff]  ;;  %v227_v35 = vld [vmem:[%s453_s14 + $0x1f0] sm:$0xff]  ;;  %v226_v36 = vld [vmem:[%s453_s14 + $0x1e8] sm:$0xff] }
  0x1a   : > { %251 = vmatpush1.msra.mxu0 %v185_v11  ;;  %v225_v37 = vld [vmem:[%s453_s14 + $0x1e0] sm:$0xff]  ;;  %v224_v38 = vld [vmem:[%s453_s14 + $0x1d8] sm:$0xff]  ;;  %v223_v39 = vld [vmem:[%s453_s14 + $0x1d0] sm:$0xff] }
  0x1b   : > { %252 = vmatprep.subr.mxu0 %v184_v12  ;;  %v222_v40 = vld [vmem:[%s453_s14 + $0x1c8] sm:$0xff]  ;;  %v221_v41 = vld [vmem:[%s453_s14 + $0x1c0] sm:$0xff]  ;;  %v220_v42 = vld [vmem:[%s453_s14 + $0x1b8] sm:$0xff] }
  0x1c   : > { %253 = vmatpush1.msra.mxu0 %v183_v13  ;;  %v219_v43 = vld [vmem:[%s453_s14 + $0x1b0] sm:$0xff]  ;;  %v218_v44 = vld [vmem:[%s453_s14 + $0x1a8] sm:$0xff]  ;;  %v217_v45 = vld [vmem:[%s453_s14 + $0x1a0] sm:$0xff] }
  0x1d   : > { %254 = vmatprep.subr.mxu0 %v182_v14  ;;  %v216_v46 = vld [vmem:[%s453_s14 + $0x198] sm:$0xff]  ;;  %v215_v47 = vld [vmem:[%s453_s14 + $0x190] sm:$0xff]  ;;  %v214_v48 = vld [vmem:[%s453_s14 + $0x188] sm:$0xff] }
  0x1e   : > { %255 = vmatpush1.msra.mxu0 %v181_v15  ;;  %v213_v49 = vld [vmem:[%s453_s14 + $0x180] sm:$0xff]  ;;  %v212_v50 = vld [vmem:[%s453_s14 + $0x178] sm:$0xff]  ;;  %v211_v51 = vld [vmem:[%s453_s14 + $0x170] sm:$0xff] }
  0x1f   : > { %256 = vmatprep.subr.mxu0 %v180_v16  ;;  %v210_v52 = vld [vmem:[%s453_s14 + $0x168] sm:$0xff]  ;;  %v209_v53 = vld [vmem:[%s453_s14 + $0x160] sm:$0xff]  ;;  %v208_v54 = vld [vmem:[%s453_s14 + $0x158] sm:$0xff] }
  0x20   : > { %257 = vmatpush1.msra.mxu0 %v179_v17  ;;  %v207_v55 = vld [vmem:[%s453_s14 + $0x150] sm:$0xff]  ;;  %v206_v56 = vld [vmem:[%s453_s14 + $0x148] sm:$0xff]  ;;  %v205_v57 = vld [vmem:[%s453_s14 + $0x140] sm:$0xff] }
  0x21   : > { %258 = vmatprep.subr.mxu0 %v178_v18  ;;  %v204_v58 = vld [vmem:[%s453_s14 + $0x138] sm:$0xff]  ;;  %v203_v59 = vld [vmem:[%s453_s14 + $0x130] sm:$0xff]  ;;  %v202_v60 = vld [vmem:[%s453_s14 + $0x128] sm:$0xff] }
  0x22   : > { %259 = vmatpush1.msra.mxu0 %v177_v19  ;;  %v201_v61 = vld [vmem:[%s453_s14 + $0x120] sm:$0xff]  ;;  %v200_v62 = vld [vmem:[%s453_s14 + $0x118] sm:$0xff]  ;;  %v199_v63 = vld [vmem:[%s453_s14 + $0x110] sm:$0xff] }
  0x23   : > { %260 = vmatprep.subr.mxu0 %v176_v20  ;;  %v198_v0 = vld [vmem:[%s453_s14 + $0x108] sm:$0xff]  ;;  %v197_v1 = vld [vmem:[%s453_s14 + $0x100] sm:$0xff] }
  0x24   : > { %261 = vmatpush1.msra.mxu0 %v175_v21 }
  0x25   : > { %262 = vmatprep.subr.mxu0 %v174_v22 }
  0x26   : > { %263 = vmatpush1.msra.mxu0 %v173_v23 }
  0x27   : > { %264 = vmatprep.subr.mxu0 %v172_v25 }
  0x28   : > { %265 = vmatpush1.msra.mxu0 %v171_v27 }
  0x29   : > { %266 = vmatprep.subr.mxu0 %v170_v28 }
  0x2a   : > { %267 = vmatpush1.msra.mxu0 %v169_v29 }
  0x2b   : > { %268 = vmatprep.subr.mxu0 %v168_v30 }
  0x2c   : > { %269 = vmatpush1.msra.mxu0 %v167_v31 }
  0x2d   : > { %270 = vmatprep.subr.mxu0 %v166_v32 }
  0x2e   : > { %271 = vmatpush1.msra.mxu0 %v165_v33 }
  0x2f   : > { %272 = vmatprep.subr.mxu0 %v228_v34 }
  0x30   : > { %273 = vmatpush2.msra.mxu0 %v227_v35 }
  0x31   : > { %274 = vmatprep.subr.mxu0 %v226_v36 }
  0x32   : > { %275 = vmatpush2.msra.mxu0 %v225_v37 }
  0x33   : > { %276 = vmatprep.subr.mxu0 %v224_v38 }
  0x34   : > { %277 = vmatpush2.msra.mxu0 %v223_v39 }
  0x35   : > { %278 = vmatprep.subr.mxu0 %v222_v40 }
  0x36   : > { %279 = vmatpush2.msra.mxu0 %v221_v41 }
  0x37   : > { %280 = vmatprep.subr.mxu0 %v220_v42 }
  0x38   : > { %281 = vmatpush2.msra.mxu0 %v219_v43 }
  0x39   : > { %282 = vmatprep.subr.mxu0 %v218_v44 }
  0x3a   : > { %283 = vmatpush2.msra.mxu0 %v217_v45 }
  0x3b   : > { %284 = vmatprep.subr.mxu0 %v216_v46 }
  0x3c   : > { %285 = vmatpush2.msra.mxu0 %v215_v47 }
  0x3d   : > { %286 = vmatprep.subr.mxu0 %v214_v48 }
  0x3e   : > { %287 = vmatpush2.msra.mxu0 %v213_v49 }
  0x3f   : > { %288 = vmatprep.subr.mxu0 %v212_v50 }
  0x40   : > { %289 = vmatpush2.msra.mxu0 %v211_v51 }
  0x41   : > { %290 = vmatprep.subr.mxu0 %v210_v52 }
  0x42   : > { %291 = vmatpush2.msra.mxu0 %v209_v53 }
  0x43   : > { %292 = vmatprep.subr.mxu0 %v208_v54 }
  0x44   : > { %293 = vmatpush2.msra.mxu0 %v207_v55 }
  0x45   : > { %294 = vmatprep.subr.mxu0 %v206_v56 }
  0x46   : > { %295 = vmatpush2.msra.mxu0 %v205_v57 }
  0x47   : > { %296 = vmatprep.subr.mxu0 %v204_v58 }
  0x48   : > { %297 = vmatpush2.msra.mxu0 %v203_v59 }
  0x49   : > { %298 = vmatprep.subr.mxu0 %v202_v60 }
  0x4a   : > { %299 = vmatpush2.msra.mxu0 %v201_v61 }
  0x4b   : > { %300 = vmatprep.subr.mxu0 %v200_v62 }
  0x4c   : > { %301 = vmatpush2.msra.mxu0 %v199_v63 }
  0x4d   : > { %302 = vmatprep.subr.mxu0 %v198_v0 }
  0x4e   : > { %303 = vmatpush2.msra.mxu0 %v197_v1 }
  0x4f   : > { %305 = vmatmul.mubr.f32.vlgmr.msra.gmra.mxu0 %v485_v24 }
 0x10f   : > { %v306_v2 = vpop.f32.mrf.mxu0 }
 0x111   : > { %v308_v3 = vpop.f32.mrf.mxu0 }
 0x112   : > { %v313_v4 = vcombine.low %v306_v2, %v308_v3 }
 0x114   : > { %402 = vst.sshfl [vmem:[%s163_s21] sm:$0x33 pattern:$0x76325410] %v313_v4 }
 0x115 PF: > { %s12_s9 = sadd.s32 1, %s422_s9  }
 0x116   : > { %p9_p4 = scmp.ge.s32.totalorder %s12_s9, 10  }
 0x118   :  { %11 = sbr.rel (!%p9_p4) target bundleno = 1 (0x1), region = 61 }

// kernel: reverse.8
= control target key start
LH: loop header
LB: loop body
LE: loop exit
PB: predicated region body
PF: predicated region fallthrough
CT: control target
= control target key end

     0   :  { %s344_s0 = inlined_call_operand.vmem [shape: f32[32,2,16,7], index: 0, kind: input, shape index: {}]   ;;  %s345_s1 = inlined_call_operand.vmem [shape: f32[32,2,16,7], index: 1, kind: output, shape index: {}]  }
   0x1   :  { %v112_v0 = vld [vmem:[%s344_s0 + $0x60] sm:$0xff]  ;;  %v113_v1 = vld [vmem:[%s344_s0 + $0xd0] sm:$0xff]  ;;  %v138_v14 = vld [vmem:[%s344_s0 + $0x68] sm:$0xff] }
   0x2   :  { %v115_v2 = vld [vmem:[%s344_s0 + $0x50] sm:$0xff]  ;;  %4 = vst [vmem:[%s345_s1] sm:$0xff] %v112_v0  ;;  %114 = vst [vmem:[%s345_s1 + $0x70] sm:$0xff] %v113_v1  ;;  %v117_v3 = vld [vmem:[%s344_s0 + $0xc0] sm:$0xff] }
   0x3   :  { %116 = vst [vmem:[%s345_s1 + $0x10] sm:$0xff] %v115_v2  ;;  %v119_v4 = vld [vmem:[%s344_s0 + $0x40] sm:$0xff]  ;;  %v121_v5 = vld [vmem:[%s344_s0 + $0xb0] sm:$0xff]  ;;  %118 = vst [vmem:[%s345_s1 + $0x80] sm:$0xff] %v117_v3 }
   0x4   :  { %120 = vst [vmem:[%s345_s1 + $0x20] sm:$0xff] %v119_v4  ;;  %122 = vst [vmem:[%s345_s1 + $0x90] sm:$0xff] %v121_v5  ;;  %v123_v6 = vld [vmem:[%s344_s0 + $0x30] sm:$0xff]  ;;  %v125_v7 = vld [vmem:[%s344_s0 + $0xa0] sm:$0xff] }
   0x5   :  { %v127_v8 = vld [vmem:[%s344_s0 + $0x20] sm:$0xff]  ;;  %124 = vst [vmem:[%s345_s1 + $0x30] sm:$0xff] %v123_v6  ;;  %126 = vst [vmem:[%s345_s1 + $0xa0] sm:$0xff] %v125_v7  ;;  %v129_v9 = vld [vmem:[%s344_s0 + $0x90] sm:$0xff] }
   0x6   :  { %128 = vst [vmem:[%s345_s1 + $0x40] sm:$0xff] %v127_v8  ;;  %v131_v10 = vld [vmem:[%s344_s0 + $0x10] sm:$0xff]  ;;  %v133_v11 = vld [vmem:[%s344_s0 + $0x80] sm:$0xff]  ;;  %130 = vst [vmem:[%s345_s1 + $0xb0] sm:$0xff] %v129_v9 }
   0x7   :  { %132 = vst [vmem:[%s345_s1 + $0x50] sm:$0xff] %v131_v10  ;;  %134 = vst [vmem:[%s345_s1 + $0xc0] sm:$0xff] %v133_v11  ;;  %v49_v12 = vld [vmem:[%s344_s0] sm:$0xff]  ;;  %v136_v13 = vld [vmem:[%s344_s0 + $0x70] sm:$0xff] }
   0x8   :  { %135 = vst [vmem:[%s345_s1 + $0x60] sm:$0xff] %v49_v12  ;;  %137 = vst [vmem:[%s345_s1 + $0xd0] sm:$0xff] %v136_v13  ;;  %v140_v15 = vld [vmem:[%s344_s0 + $0xd8] sm:$0xff]  ;;  %v144_v17 = vld [vmem:[%s344_s0 + $0xc8] sm:$0xff] }
   0x9   :  { %139 = vst [vmem:[%s345_s1 + $0x8] sm:$0xff] %v138_v14  ;;  %v142_v16 = vld [vmem:[%s344_s0 + $0x58] sm:$0xff]  ;;  %141 = vst [vmem:[%s345_s1 + $0x78] sm:$0xff] %v140_v15  ;;  %v146_v18 = vld [vmem:[%s344_s0 + $0x48] sm:$0xff] }
   0xa   :  { %143 = vst [vmem:[%s345_s1 + $0x18] sm:$0xff] %v142_v16  ;;  %145 = vst [vmem:[%s345_s1 + $0x88] sm:$0xff] %v144_v17  ;;  %v148_v19 = vld [vmem:[%s344_s0 + $0xb8] sm:$0xff]  ;;  %v152_v21 = vld [vmem:[%s344_s0 + $0xa8] sm:$0xff] }
   0xb   :  { %v150_v20 = vld [vmem:[%s344_s0 + $0x38] sm:$0xff]  ;;  %147 = vst [vmem:[%s345_s1 + $0x28] sm:$0xff] %v146_v18  ;;  %149 = vst [vmem:[%s345_s1 + $0x98] sm:$0xff] %v148_v19  ;;  %v154_v22 = vld [vmem:[%s344_s0 + $0x28] sm:$0xff] }
   0xc   :  { %151 = vst [vmem:[%s345_s1 + $0x38] sm:$0xff] %v150_v20  ;;  %v156_v23 = vld [vmem:[%s344_s0 + $0x98] sm:$0xff]  ;;  %153 = vst [vmem:[%s345_s1 + $0xa8] sm:$0xff] %v152_v21  ;;  %v160_v25 = vld [vmem:[%s344_s0 + $0x88] sm:$0xff] }
   0xd   :  { %155 = vst [vmem:[%s345_s1 + $0x48] sm:$0xff] %v154_v22  ;;  %157 = vst [vmem:[%s345_s1 + $0xb8] sm:$0xff] %v156_v23  ;;  %v158_v24 = vld [vmem:[%s344_s0 + $0x18] sm:$0xff]  ;;  %v162_v26 = vld [vmem:[%s344_s0 + $0x8] sm:$0xff] }
   0xe   :  { %159 = vst [vmem:[%s345_s1 + $0x58] sm:$0xff] %v158_v24  ;;  %161 = vst [vmem:[%s345_s1 + $0xc8] sm:$0xff] %v160_v25  ;;  %v164_v27 = vld [vmem:[%s344_s0 + $0x78] sm:$0xff] }
   0xf   :  { %163 = vst [vmem:[%s345_s1 + $0x68] sm:$0xff] %v162_v26  ;;  %165 = vst [vmem:[%s345_s1 + $0xd8] sm:$0xff] %v164_v27 }

// kernel: fno2d_forward.12
= control target key start
LH: loop header
LB: loop body
LE: loop exit
PB: predicated region body
PF: predicated region fallthrough
CT: control target
= control target key end

     0   :  { %s890_s15 = smov 0   ;;  %s892_s16 = smov 0   ;;  %s1151_s0 = inlined_call_operand.vmem [shape: f32[32,512], index: 0, kind: input, shape index: {}]   ;;  %s1152_s1 = inlined_call_operand.vmem [shape: f32[32,512], index: 1, kind: input, shape index: {}]   ;;  %s1153_s2 = inlined_call_operand.vmem [shape: bf16[32,32], index: 2, kind: input, shape index: {}]   ;;  %s1154_s3 = inlined_call_operand.vmem [shape: f32[32,1], index: 3, kind: input, shape index: {}]   ;;  %s1155_s4 = inlined_call_operand.vmem [shape: f32[32,512], index: 4, kind: output, shape index: {}]  }
   0x1   :  { %s894_s17 = smov 0  }
   0x2 LB: > { %s749_s18 = sadd.s32 4294967295, %s862_s17   ;;  %s907_s19 = sadd.s32 1, %s862_s17   ;;  %s862_s17 = sphi %s894_s17, %s1160_s17   ;;  %s858_s16 = sphi %s892_s16, %s1159_s16   ;;  %s854_s15 = sphi %s890_s15, %s1158_s15  }
   0x3   : > { %s18_s20 = ssub.s32 %s862_s17, %s907_s19  ;;  %s21_s21 = sadd.s32 1, %s858_s16 }
   0x4   : > { %p19_p0 = scmp.eq.s32.totalorder %s18_s20, 0  ;;  %p28_p1 = scmp.ne.s32.totalorder %s858_s16, %s854_s15 }
   0x5   : > { %p29_p2 = scmp.eq.s32.totalorder %s862_s17, 0  ;;  %p126_p3 = scmp.eq.s32.totalorder %s749_s18, 1 }
   0x6   : > { %s918_s22 = scalar_select %p19_p0, %s858_s16, %s21_s21  }
   0x7   : > { %p920_p4 = por %p29_p2, %p28_p1  ;;  %p924_p5 = por %p126_p3, %p28_p1 }
   0x8   : > { %p752_p6 = scmp.ge.s32.totalorder %s862_s17, 2 }
   0xa   : > { %154 = sbr.rel (%p752_p6) target bundleno = 31 (0x1f), region = 24 }
   0xf   : > { %157 = sbr.rel (!%p920_p4) target bundleno = 23 (0x17), region = 28  ;;  %s159_s25 = sand.u32 (%p920_p4), 1, %s858_s16  }
  0x10   : > { %s772_s26 = sshll.u32 (%p920_p4), %s862_s17, 4  ;;  %s753_s27 = sshll.u32 (%p920_p4), %s159_s25, 6 }
  0x11   : > { %s164_s30 = scalar_lea.vmem (%p920_p4), %s1151_s0, %s772_s26  ;;  %s161_s5 = scalar_lea.vmem (%p920_p4), [#allocation2], %s753_s27 }
  0x12   : > { %v177_v0 = vld [vmem:[%s164_s30] sm:$0xff] (%p920_p4)  ;;  %v179_v1 = vld [vmem:[%s164_s30 + $0x8] sm:$0xff] (%p920_p4) }
  0x13   : > { %v181_v2 = vld [vmem:[%s164_s30 + $0x20] sm:$0xff] (%p920_p4)  ;;  %178 = vst [vmem:[%s161_s5] sm:$0xff] (%p920_p4), %v177_v0  ;;  %180 = vst [vmem:[%s161_s5 + $0x8] sm:$0xff] (%p920_p4), %v179_v1  ;;  %v183_v3 = vld [vmem:[%s164_s30 + $0x28] sm:$0xff] (%p920_p4) }
  0x14   : > { %182 = vst [vmem:[%s161_s5 + $0x10] sm:$0xff] %v181_v2  ;;  %v185_v4 = vld [vmem:[%s164_s30 + $0x40] sm:$0xff]  ;;  %v187_v5 = vld [vmem:[%s164_s30 + $0x48] sm:$0xff]  ;;  %184 = vst [vmem:[%s161_s5 + $0x18] sm:$0xff] %v183_v3 }
  0x15   : > { %186 = vst [vmem:[%s161_s5 + $0x20] sm:$0xff] %v185_v4  ;;  %188 = vst [vmem:[%s161_s5 + $0x28] sm:$0xff] %v187_v5  ;;  %v189_v6 = vld [vmem:[%s164_s30 + $0x60] sm:$0xff]  ;;  %v191_v7 = vld [vmem:[%s164_s30 + $0x68] sm:$0xff] }
  0x16   : > { %190 = vst [vmem:[%s161_s5 + $0x30] sm:$0xff] %v189_v6  ;;  %192 = vst [vmem:[%s161_s5 + $0x38] sm:$0xff] %v191_v7 }
  0x17 PF: > { %198 = sbr.rel (!%p920_p4) target bundleno = 31 (0x1f), region = 51  ;;  %s200_s6 = sand.u32 (%p920_p4), 1, %s858_s16  }
  0x18   : > { %s773_s7 = sshll.u32 (%p920_p4), %s862_s17, 4  ;;  %s756_s8 = sshll.u32 (%p920_p4), %s200_s6, 6 }
  0x19   : > { %s205_s11 = scalar_lea.vmem (%p920_p4), %s1152_s1, %s773_s7  ;;  %s202_s12 = scalar_lea.vmem (%p920_p4), [#allocation3], %s756_s8 }
  0x1a   : > { %v218_v8 = vld [vmem:[%s205_s11] sm:$0xff] (%p920_p4)  ;;  %v220_v9 = vld [vmem:[%s205_s11 + $0x8] sm:$0xff] (%p920_p4) }
  0x1b   : > { %v222_v10 = vld [vmem:[%s205_s11 + $0x20] sm:$0xff] (%p920_p4)  ;;  %219 = vst [vmem:[%s202_s12] sm:$0xff] (%p920_p4), %v218_v8  ;;  %221 = vst [vmem:[%s202_s12 + $0x8] sm:$0xff] (%p920_p4), %v220_v9  ;;  %v224_v11 = vld [vmem:[%s205_s11 + $0x28] sm:$0xff] (%p920_p4) }
  0x1c   : > { %223 = vst [vmem:[%s202_s12 + $0x10] sm:$0xff] %v222_v10  ;;  %v226_v12 = vld [vmem:[%s205_s11 + $0x40] sm:$0xff]  ;;  %v228_v13 = vld [vmem:[%s205_s11 + $0x48] sm:$0xff]  ;;  %225 = vst [vmem:[%s202_s12 + $0x18] sm:$0xff] %v224_v11 }
  0x1d   : > { %227 = vst [vmem:[%s202_s12 + $0x20] sm:$0xff] %v226_v12  ;;  %229 = vst [vmem:[%s202_s12 + $0x28] sm:$0xff] %v228_v13  ;;  %v230_v14 = vld [vmem:[%s205_s11 + $0x60] sm:$0xff]  ;;  %v232_v15 = vld [vmem:[%s205_s11 + $0x68] sm:$0xff] }
  0x1e   : > { %231 = vst [vmem:[%s202_s12 + $0x30] sm:$0xff] %v230_v14  ;;  %233 = vst [vmem:[%s202_s12 + $0x38] sm:$0xff] %v232_v15 }
  0x1f PF: > { %p759_p7 = scmp.ge.s32.totalorder %s862_s17, 1  ;;  %p238_p8 = scmp.lt.s32.totalorder %s862_s17, 3 }
  0x21   : > { %p239_p9 = pnand %p759_p7, %p238_p8 }
  0x22   : > { %s245_s13 = sand.u32 (!%p239_p9), 1, %s854_s15  }
  0x23   : > { %242 = sbr.rel (%p239_p9) target bundleno = 326 (0x146), region = 74  ;;  %s946_s14 = sshll.u32 (!%p239_p9), %s245_s13, 6 }
  0x24   : > { %s254_s26 = scalar_lea.vmem (!%p239_p9), [#allocation3], %s946_s14  ;;  %s968_s8 = scalar_lea.vmem (!%p239_p9), [#allocation2], %s946_s14 }
  0x25   : > { %s1098_s9 = scalar_lea.vmem (!%p239_p9), [#allocation4], %s946_s14 }
  0x28   : > { %v864_v16 = vmov 0   ;;  %v388_v17 = vld [vmem:[%s1154_s3 + $0x10] sm:$0xff]  ;;  %v386_v18 = vld [vmem:[%s1154_s3] sm:$0xff]  ;;  %v301_v19 = vld [vmem:[%s254_s26 + $0x28] sm:$0xff]  ;;  %vm318_vm0 = vcmask 261120   ;;  %s774_s10 = sshll.u32 (%p924_p5), %s749_s18, 4 }
  0x29   : > { %357 = vmatprep.mubr.bf16.mxu0 %v864_v16  ;;  %367 = vmatprep.mubr.bf16.mxu1 %v864_v16  ;;  %v303_v20 = vld [vmem:[%s254_s26 + $0x38] sm:$0xff]  ;;  %v300_v21 = vld [vmem:[%s254_s26 + $0x20] sm:$0xff]  ;;  %v302_v23 = vld [vmem:[%s254_s26 + $0x30] sm:$0xff]  ;;  %s643_s13 = scalar_lea.vmem (%p924_p5), %s1155_s4, %s774_s10 }
  0x2a   : > { %805 = vset.pattern.permute.xlu1 %v864_v16  ;;  %804 = vset.pattern.permute.xlu0 %v864_v16  ;;  %v307_v22 = vpack.c.bf16 %v303_v20, %v301_v19  ;;  %v297_v24 = vld [vmem:[%s254_s26 + $0x8] sm:$0xff]  ;;  %v299_v25 = vld [vmem:[%s254_s26 + $0x18] sm:$0xff]  ;;  %v306_v26 = vpack.c.bf16 %v302_v23, %v300_v21  ;;  %v296_v28 = vld [vmem:[%s254_s26] sm:$0xff] }
  0x2b   : > { %402 = vperm.xlu1 %805, %v388_v17   ;;  %392 = vperm.xlu0 %804, %v386_v18   ;;  %v305_v27 = vpack.c.bf16 %v299_v25, %v297_v24  ;;  %v298_v29 = vld [vmem:[%s254_s26 + $0x10] sm:$0xff]  ;;  %v389_v30 = vld [vmem:[%s1154_s3 + $0x18] sm:$0xff]  ;;  %v387_v31 = vld [vmem:[%s1154_s3 + $0x8] sm:$0xff] }
  0x2c   : > { %337 = vmatprep.subr.bf16.mxu0 %v307_v22  ;;  %775 = vmatprep.subr.bf16.mxu1 %v307_v22  ;;  %v304_v32 = vpack.c.bf16 %v298_v29, %v296_v28  ;;  %v806_v33 = vld [vmem:[%s1153_s2] sm:$0xff]   ;;  %v807_v34 = vld [vmem:[%s1153_s2 + $0x8] sm:$0xff]   ;;  %v286_v55 = vld [vmem:[%s968_s8 + $0x10] sm:$0xff] }
  0x2d   : > { %338 = vmatpush1.bf16.msra.mxu0 %v306_v26  ;;  %777 = vmatpush1.bf16.msra.mxu1 %v306_v26  ;;  %v284_v35 = vld [vmem:[%s968_s8] sm:$0xff]  ;;  %v285_v39 = vld [vmem:[%s968_s8 + $0x8] sm:$0xff]  ;;  %v290_v0 = vld [vmem:[%s968_s8 + $0x30] sm:$0xff] }
  0x2e   : > { %339 = vmatprep.subr.bf16.mxu0 %v305_v27  ;;  %776 = vmatprep.subr.bf16.mxu1 %v305_v27  ;;  %v288_v36 = vld [vmem:[%s968_s8 + $0x20] sm:$0xff]  ;;  %v289_v40 = vld [vmem:[%s968_s8 + $0x28] sm:$0xff]  ;;  %v287_v11 = vld [vmem:[%s968_s8 + $0x18] sm:$0xff] }
  0x2f   : > { %407 = vperm.xlu1 %805, %v389_v30   ;;  %397 = vperm.xlu0 %804, %v387_v31   ;;  %v291_v21 = vld [vmem:[%s968_s8 + $0x38] sm:$0xff] }
  0x31   : > { %340 = vmatpush1.bf16.msra.mxu0 %v304_v32  ;;  %778 = vmatpush1.bf16.msra.mxu1 %v304_v32 }
  0x34   : > { %765 = vmatmul.mubr.msk.bf16.vlgmr.msra.gmra.mxu0 %vm318_vm0, %v806_v33  ;;  %766 = vmatmul.mubr.msk.bf16.vlgmr.msra.gmra.mxu1 %vm318_vm0, %v807_v34 }
  0xa6   : > { %v403_v41 = vpop.permute.xlu1 %402  ;;  %v393_v42 = vpop.permute.xlu0 %392 }
  0xaa   : > { %v398_v8 = vpop.permute.xlu0 %397  ;;  %v408_v16 = vpop.permute.xlu1 %407 }
  0xf4   : > { %v359_v37 = vpop.f32.mrf.mxu0  ;;  %v369_v38 = vpop.f32.mrf.mxu1 }
  0xf5   : > { %v378_v43 = vadd.f32 %v359_v37, %v284_v35  ;;  %v382_v44 = vadd.f32 %v369_v38, %v288_v36 }
  0xf6   : > { %v361_v45 = vpop.f32.mrf.mxu0  ;;  %v371_v46 = vpop.f32.mrf.mxu1 }
  0xf7   : > { %v974_v47 = vadd.f32 %v393_v42, %v378_v43  ;;  %v976_v48 = vadd.f32 %v403_v41, %v382_v44  ;;  %v379_v49 = vadd.f32 %v361_v45, %v285_v39  ;;  %v383_v50 = vadd.f32 %v371_v46, %v289_v40 }
  0xf8   : > { %v363_v56 = vpop.f32.mrf.mxu0  ;;  %v373_v1 = vpop.f32.mrf.mxu1 }
  0xf9   : > { %v979_v51 = vmul.f32 0.70710677, %v974_v47  ;;  %v982_v52 = vmul.f32 0.70710677, %v976_v48  ;;  %v984_v53 = vadd.f32 %v393_v42, %v379_v49  ;;  %v986_v54 = vadd.f32 %v403_v41, %v383_v50 }
  0xfa   : > { %v380_v63 = vadd.f32 %v363_v56, %v286_v55  ;;  %v384_v9 = vadd.f32 %v373_v1, %v290_v0  ;;  %v365_v12 = vpop.f32.mrf.mxu0  ;;  %v375_v22 = vpop.f32.mrf.mxu1 }
  0xfb   : > { %v434_v57 = vand.u32 2147483647, %v979_v51  ;;  %v438_v58 = vand.u32 2147483647, %v982_v52  ;;  %v992_v59 = vmul.f32 0.70710677, %v984_v53  ;;  %v381_v20 = vadd.f32 %v365_v12, %v287_v11 }
  0xfc   : > { %v995_v60 = vmul.f32 0.70710677, %v986_v54  ;;  %v1000_v10 = vadd.f32 %v398_v8, %v380_v63  ;;  %v1006_v19 = vadd.f32 %v408_v16, %v384_v9  ;;  %v385_v28 = vadd.f32 %v375_v22, %v291_v21 }
  0xfd   : > { %v442_v61 = vmul.f32 0.3275911, %v434_v57  ;;  %v446_v62 = vmul.f32 0.3275911, %v438_v58  ;;  %v435_v2 = vand.u32 2147483647, %v992_v59  ;;  %v1013_v25 = vadd.f32 %v398_v8, %v381_v20 }
  0xfe   : > { %v439_v3 = vand.u32 2147483647, %v995_v60  ;;  %v538_v14 = vsub.f32 0.0, %v434_v57  ;;  %v1004_v17 = vmul.f32 0.70710677, %v1000_v10  ;;  %v542_v18 = vsub.f32 0.0, %v438_v58 }
  0xff   : > { %v450_v4 = vadd.f32 1.0, %v442_v61  ;;  %v454_v5 = vadd.f32 1.0, %v446_v62  ;;  %v443_v6 = vmul.f32 0.3275911, %v435_v2  ;;  %v1011_v24 = vmul.f32 0.70710677, %v1006_v19 }
 0x100   : > { %v447_v7 = vmul.f32 0.3275911, %v439_v3  ;;  %v436_v23 = vand.u32 2147483647, %v1004_v17  ;;  %v546_v26 = vmul.f32 %v538_v14, %v434_v57  ;;  %v550_v29 = vmul.f32 %v542_v18, %v438_v58 }
 0x101   : > { %808 = vrcp.f32 %v450_v4  ;;  %v451_v13 = vadd.f32 1.0, %v443_v6  ;;  %v440_v30 = vand.u32 2147483647, %v1011_v24  ;;  %v1017_v32 = vmul.f32 0.70710677, %v1013_v25 }
 0x102   : > { %810 = vrcp.f32 %v454_v5  ;;  %v455_v15 = vadd.f32 1.0, %v447_v7  ;;  %v444_v27 = vmul.f32 0.3275911, %v436_v23  ;;  %v1019_v33 = vadd.f32 %v408_v16, %v385_v28 }
 0x103   : > { %812 = vrcp.f32 %v451_v13  ;;  %v539_v34 = vsub.f32 0.0, %v435_v2  ;;  %v448_v35 = vmul.f32 0.3275911, %v440_v30  ;;  %v554_v36 = vmul.f32 1.442695, %v546_v26 }
 0x104   : > { %814 = vrcp.f32 %v455_v15  ;;  %v452_v31 = vadd.f32 1.0, %v444_v27  ;;  %v543_v37 = vsub.f32 0.0, %v439_v3  ;;  %v437_v38 = vand.u32 2147483647, %v1017_v32 }
 0x105   : > { %v562_v39 = vmul.f32 1.442695, %v550_v29  ;;  %v456_v40 = vadd.f32 1.0, %v448_v35  ;;  %v1023_v41 = vmul.f32 0.70710677, %v1019_v33  ;;  %v547_v44 = vmul.f32 %v539_v34, %v435_v2 }
 0x106   : > { %816 = vrcp.f32 %v452_v31  ;;  %v445_v42 = vmul.f32 0.3275911, %v437_v38  ;;  %v540_v45 = vsub.f32 0.0, %v436_v23  ;;  %v551_v55 = vmul.f32 %v543_v37, %v439_v3 }
 0x107   : > { %818 = vrcp.f32 %v456_v40  ;;  %v441_v46 = vand.u32 2147483647, %v1023_v41  ;;  %v544_v58 = vsub.f32 0.0, %v440_v30  ;;  %v541_v2 = vsub.f32 0.0, %v437_v38 }
 0x108   : > { %820 = vpow2.f32 %v554_v36  ;;  %v453_v56 = vadd.f32 1.0, %v445_v42  ;;  %v548_v1 = vmul.f32 %v540_v45, %v436_v23  ;;  %v556_v7 = vmul.f32 1.442695, %v547_v44 }
 0x109   : > { %822 = vpow2.f32 %v562_v39  ;;  %v449_v61 = vmul.f32 0.3275911, %v441_v46  ;;  %v564_v3 = vmul.f32 1.442695, %v551_v55  ;;  %v552_v11 = vmul.f32 %v544_v58, %v440_v30 }
 0x10a   : > { %824 = vrcp.f32 %v453_v56  ;;  %v545_v12 = vsub.f32 0.0, %v441_v46  ;;  %v1041_v16 = vmul.f32 0.5, %v974_v47  ;;  %v558_v20 = vmul.f32 1.442695, %v548_v1 }
 0x10b   : > { %v457_v4 = vadd.f32 1.0, %v449_v61  ;;  %v549_v21 = vmul.f32 %v541_v2, %v437_v38  ;;  %v566_v29 = vmul.f32 1.442695, %v552_v11  ;;  %v1051_v36 = vmul.f32 0.5, %v976_v48 }
 0x10c   : > { %v553_v30 = vmul.f32 %v545_v12, %v441_v46  ;;  %vm586_vm1 = vcmp.lt.f32.partialorder %v979_v51, 0.0  ;;  %v1065_v2 = vmul.f32 0.5, %v984_v53  ;;  %vm590_vm2 = vcmp.lt.f32.partialorder %v982_v52, 0.0 }
 0x10d   : > { %826 = vrcp.f32 %v457_v4  ;;  %v560_v38 = vmul.f32 1.442695, %v549_v21  ;;  %vm587_vm3 = vcmp.lt.f32.partialorder %v992_v59, 0.0  ;;  %vm591_vm4 = vcmp.lt.f32.partialorder %v995_v60, 0.0 }
 0x10e   : > { %v1025_v43 = vpop.eup %808  ;;  %828 = vpow2.f32 %v556_v7  ;;  %v568_v56 = vmul.f32 1.442695, %v553_v30  ;;  %v423_v59 = vmul.f32 0.5, %v986_v54  ;;  %vm588_vm5 = vcmp.lt.f32.partialorder %v1004_v17, 0.0 }
 0x10f   : > { %v1028_v49 = vpop.eup %810  ;;  %v466_v50 = vmul.f32 1.0614054, %v1025_v43  ;;  %830 = vpow2.f32 %v564_v3  ;;  %vm592_vm6 = vcmp.lt.f32.partialorder %v1011_v24, 0.0  ;;  %vm589_vm7 = vcmp.lt.f32.partialorder %v1017_v32, 0.0 }
 0x110   : > { %v470_v57 = vmul.f32 1.0614054, %v1028_v49  ;;  %v1032_v63 = vpop.eup %812  ;;  %832 = vpow2.f32 %v558_v20  ;;  %v421_v24 = vmul.f32 0.5, %v1013_v25  ;;  %vm593_vm8 = vcmp.lt.f32.partialorder %v1023_v41, 0.0 }
 0x111   : > { %v474_v62 = vadd.f32 -1.4531521, %v466_v50  ;;  %v467_v6 = vmul.f32 1.0614054, %v1032_v63  ;;  %v1036_v8 = vpop.eup %814  ;;  %834 = vpow2.f32 %v566_v29 }
 0x112   : > { %v478_v0 = vadd.f32 -1.4531521, %v470_v57  ;;  %v471_v15 = vmul.f32 1.0614054, %v1036_v8  ;;  %836 = vpow2.f32 %v560_v38 }
 0x113   : > { %v482_v5 = vmul.f32 %v1025_v43, %v474_v62  ;;  %v475_v14 = vadd.f32 -1.4531521, %v467_v6  ;;  %v1045_v27 = vpop.eup %816  ;;  %838 = vpow2.f32 %v568_v56 }
 0x114   : > { %v486_v9 = vmul.f32 %v1028_v49, %v478_v0  ;;  %v479_v26 = vadd.f32 -1.4531521, %v471_v15  ;;  %v468_v35 = vmul.f32 1.0614054, %v1045_v27  ;;  %v1053_v39 = vpop.eup %818 }
 0x115   : > { %v490_v13 = vadd.f32 1.4214138, %v482_v5  ;;  %v483_v23 = vmul.f32 %v1032_v63, %v475_v14  ;;  %v821_v46 = vpop.eup %820  ;;  %v472_v55 = vmul.f32 1.0614054, %v1053_v39 }
 0x116   : > { %v494_v18 = vadd.f32 1.4214138, %v486_v9  ;;  %v487_v47 = vmul.f32 %v1036_v8, %v479_v26  ;;  %v476_v45 = vadd.f32 -1.4531521, %v468_v35  ;;  %v823_v48 = vpop.eup %822 }
 0x117   : > { %v498_v22 = vmul.f32 %v1025_v43, %v490_v13  ;;  %v491_v34 = vadd.f32 1.4214138, %v483_v23  ;;  %v1061_v0 = vpop.eup %824  ;;  %v480_v4 = vadd.f32 -1.4531521, %v472_v55 }
 0x118   : > { %v502_v28 = vmul.f32 %v1028_v49, %v494_v18  ;;  %v495_v44 = vadd.f32 1.4214138, %v487_v47  ;;  %v484_v62 = vmul.f32 %v1045_v27, %v476_v45  ;;  %v469_v12 = vmul.f32 1.0614054, %v1061_v0 }
 0x119   : > { %v506_v31 = vadd.f32 -0.28449672, %v498_v22  ;;  %v499_v42 = vmul.f32 %v1032_v63, %v491_v34  ;;  %v488_v11 = vmul.f32 %v1053_v39, %v480_v4 }
 0x11a   : > { %v510_v37 = vadd.f32 -0.28449672, %v502_v28  ;;  %v503_v61 = vmul.f32 %v1036_v8, %v495_v44  ;;  %v492_v3 = vadd.f32 1.4214138, %v484_v62  ;;  %v1073_v13 = vpop.eup %826  ;;  %v477_v21 = vadd.f32 -1.4531521, %v469_v12 }
 0x11b   : > { %v514_v40 = vmul.f32 %v1025_v43, %v506_v31  ;;  %v507_v58 = vadd.f32 -0.28449672, %v499_v42  ;;  %v496_v20 = vadd.f32 1.4214138, %v488_v11  ;;  %v829_v29 = vpop.eup %828 }
 0x11c   : > { %v518_v50 = vmul.f32 %v1028_v49, %v510_v37  ;;  %v511_v7 = vadd.f32 -0.28449672, %v503_v61  ;;  %v485_v34 = vmul.f32 %v1061_v0, %v477_v21  ;;  %v831_v35 = vpop.eup %830 }
 0x11d   : > { %v522_v57 = vadd.f32 0.2548296, %v514_v40  ;;  %v515_v6 = vmul.f32 %v1032_v63, %v507_v58  ;;  %v504_v31 = vmul.f32 %v1053_v39, %v496_v20 }
 0x11e   : > { %v526_v1 = vadd.f32 0.2548296, %v518_v50  ;;  %v519_v15 = vmul.f32 %v1036_v8, %v511_v7  ;;  %v493_v45 = vadd.f32 1.4214138, %v485_v34  ;;  %v833_v50 = vpop.eup %832  ;;  %v420_v34 = vmul.f32 0.5, %v1000_v10 }
 0x11f   : > { %v530_v5 = vmul.f32 %v1025_v43, %v522_v57  ;;  %v523_v14 = vadd.f32 0.2548296, %v515_v6  ;;  %v500_v43 = vmul.f32 %v1045_v27, %v492_v3 }
 0x120   : > { %v534_v9 = vmul.f32 %v1028_v49, %v526_v1  ;;  %v473_v49 = vmul.f32 1.0614054, %v1073_v13  ;;  %v527_v26 = vadd.f32 0.2548296, %v519_v15  ;;  %v501_v62 = vmul.f32 %v1061_v0, %v493_v45  ;;  %v835_v1 = vpop.eup %834 }
 0x121   : > { %v570_v53 = vmul.f32 %v821_v46, %v530_v5  ;;  %v531_v23 = vmul.f32 %v1032_v63, %v523_v14  ;;  %v508_v28 = vadd.f32 -0.28449672, %v500_v43  ;;  %v512_v63 = vadd.f32 -0.28449672, %v504_v31  ;;  %v837_v12 = vpop.eup %836 }
 0x122   : > { %v574_v18 = vmul.f32 %v823_v48, %v534_v9  ;;  %v481_v47 = vadd.f32 -1.4531521, %v473_v49  ;;  %v535_v40 = vmul.f32 %v1036_v8, %v527_v26  ;;  %v509_v9 = vadd.f32 -0.28449672, %v501_v62  ;;  %v839_v20 = vpop.eup %838 }
 0x123   : > { %v578_v22 = vsub.f32 1.0, %v570_v53  ;;  %v571_v38 = vmul.f32 %v829_v29, %v531_v23  ;;  %v516_v42 = vmul.f32 %v1045_v27, %v508_v28  ;;  %v520_v8 = vmul.f32 %v1053_v39, %v512_v63 }
 0x124   : > { %v582_v30 = vsub.f32 1.0, %v574_v18  ;;  %v489_v46 = vmul.f32 %v1073_v13, %v481_v47  ;;  %v575_v48 = vmul.f32 %v831_v35, %v535_v40  ;;  %v517_v43 = vmul.f32 %v1061_v0, %v509_v9 }
 0x125   : > { %v594_v37 = vsub.f32 0.0, %v578_v22  ;;  %v579_v56 = vsub.f32 1.0, %v571_v38  ;;  %v524_v57 = vadd.f32 0.2548296, %v516_v42  ;;  %v528_v3 = vadd.f32 0.2548296, %v520_v8 }
 0x126   : > { %v598_v44 = vsub.f32 0.0, %v582_v30  ;;  %v583_v6 = vsub.f32 1.0, %v575_v48  ;;  %v497_v11 = vadd.f32 1.4214138, %v489_v46  ;;  %v525_v26 = vadd.f32 0.2548296, %v517_v43 }
 0x127   : > { %v602_v55 = vsel %vm586_vm1, %v594_v37, %v578_v22  ;;  %v595_v5 = vsub.f32 0.0, %v579_v56  ;;  %v532_v7 = vmul.f32 %v1045_v27, %v524_v57  ;;  %v424_v42 = vmul.f32 0.5, %v1006_v19 }
 0x128   : > { %v610_v58 = vadd.f32 1.0, %v602_v55  ;;  %v606_v61 = vsel %vm590_vm2, %v598_v44, %v582_v30  ;;  %v599_v14 = vsub.f32 0.0, %v583_v6  ;;  %v505_v18 = vmul.f32 %v1073_v13, %v497_v11 }
 0x129   : > { %v614_v4 = vadd.f32 1.0, %v606_v61  ;;  %v603_v53 = vsel %vm587_vm3, %v595_v5, %v579_v56  ;;  %v572_v15 = vmul.f32 %v833_v50, %v532_v7  ;;  %v533_v31 = vmul.f32 %v1061_v0, %v525_v26 }
 0x12a   : > { %v618_v51 = vmul.f32 %v610_v58, %v1041_v16  ;;  %v611_v27 = vadd.f32 1.0, %v603_v53  ;;  %v536_v16 = vmul.f32 %v1053_v39, %v528_v3  ;;  %v513_v39 = vadd.f32 -0.28449672, %v505_v18 }
 0x12b   : > { %v622_v52 = vmul.f32 %v614_v4, %v1051_v36  ;;  %v607_v36 = vsel %vm591_vm4, %v599_v14, %v583_v6  ;;  %v580_v21 = vsub.f32 1.0, %v572_v15  ;;  %v573_v35 = vmul.f32 %v837_v12, %v533_v31 }
 0x12c   : > { %626 = vst [vmem:[%s1098_s9] sm:$0xff] %v618_v51  ;;  %v619_v49 = vmul.f32 %v611_v27, %v1065_v2  ;;  %v615_v22 = vadd.f32 1.0, %v607_v36  ;;  %v576_v23 = vmul.f32 %v835_v1, %v536_v16  ;;  %v521_v60 = vmul.f32 %v1073_v13, %v513_v39 }
 0x12d   : > { %630 = vst [vmem:[%s1098_s9 + $0x20] sm:$0xff] %v622_v52  ;;  %v596_v28 = vsub.f32 0.0, %v580_v21  ;;  %v581_v17 = vsub.f32 1.0, %v573_v35 }
 0x12e   : > { %627 = vst [vmem:[%s1098_s9 + $0x8] sm:$0xff] %v619_v49  ;;  %v623_v29 = vmul.f32 %v615_v22, %v423_v59  ;;  %v584_v30 = vsub.f32 1.0, %v576_v23  ;;  %v529_v37 = vadd.f32 0.2548296, %v521_v60 }
 0x12f   : > { %v604_v54 = vsel %vm588_vm5, %v596_v28, %v580_v21  ;;  %v597_v63 = vsub.f32 0.0, %v581_v17 }
 0x130   : > { %631 = vst [vmem:[%s1098_s9 + $0x28] sm:$0xff] %v623_v29  ;;  %v612_v2 = vadd.f32 1.0, %v604_v54  ;;  %v600_v47 = vsub.f32 0.0, %v584_v30  ;;  %v537_v44 = vmul.f32 %v1073_v13, %v529_v37  ;;  %v425_v13 = vmul.f32 0.5, %v1019_v33 }
 0x131   : > { %v605_v46 = vsel %vm589_vm7, %v597_v63, %v581_v17 }
 0x132   : > { %v620_v38 = vmul.f32 %v612_v2, %v420_v34  ;;  %v608_v40 = vsel %vm592_vm6, %v600_v47, %v584_v30  ;;  %v577_v10 = vmul.f32 %v839_v20, %v537_v44  ;;  %v613_v50 = vadd.f32 1.0, %v605_v46 }
 0x133   : > { %v616_v0 = vadd.f32 1.0, %v608_v40  ;;  %v656_v25 = vld [vmem:[%s1098_s9] sm:$0xff] (%p924_p5) }
 0x134   : > { %628 = vst [vmem:[%s1098_s9 + $0x10] sm:$0xff] %v620_v38  ;;  %v585_v55 = vsub.f32 1.0, %v577_v10  ;;  %v621_v56 = vmul.f32 %v613_v50, %v421_v24  ;;  %v664_v61 = vld [vmem:[%s1098_s9 + $0x20] sm:$0xff] (%p924_p5)  ;;  %657 = vst [vmem:[%s643_s13] sm:$0xff] (%p924_p5), %v656_v25 }
 0x135   : > { %v624_v45 = vmul.f32 %v616_v0, %v424_v42  ;;  %v658_v32 = vld [vmem:[%s1098_s9 + $0x8] sm:$0xff] (%p924_p5)  ;;  %665 = vst [vmem:[%s643_s13 + $0x40] sm:$0xff] (%p924_p5), %v664_v61 }
 0x136   : > { %v601_v48 = vsub.f32 0.0, %v585_v55  ;;  %629 = vst [vmem:[%s1098_s9 + $0x18] sm:$0xff] %v621_v56  ;;  %659 = vst [vmem:[%s643_s13 + $0x8] sm:$0xff] (%p924_p5), %v658_v32 }
 0x137   : > { %632 = vst [vmem:[%s1098_s9 + $0x30] sm:$0xff] %v624_v45  ;;  %v666_v8 = vld [vmem:[%s1098_s9 + $0x28] sm:$0xff] (%p924_p5) }
 0x138   : > { %v609_v19 = vsel %vm593_vm8, %v601_v48, %v585_v55  ;;  %667 = vst [vmem:[%s643_s13 + $0x48] sm:$0xff] (%p924_p5), %v666_v8 }
 0x139   : > { %v617_v57 = vadd.f32 1.0, %v609_v19  ;;  %640 = sbr.rel (!%p924_p5) target bundleno = 326 (0x146), region = 86 }
 0x13b   : > { %v625_v58 = vmul.f32 %v617_v57, %v425_v13  ;;  %v660_v33 = vld [vmem:[%s1098_s9 + $0x10] sm:$0xff] (%p924_p5) }
 0x13c   : > { %661 = vst [vmem:[%s643_s13 + $0x20] sm:$0xff] (%p924_p5), %v660_v33 }
 0x13d   : > { %633 = vst [vmem:[%s1098_s9 + $0x38] sm:$0xff] %v625_v58  ;;  %v662_v41 = vld [vmem:[%s1098_s9 + $0x18] sm:$0xff] (%p924_p5) }
 0x13e   : > { %663 = vst [vmem:[%s643_s13 + $0x28] sm:$0xff] %v662_v41  ;;  %v668_v62 = vld [vmem:[%s1098_s9 + $0x30] sm:$0xff] }
 0x13f   : > { %669 = vst [vmem:[%s643_s13 + $0x60] sm:$0xff] %v668_v62 }
 0x144   : > { %v670_v1 = vld [vmem:[%s1098_s9 + $0x38] sm:$0xff] }
 0x145   : > { %671 = vst [vmem:[%s643_s13 + $0x68] sm:$0xff] %v670_v1 }
 0x146 PF: > { %p11_p10 = scmp.ge.s32.totalorder %s907_s19, 4   ;;  %s1158_s15 = smov %s858_s16 }
 0x147   : > { %s1159_s16 = smov %s918_s22  ;;  %s1160_s17 = smov %s907_s19 }
 0x148   :  { %13 = sbr.rel (!%p11_p10) target bundleno = 2 (0x2), region = 148 }

// kernel: fno2d_forward.18
= control target key start
LH: loop header
LB: loop body
LE: loop exit
PB: predicated region body
PF: predicated region fallthrough
CT: control target
= control target key end

     0   :  { %s650_s15 = smov 0   ;;  %s652_s16 = smov 0   ;;  %s764_s0 = inlined_call_operand.vmem [shape: f32[32,512], index: 0, kind: input, shape index: {}]   ;;  %s765_s1 = inlined_call_operand.vmem [shape: f32[32,512], index: 1, kind: input, shape index: {}]   ;;  %s766_s2 = inlined_call_operand.vmem [shape: bf16[32,32], index: 2, kind: input, shape index: {}]   ;;  %s767_s3 = inlined_call_operand.vmem [shape: f32[32,1], index: 3, kind: input, shape index: {}]   ;;  %s768_s4 = inlined_call_operand.vmem [shape: f32[32,512], index: 4, kind: output, shape index: {}]  }
   0x1   :  { %s654_s17 = smov 0  }
   0x2 LB: > { %s541_s18 = sadd.s32 4294967295, %s622_s17   ;;  %s667_s19 = sadd.s32 1, %s622_s17   ;;  %s622_s17 = sphi %s654_s17, %s773_s17   ;;  %s618_s16 = sphi %s652_s16, %s772_s16   ;;  %s614_s15 = sphi %s650_s15, %s771_s15  }
   0x3   : > { %s18_s20 = ssub.s32 %s622_s17, %s667_s19  ;;  %s21_s21 = sadd.s32 1, %s618_s16 }
   0x4   : > { %p19_p0 = scmp.eq.s32.totalorder %s18_s20, 0  ;;  %p28_p1 = scmp.ne.s32.totalorder %s618_s16, %s614_s15 }
   0x5   : > { %p29_p2 = scmp.eq.s32.totalorder %s622_s17, 0  ;;  %p126_p3 = scmp.eq.s32.totalorder %s541_s18, 1 }
   0x6   : > { %s678_s22 = scalar_select %p19_p0, %s618_s16, %s21_s21  }
   0x7   : > { %p680_p4 = por %p29_p2, %p28_p1  ;;  %p684_p5 = por %p126_p3, %p28_p1 }
   0x8   : > { %p544_p6 = scmp.ge.s32.totalorder %s622_s17, 2 }
   0xa   : > { %154 = sbr.rel (%p544_p6) target bundleno = 31 (0x1f), region = 24 }
   0xf   : > { %157 = sbr.rel (!%p680_p4) target bundleno = 23 (0x17), region = 28  ;;  %s159_s25 = sand.u32 (%p680_p4), 1, %s618_s16  }
  0x10   : > { %s564_s26 = sshll.u32 (%p680_p4), %s622_s17, 4  ;;  %s545_s27 = sshll.u32 (%p680_p4), %s159_s25, 6 }
  0x11   : > { %s164_s30 = scalar_lea.vmem (%p680_p4), %s764_s0, %s564_s26  ;;  %s161_s5 = scalar_lea.vmem (%p680_p4), [#allocation2], %s545_s27 }
  0x12   : > { %v177_v0 = vld [vmem:[%s164_s30] sm:$0xff] (%p680_p4)  ;;  %v179_v1 = vld [vmem:[%s164_s30 + $0x8] sm:$0xff] (%p680_p4) }
  0x13   : > { %v181_v2 = vld [vmem:[%s164_s30 + $0x20] sm:$0xff] (%p680_p4)  ;;  %178 = vst [vmem:[%s161_s5] sm:$0xff] (%p680_p4), %v177_v0  ;;  %180 = vst [vmem:[%s161_s5 + $0x8] sm:$0xff] (%p680_p4), %v179_v1  ;;  %v183_v3 = vld [vmem:[%s164_s30 + $0x28] sm:$0xff] (%p680_p4) }
  0x14   : > { %182 = vst [vmem:[%s161_s5 + $0x10] sm:$0xff] %v181_v2  ;;  %v185_v4 = vld [vmem:[%s164_s30 + $0x40] sm:$0xff]  ;;  %v187_v5 = vld [vmem:[%s164_s30 + $0x48] sm:$0xff]  ;;  %184 = vst [vmem:[%s161_s5 + $0x18] sm:$0xff] %v183_v3 }
  0x15   : > { %186 = vst [vmem:[%s161_s5 + $0x20] sm:$0xff] %v185_v4  ;;  %188 = vst [vmem:[%s161_s5 + $0x28] sm:$0xff] %v187_v5  ;;  %v189_v6 = vld [vmem:[%s164_s30 + $0x60] sm:$0xff]  ;;  %v191_v7 = vld [vmem:[%s164_s30 + $0x68] sm:$0xff] }
  0x16   : > { %190 = vst [vmem:[%s161_s5 + $0x30] sm:$0xff] %v189_v6  ;;  %192 = vst [vmem:[%s161_s5 + $0x38] sm:$0xff] %v191_v7 }
  0x17 PF: > { %198 = sbr.rel (!%p680_p4) target bundleno = 31 (0x1f), region = 51  ;;  %s200_s6 = sand.u32 (%p680_p4), 1, %s618_s16  }
  0x18   : > { %s565_s7 = sshll.u32 (%p680_p4), %s622_s17, 4  ;;  %s548_s8 = sshll.u32 (%p680_p4), %s200_s6, 6 }
  0x19   : > { %s205_s11 = scalar_lea.vmem (%p680_p4), %s765_s1, %s565_s7  ;;  %s202_s12 = scalar_lea.vmem (%p680_p4), [#allocation3], %s548_s8 }
  0x1a   : > { %v218_v8 = vld [vmem:[%s205_s11] sm:$0xff] (%p680_p4)  ;;  %v220_v9 = vld [vmem:[%s205_s11 + $0x8] sm:$0xff] (%p680_p4) }
  0x1b   : > { %v222_v10 = vld [vmem:[%s205_s11 + $0x20] sm:$0xff] (%p680_p4)  ;;  %219 = vst [vmem:[%s202_s12] sm:$0xff] (%p680_p4), %v218_v8  ;;  %221 = vst [vmem:[%s202_s12 + $0x8] sm:$0xff] (%p680_p4), %v220_v9  ;;  %v224_v11 = vld [vmem:[%s205_s11 + $0x28] sm:$0xff] (%p680_p4) }
  0x1c   : > { %223 = vst [vmem:[%s202_s12 + $0x10] sm:$0xff] %v222_v10  ;;  %v226_v12 = vld [vmem:[%s205_s11 + $0x40] sm:$0xff]  ;;  %v228_v13 = vld [vmem:[%s205_s11 + $0x48] sm:$0xff]  ;;  %225 = vst [vmem:[%s202_s12 + $0x18] sm:$0xff] %v224_v11 }
  0x1d   : > { %227 = vst [vmem:[%s202_s12 + $0x20] sm:$0xff] %v226_v12  ;;  %229 = vst [vmem:[%s202_s12 + $0x28] sm:$0xff] %v228_v13  ;;  %v230_v14 = vld [vmem:[%s205_s11 + $0x60] sm:$0xff]  ;;  %v232_v15 = vld [vmem:[%s205_s11 + $0x68] sm:$0xff] }
  0x1e   : > { %231 = vst [vmem:[%s202_s12 + $0x30] sm:$0xff] %v230_v14  ;;  %233 = vst [vmem:[%s202_s12 + $0x38] sm:$0xff] %v232_v15 }
  0x1f PF: > { %p551_p7 = scmp.ge.s32.totalorder %s622_s17, 1  ;;  %p238_p8 = scmp.lt.s32.totalorder %s622_s17, 3 }
  0x21   : > { %p239_p9 = pnand %p551_p7, %p238_p8 }
  0x22   : > { %s245_s13 = sand.u32 (!%p239_p9), 1, %s614_s15  }
  0x23   : > { %242 = sbr.rel (%p239_p9) target bundleno = 265 (0x109), region = 74  ;;  %s706_s14 = sshll.u32 (!%p239_p9), %s245_s13, 6 }
  0x24   : > { %s254_s26 = scalar_lea.vmem (!%p239_p9), [#allocation3], %s706_s14  ;;  %s247_s8 = scalar_lea.vmem (!%p239_p9), [#allocation2], %s706_s14 }
  0x25   : > { %s729_s9 = scalar_lea.vmem (!%p239_p9), [#allocation4], %s706_s14 }
  0x28   : > { %v624_v16 = vmov 0   ;;  %v388_v17 = vld [vmem:[%s767_s3 + $0x10] sm:$0xff]  ;;  %v386_v18 = vld [vmem:[%s767_s3] sm:$0xff]  ;;  %v301_v19 = vld [vmem:[%s254_s26 + $0x28] sm:$0xff]  ;;  %vm318_vm0 = vcmask 261120   ;;  %s566_s10 = sshll.u32 (%p684_p5), %s541_s18, 4 }
  0x29   : > { %357 = vmatprep.mubr.bf16.mxu0 %v624_v16  ;;  %367 = vmatprep.mubr.bf16.mxu1 %v624_v16  ;;  %v303_v20 = vld [vmem:[%s254_s26 + $0x38] sm:$0xff]  ;;  %v300_v21 = vld [vmem:[%s254_s26 + $0x20] sm:$0xff]  ;;  %v302_v23 = vld [vmem:[%s254_s26 + $0x30] sm:$0xff]  ;;  %s435_s13 = scalar_lea.vmem (%p684_p5), %s768_s4, %s566_s10 }
  0x2a   : > { %597 = vset.pattern.permute.xlu1 %v624_v16  ;;  %596 = vset.pattern.permute.xlu0 %v624_v16  ;;  %v307_v22 = vpack.c.bf16 %v303_v20, %v301_v19  ;;  %v297_v24 = vld [vmem:[%s254_s26 + $0x8] sm:$0xff]  ;;  %v299_v25 = vld [vmem:[%s254_s26 + $0x18] sm:$0xff]  ;;  %v306_v26 = vpack.c.bf16 %v302_v23, %v300_v21  ;;  %v296_v28 = vld [vmem:[%s254_s26] sm:$0xff] }
  0x2b   : > { %402 = vperm.xlu1 %597, %v388_v17   ;;  %392 = vperm.xlu0 %596, %v386_v18   ;;  %v305_v27 = vpack.c.bf16 %v299_v25, %v297_v24  ;;  %v298_v29 = vld [vmem:[%s254_s26 + $0x10] sm:$0xff]  ;;  %v389_v30 = vld [vmem:[%s767_s3 + $0x18] sm:$0xff]  ;;  %v387_v31 = vld [vmem:[%s767_s3 + $0x8] sm:$0xff] }
  0x2c   : > { %337 = vmatprep.subr.bf16.mxu0 %v307_v22  ;;  %567 = vmatprep.subr.bf16.mxu1 %v307_v22  ;;  %v304_v32 = vpack.c.bf16 %v298_v29, %v296_v28  ;;  %v598_v33 = vld [vmem:[%s766_s2] sm:$0xff]   ;;  %v599_v34 = vld [vmem:[%s766_s2 + $0x8] sm:$0xff]   ;;  %v286_v47 = vld [vmem:[%s247_s8 + $0x10] sm:$0xff] }
  0x2d   : > { %338 = vmatpush1.bf16.msra.mxu0 %v306_v26  ;;  %569 = vmatpush1.bf16.msra.mxu1 %v306_v26  ;;  %v284_v35 = vld [vmem:[%s247_s8] sm:$0xff]  ;;  %v285_v41 = vld [vmem:[%s247_s8 + $0x8] sm:$0xff]  ;;  %v290_v48 = vld [vmem:[%s247_s8 + $0x30] sm:$0xff] }
  0x2e   : > { %339 = vmatprep.subr.bf16.mxu0 %v305_v27  ;;  %568 = vmatprep.subr.bf16.mxu1 %v305_v27  ;;  %v288_v36 = vld [vmem:[%s247_s8 + $0x20] sm:$0xff]  ;;  %v289_v42 = vld [vmem:[%s247_s8 + $0x28] sm:$0xff]  ;;  %v287_v55 = vld [vmem:[%s247_s8 + $0x18] sm:$0xff] }
  0x2f   : > { %407 = vperm.xlu1 %597, %v389_v30   ;;  %397 = vperm.xlu0 %596, %v387_v31   ;;  %v291_v56 = vld [vmem:[%s247_s8 + $0x38] sm:$0xff] }
  0x31   : > { %340 = vmatpush1.bf16.msra.mxu0 %v304_v32  ;;  %570 = vmatpush1.bf16.msra.mxu1 %v304_v32 }
  0x34   : > { %557 = vmatmul.mubr.msk.bf16.vlgmr.msra.gmra.mxu0 %vm318_vm0, %v598_v33  ;;  %558 = vmatmul.mubr.msk.bf16.vlgmr.msra.gmra.mxu1 %vm318_vm0, %v599_v34 }
  0xa6   : > { %v403_v37 = vpop.permute.xlu1 %402  ;;  %v393_v38 = vpop.permute.xlu0 %392 }
  0xaa   : > { %v408_v59 = vpop.permute.xlu1 %407  ;;  %v398_v60 = vpop.permute.xlu0 %397 }
  0xf4   : > { %v359_v39 = vpop.f32.mrf.mxu0  ;;  %v369_v40 = vpop.f32.mrf.mxu1 }
  0xf5   : > { %v378_v43 = vadd.f32 %v359_v39, %v284_v35  ;;  %v382_v44 = vadd.f32 %v369_v40, %v288_v36 }
  0xf6   : > { %v361_v45 = vpop.f32.mrf.mxu0  ;;  %v371_v46 = vpop.f32.mrf.mxu1 }
  0xf7   : > { %v410_v49 = vadd.f32 %v393_v38, %v378_v43  ;;  %v414_v50 = vadd.f32 %v403_v37, %v382_v44  ;;  %v379_v51 = vadd.f32 %v361_v45, %v285_v41  ;;  %v383_v52 = vadd.f32 %v371_v46, %v289_v42 }
  0xf8   : > { %v363_v53 = vpop.f32.mrf.mxu0  ;;  %v373_v54 = vpop.f32.mrf.mxu1 }
  0xf9   : > { %418 = vst [vmem:[%s729_s9] sm:$0xff] %v410_v49  ;;  %422 = vst [vmem:[%s729_s9 + $0x20] sm:$0xff] %v414_v50  ;;  %v411_v57 = vadd.f32 %v393_v38, %v379_v51  ;;  %v415_v58 = vadd.f32 %v403_v37, %v383_v52  ;;  %v380_v61 = vadd.f32 %v363_v53, %v286_v47 }
  0xfa   : > { %v384_v62 = vadd.f32 %v373_v54, %v290_v48  ;;  %v365_v63 = vpop.f32.mrf.mxu0  ;;  %v375_v0 = vpop.f32.mrf.mxu1 }
  0xfb   : > { %419 = vst [vmem:[%s729_s9 + $0x8] sm:$0xff] %v411_v57  ;;  %423 = vst [vmem:[%s729_s9 + $0x28] sm:$0xff] %v415_v58  ;;  %v412_v1 = vadd.f32 %v398_v60, %v380_v61  ;;  %v381_v3 = vadd.f32 %v365_v63, %v287_v55  ;;  %v385_v4 = vadd.f32 %v375_v0, %v291_v56  ;;  %432 = sbr.rel (!%p684_p5) target bundleno = 265 (0x109), region = 86 }
  0xfc   : > { %v416_v2 = vadd.f32 %v408_v59, %v384_v62 }
  0xfd   : > { %420 = vst [vmem:[%s729_s9 + $0x10] sm:$0xff] %v412_v1  ;;  %v413_v5 = vadd.f32 %v398_v60, %v381_v3  ;;  %v417_v6 = vadd.f32 %v408_v59, %v385_v4 }
  0xfe   : > { %424 = vst [vmem:[%s729_s9 + $0x30] sm:$0xff] %v416_v2 }
  0xff   : > { %421 = vst [vmem:[%s729_s9 + $0x18] sm:$0xff] %v413_v5  ;;  %425 = vst [vmem:[%s729_s9 + $0x38] sm:$0xff] %v417_v6 }
 0x100   : > { %v448_v7 = vld [vmem:[%s729_s9] sm:$0xff] }
 0x101   : > { %v456_v11 = vld [vmem:[%s729_s9 + $0x20] sm:$0xff]  ;;  %449 = vst [vmem:[%s435_s13] sm:$0xff] %v448_v7 }
 0x102   : > { %v450_v8 = vld [vmem:[%s729_s9 + $0x8] sm:$0xff]  ;;  %457 = vst [vmem:[%s435_s13 + $0x40] sm:$0xff] %v456_v11 }
 0x103   : > { %v458_v12 = vld [vmem:[%s729_s9 + $0x28] sm:$0xff]  ;;  %451 = vst [vmem:[%s435_s13 + $0x8] sm:$0xff] %v450_v8 }
 0x104   : > { %v452_v9 = vld [vmem:[%s729_s9 + $0x10] sm:$0xff]  ;;  %459 = vst [vmem:[%s435_s13 + $0x48] sm:$0xff] %v458_v12 }
 0x105   : > { %453 = vst [vmem:[%s435_s13 + $0x20] sm:$0xff] %v452_v9  ;;  %v460_v13 = vld [vmem:[%s729_s9 + $0x30] sm:$0xff] }
 0x106   : > { %v454_v10 = vld [vmem:[%s729_s9 + $0x18] sm:$0xff]  ;;  %461 = vst [vmem:[%s435_s13 + $0x60] sm:$0xff] %v460_v13 }
 0x107   : > { %455 = vst [vmem:[%s435_s13 + $0x28] sm:$0xff] %v454_v10  ;;  %v462_v14 = vld [vmem:[%s729_s9 + $0x38] sm:$0xff] }
 0x108   : > { %463 = vst [vmem:[%s435_s13 + $0x68] sm:$0xff] %v462_v14 }
 0x109 PF: > { %p11_p10 = scmp.ge.s32.totalorder %s667_s19, 4   ;;  %s771_s15 = smov %s618_s16 }
 0x10a   : > { %s772_s16 = smov %s678_s22  ;;  %s773_s17 = smov %s667_s19 }
 0x10b   :  { %13 = sbr.rel (!%p11_p10) target bundleno = 2 (0x2), region = 148 }

// kernel: fno2d_forward.19
= control target key start
LH: loop header
LB: loop body
LE: loop exit
PB: predicated region body
PF: predicated region fallthrough
CT: control target
= control target key end

     0   :  { %s2948_s0 = inlined_call_operand.vmem [shape: f32[32,512], index: 0, kind: input, shape index: {}]   ;;  %s2949_s1 = inlined_call_operand.vmem [shape: bf16[128,32], index: 1, kind: input, shape index: {}]   ;;  %s2950_s2 = inlined_call_operand.vmem [shape: f32[128,1], index: 2, kind: input, shape index: {}]   ;;  %s2951_s3 = inlined_call_operand.vmem [shape: bf16[1,128], index: 3, kind: input, shape index: {}]   ;;  %s2952_s4 = inlined_call_operand.<no memory space> [shape: f32[1,1], index: 4, kind: input, shape index: {}]   ;;  %s2953_s5 = inlined_call_operand.vmem [shape: f32[1,512], index: 5, kind: output, shape index: {}]  }
   0x1   :  { %v10_v0 = vstv %s2952_s4 }
   0x2   :  { %11 = vst [vmem:[#allocation2] sm:$0x1] %v10_v0 }
   0x3   :  { %s1795_s20 = smov 0   ;;  %s1797_s21 = smov 0  }
   0x4   :  { %s1799_s22 = smov 0  }
   0x5 LB: > { %s1543_s4 = sadd.s32 4294967295, %s1758_s22   ;;  %s1812_s23 = sadd.s32 1, %s1758_s22   ;;  %s1758_s22 = sphi %s1799_s22, %s3170_s22   ;;  %s1754_s21 = sphi %s1797_s21, %s3169_s21   ;;  %s1750_s20 = sphi %s1795_s20, %s3168_s20  }
   0x6   : > { %s21_s24 = ssub.s32 %s1758_s22, %s1812_s23  ;;  %s24_s25 = sadd.s32 1, %s1754_s21 }
   0x7   : > { %p22_p0 = scmp.eq.s32.totalorder %s21_s24, 0  ;;  %p31_p1 = scmp.ne.s32.totalorder %s1754_s21, %s1750_s20 }
   0x8   : > { %p32_p2 = scmp.eq.s32.totalorder %s1758_s22, 0  ;;  %p1546_p4 = scmp.ge.s32.totalorder %s1758_s22, 2 }
   0x9   : > { %s1821_s26 = scalar_select %p22_p0, %s1754_s21, %s24_s25  }
   0xa   : > { %p33_p3 = por %p32_p2, %p31_p1  ;;  %179 = sbr.rel (%p1546_p4) target bundleno = 23 (0x17), region = 32 }
   0xf   : > { %182 = sbr.rel (!%p33_p3) target bundleno = 23 (0x17), region = 36  ;;  %s184_s27 = sand.u32 (%p33_p3), 1, %s1754_s21  }
  0x10   : > { %s1571_s28 = sshll.u32 (%p33_p3), %s1758_s22, 4  ;;  %s1547_s29 = sshll.u32 (%p33_p3), %s184_s27, 6 }
  0x11   : > { %s189_s7 = scalar_lea.vmem (%p33_p3), %s2948_s0, %s1571_s28  ;;  %s186_s8 = scalar_lea.vmem (%p33_p3), [#allocation3], %s1547_s29 }
  0x12   : > { %v202_v1 = vld [vmem:[%s189_s7] sm:$0xff] (%p33_p3)  ;;  %v204_v2 = vld [vmem:[%s189_s7 + $0x8] sm:$0xff] (%p33_p3) }
  0x13   : > { %v206_v3 = vld [vmem:[%s189_s7 + $0x20] sm:$0xff] (%p33_p3)  ;;  %203 = vst [vmem:[%s186_s8] sm:$0xff] (%p33_p3), %v202_v1  ;;  %205 = vst [vmem:[%s186_s8 + $0x8] sm:$0xff] (%p33_p3), %v204_v2  ;;  %v208_v4 = vld [vmem:[%s189_s7 + $0x28] sm:$0xff] (%p33_p3) }
  0x14   : > { %207 = vst [vmem:[%s186_s8 + $0x10] sm:$0xff] %v206_v3  ;;  %v210_v5 = vld [vmem:[%s189_s7 + $0x40] sm:$0xff]  ;;  %v212_v6 = vld [vmem:[%s189_s7 + $0x48] sm:$0xff]  ;;  %209 = vst [vmem:[%s186_s8 + $0x18] sm:$0xff] %v208_v4 }
  0x15   : > { %211 = vst [vmem:[%s186_s8 + $0x20] sm:$0xff] %v210_v5  ;;  %213 = vst [vmem:[%s186_s8 + $0x28] sm:$0xff] %v212_v6  ;;  %v214_v7 = vld [vmem:[%s189_s7 + $0x60] sm:$0xff]  ;;  %v216_v8 = vld [vmem:[%s189_s7 + $0x68] sm:$0xff] }
  0x16   : > { %215 = vst [vmem:[%s186_s8 + $0x30] sm:$0xff] %v214_v7  ;;  %217 = vst [vmem:[%s186_s8 + $0x38] sm:$0xff] %v216_v8 }
  0x17 PF: > { %p1550_p5 = scmp.ge.s32.totalorder %s1758_s22, 1  ;;  %p222_p6 = scmp.lt.s32.totalorder %s1758_s22, 3 }
  0x19   : > { %p223_p7 = pnand %p1550_p5, %p222_p6 }
  0x1b   : > { %226 = sbr.rel (%p223_p7) target bundleno = 690 (0x2b2), region = 59 }
  0x20   : > { %s229_s9 = sand.u32 1, %s1750_s20   ;;  %v1760_v9 = vmov 0   ;;  %v304_v22 = vld [vmem:[%s2950_s2 + $0x70] sm:$0xff]  ;;  %v302_v23 = vld [vmem:[%s2950_s2 + $0x60] sm:$0xff]  ;;  %vm426_vm0 = vcmask 261120   ;;  %v305_v25 = vld [vmem:[%s2950_s2 + $0x78] sm:$0xff] }
  0x21   : > { %s1551_s10 = sshll.u32 %s229_s9, 6  ;;  %483 = vmatprep.mubr.bf16.mxu0 %v1760_v9  ;;  %1598 = vset.pattern.permute.xlu0 %v1760_v9  ;;  %v1600_v24 = vld [vmem:[%s2949_s1] sm:$0xff]   ;;  %v303_v26 = vld [vmem:[%s2950_s2 + $0x68] sm:$0xff]  ;;  %v300_v27 = vld [vmem:[%s2950_s2 + $0x50] sm:$0xff]  ;;  %s1552_s20 = sshll.u32 %s1543_s4, 1 }
  0x22   : > { %1599 = vset.pattern.permute.xlu1 %v1760_v9  ;;  %1455 = vmatprep.mubr.bf16.mxu1 %v1760_v9  ;;  %s231_s11 = scalar_lea.vmem [#allocation3], %s1551_s10  ;;  %v301_v28 = vld [vmem:[%s2950_s2 + $0x58] sm:$0xff]  ;;  %v1601_v29 = vld [vmem:[%s2949_s1 + $0x8] sm:$0xff]   ;;  %v298_v30 = vld [vmem:[%s2950_s2 + $0x40] sm:$0xff]  ;;  %p257_p8 = scmp.lt.s32.totalorder %s1552_s20, 3 }
  0x23   : > { %v283_v10 = vld [vmem:[%s231_s11 + $0x28] sm:$0xff]  ;;  %v285_v11 = vld [vmem:[%s231_s11 + $0x38] sm:$0xff]  ;;  %v282_v12 = vld [vmem:[%s231_s11 + $0x20] sm:$0xff]  ;;  %378 = vperm.xlu0 %1598, %v304_v22   ;;  %368 = vperm.xlu1 %1599, %v302_v23  }
  0x24   : > { %v289_v13 = vpack.c.bf16 %v285_v11, %v283_v10  ;;  %v284_v14 = vld [vmem:[%s231_s11 + $0x30] sm:$0xff]  ;;  %v279_v15 = vld [vmem:[%s231_s11 + $0x8] sm:$0xff]  ;;  %v281_v16 = vld [vmem:[%s231_s11 + $0x18] sm:$0xff]  ;;  %s3172_s20 = smov (!%p257_p8, %s1552_s20), 3 }
  0x25   : > { %v288_v17 = vpack.c.bf16 %v284_v14, %v282_v12  ;;  %v287_v18 = vpack.c.bf16 %v281_v16, %v279_v15  ;;  %v278_v19 = vld [vmem:[%s231_s11] sm:$0xff]  ;;  %v280_v20 = vld [vmem:[%s231_s11 + $0x10] sm:$0xff]  ;;  %v1413_v42 = vld [vmem:[#allocation2] sm:$0x1]  ;;  %s259_s22 = scalar_lea.vmem %s2953_s5, %s3172_s20 }
  0x26   : > { %463 = vmatprep.subr.bf16.mxu0 %v289_v13  ;;  %v286_v21 = vpack.c.bf16 %v280_v20, %v278_v19  ;;  %v299_v31 = vld [vmem:[%s2950_s2 + $0x48] sm:$0xff]  ;;  %v296_v32 = vld [vmem:[%s2950_s2 + $0x30] sm:$0xff]  ;;  %v297_v33 = vld [vmem:[%s2950_s2 + $0x38] sm:$0xff] }
  0x27   : > { %464 = vmatpush1.bf16.msra.mxu0 %v288_v17  ;;  %383 = vperm.xlu0 %1598, %v305_v25   ;;  %v1602_v34 = vld [vmem:[%s2949_s1 + $0x10] sm:$0xff]   ;;  %v294_v35 = vld [vmem:[%s2950_s2 + $0x20] sm:$0xff]  ;;  %v295_v36 = vld [vmem:[%s2950_s2 + $0x28] sm:$0xff] }
  0x28   : > { %465 = vmatprep.subr.bf16.mxu0 %v287_v18  ;;  %373 = vperm.xlu1 %1599, %v303_v26   ;;  %v292_v37 = vld [vmem:[%s2950_s2 + $0x10] sm:$0xff]  ;;  %v293_v38 = vld [vmem:[%s2950_s2 + $0x18] sm:$0xff]  ;;  %v290_v40 = vld [vmem:[%s2950_s2] sm:$0xff] }
  0x29   : > { %v1603_v39 = vld [vmem:[%s2949_s1 + $0x18] sm:$0xff]   ;;  %v291_v41 = vld [vmem:[%s2950_s2 + $0x8] sm:$0xff]  ;;  %v1604_v43 = vld [vmem:[%s2949_s1 + $0x20] sm:$0xff]  }
  0x2a   : > { %v1605_v44 = vld [vmem:[%s2949_s1 + $0x28] sm:$0xff]   ;;  %v1606_v45 = vld [vmem:[%s2949_s1 + $0x30] sm:$0xff]   ;;  %v1607_v46 = vld [vmem:[%s2949_s1 + $0x38] sm:$0xff]  }
  0x2b   : > { %466 = vmatpush1.bf16.msra.mxu0 %v286_v21  ;;  %358 = vperm.xlu0 %1598, %v300_v27  }
  0x2c   : > { %363 = vperm.xlu1 %1599, %v301_v28  }
  0x2e   : > { %1561 = vmatmul.mubr.msk.bf16.vlgmr.msra.gmra.mxu0 %vm426_vm0, %v1600_v24 }
  0x2f   : > { %493 = vmatprep.mubr.bf16.mxu0 %v1760_v9  ;;  %348 = vperm.xlu0 %1598, %v298_v30  }
  0x30   : > { %353 = vperm.xlu1 %1599, %v299_v31  }
  0x33   : > { %338 = vperm.xlu0 %1598, %v296_v32  }
  0x34   : > { %343 = vperm.xlu1 %1599, %v297_v33  }
  0x36   : > { %1562 = vmatmul.mubr.msk.bf16.gmra.mxu0 %vm426_vm0, %v1601_v29 }
  0x37   : > { %503 = vmatprep.mubr.bf16.mxu0 %v1760_v9  ;;  %328 = vperm.xlu0 %1598, %v294_v35  }
  0x38   : > { %333 = vperm.xlu1 %1599, %v295_v36  }
  0x3b   : > { %318 = vperm.xlu0 %1598, %v292_v37  }
  0x3c   : > { %323 = vperm.xlu1 %1599, %v293_v38  }
  0x3e   : > { %1563 = vmatmul.mubr.msk.bf16.gmra.mxu0 %vm426_vm0, %v1602_v34 }
  0x3f   : > { %513 = vmatprep.mubr.bf16.mxu0 %v1760_v9  ;;  %308 = vperm.xlu0 %1598, %v290_v40  }
  0x40   : > { %313 = vperm.xlu1 %1599, %v291_v41  }
  0x43   : > { %1416 = vperm.xlu0 %1598, %v1413_v42  }
  0x46   : > { %1564 = vmatmul.mubr.msk.bf16.gmra.mxu0 %vm426_vm0, %v1603_v39 }
  0x47   : > { %523 = vmatprep.mubr.bf16.mxu0 %v1760_v9 }
  0x4e   : > { %1565 = vmatmul.mubr.msk.bf16.gmra.mxu0 %vm426_vm0, %v1604_v43 }
  0x4f   : > { %533 = vmatprep.mubr.bf16.mxu0 %v1760_v9 }
  0x56   : > { %1566 = vmatmul.mubr.msk.bf16.gmra.mxu0 %vm426_vm0, %v1605_v44 }
  0x57   : > { %543 = vmatprep.mubr.bf16.mxu0 %v1760_v9 }
  0x5e   : > { %1567 = vmatmul.mubr.msk.bf16.gmra.mxu0 %vm426_vm0, %v1606_v45 }
  0x5f   : > { %553 = vmatprep.mubr.bf16.mxu0 %v1760_v9 }
  0x66   : > { %1568 = vmatmul.mubr.msk.bf16.gmra.mxu0 %vm426_vm0, %v1607_v46 }
  0x9e   : > { %v1923_v47 = vpop.permute.xlu0 %378  ;;  %v1929_v50 = vpop.permute.xlu1 %368 }
  0x9f   : > { %3025 = vst [vmem:[#allocation4_spill] sm:$0xff] %v1923_v47  ;;  %3028 = vst [vmem:[#allocation7_spill] sm:$0xff] %v1929_v50 }
  0xa2   : > { %v1925_v48 = vpop.permute.xlu0 %383 }
  0xa3   : > { %3026 = vst [vmem:[#allocation5_spill] sm:$0xff] %v1925_v48  ;;  %v1933_v52 = vpop.permute.xlu1 %373 }
  0xa4   : > { %3029 = vst [vmem:[#allocation8_spill] sm:$0xff] %v1933_v52 }
  0xa6   : > { %v1927_v49 = vpop.permute.xlu0 %358 }
  0xa7   : > { %3027 = vst [vmem:[#allocation6_spill] sm:$0xff] %v1927_v49  ;;  %v1937_v54 = vpop.permute.xlu1 %363 }
  0xa8   : > { %3030 = vst [vmem:[#allocation9_spill] sm:$0xff] %v1937_v54 }
  0xaa   : > { %v1931_v51 = vpop.permute.xlu0 %348 }
  0xab   : > { %v1941_v56 = vpop.permute.xlu1 %353 }
  0xae   : > { %v1935_v53 = vpop.permute.xlu0 %338 }
  0xaf   : > { %v1943_v58 = vpop.permute.xlu1 %343 }
  0xb2   : > { %v1939_v55 = vpop.permute.xlu0 %328 }
  0xb3   : > { %v1945_v61 = vpop.permute.xlu1 %333 }
  0xb6   : > { %v319_v57 = vpop.permute.xlu0 %318 }
  0xb7   : > { %v324_v0 = vpop.permute.xlu1 %323 }
  0xba   : > { %v309_v60 = vpop.permute.xlu0 %308 }
  0xbb   : > { %v314_v7 = vpop.permute.xlu1 %313 }
  0xee   : > { %v485_v59 = vpop.f32.mrf.mxu0 }
  0xef   : > { %v1947_v62 = vadd.f32 %v485_v59, %v309_v60 }
  0xf0   : > { %v487_v63 = vpop.f32.mrf.mxu0 }
  0xf1   : > { %v1950_v1 = vmul.f32 0.70710677, %v1947_v62  ;;  %v1952_v3 = vadd.f32 %v487_v63, %v309_v60 }
  0xf2   : > { %v489_v2 = vpop.f32.mrf.mxu0 }
  0xf3   : > { %v1955_v4 = vand.u32 2147483647, %v1950_v1  ;;  %v1958_v6 = vmul.f32 0.70710677, %v1952_v3  ;;  %v1961_v10 = vadd.f32 %v489_v2, %v314_v7  ;;  %vm1236_vm1 = vcmp.lt.f32.partialorder %v1950_v1, 0.0 }
  0xf4   : > { %v491_v5 = vpop.f32.mrf.mxu0 }
  0xf5   : > { %v660_v8 = vmul.f32 0.3275911, %v1955_v4  ;;  %v1964_v11 = vand.u32 2147483647, %v1958_v6  ;;  %v1967_v14 = vmul.f32 0.70710677, %v1961_v10  ;;  %v1969_v15 = vadd.f32 %v491_v5, %v314_v7 }
  0xf6   : > { %v495_v9 = vpop.f32.mrf.mxu0  ;;  %vm1237_vm2 = vcmp.lt.f32.partialorder %v1958_v6, 0.0 }
  0xf7   : > { %v692_v12 = vadd.f32 1.0, %v660_v8  ;;  %v661_v16 = vmul.f32 0.3275911, %v1964_v11  ;;  %v1973_v18 = vand.u32 2147483647, %v1967_v14  ;;  %v1978_v20 = vadd.f32 %v495_v9, %v319_v57 }
  0xf8   : > { %v497_v13 = vpop.f32.mrf.mxu0  ;;  %v1976_v19 = vmul.f32 0.70710677, %v1969_v15  ;;  %vm1238_vm3 = vcmp.lt.f32.partialorder %v1967_v14, 0.0 }
  0xf9   : > { %1608 = vrcp.f32 %v692_v12  ;;  %v693_v21 = vadd.f32 1.0, %v661_v16  ;;  %v1980_v22 = vadd.f32 %v497_v13, %v319_v57  ;;  %v662_v24 = vmul.f32 0.3275911, %v1973_v18 }
  0xfa   : > { %v499_v17 = vpop.f32.mrf.mxu0  ;;  %v1986_v25 = vand.u32 2147483647, %v1976_v19  ;;  %v1989_v26 = vmul.f32 0.70710677, %v1978_v20  ;;  %v1044_v16 = vsub.f32 0.0, %v1955_v4  ;;  %vm1239_vm4 = vcmp.lt.f32.partialorder %v1976_v19, 0.0 }
  0xfb   : > { %v1982_v23 = vadd.f32 %v499_v17, %v324_v0  ;;  %1610 = vrcp.f32 %v693_v21  ;;  %v1992_v28 = vmul.f32 0.70710677, %v1980_v22  ;;  %v694_v31 = vadd.f32 1.0, %v662_v24 }
  0xfc   : > { %v501_v27 = vpop.f32.mrf.mxu0  ;;  %v663_v32 = vmul.f32 0.3275911, %v1986_v25  ;;  %v2001_v33 = vand.u32 2147483647, %v1989_v26  ;;  %vm1240_vm5 = vcmp.lt.f32.partialorder %v1989_v26, 0.0 }
  0xfd   : > { %v1995_v29 = vmul.f32 0.70710677, %v1982_v23  ;;  %v1997_v30 = vadd.f32 %v501_v27, %v324_v0  ;;  %v2004_v34 = vand.u32 2147483647, %v1992_v28  ;;  %1612 = vrcp.f32 %v694_v31 }
  0xfe   : > { %v695_v38 = vadd.f32 1.0, %v663_v32  ;;  %v664_v39 = vmul.f32 0.3275911, %v2001_v33  ;;  %v505_v42 = vpop.f32.mrf.mxu0  ;;  %v1045_v27 = vsub.f32 0.0, %v1964_v11  ;;  %vm1241_vm6 = vcmp.lt.f32.partialorder %v1992_v28, 0.0 }
  0xff   : > { %v2007_v35 = vand.u32 2147483647, %v1995_v29  ;;  %v2010_v36 = vmul.f32 0.70710677, %v1997_v30  ;;  %v665_v40 = vmul.f32 0.3275911, %v2004_v34  ;;  %v2025_v2 = vadd.f32 %v505_v42, %v1939_v55 }
 0x100   : > { %1614 = vrcp.f32 %v695_v38  ;;  %v696_v45 = vadd.f32 1.0, %v664_v39  ;;  %v507_v60 = vpop.f32.mrf.mxu0  ;;  %v1076_v38 = vmul.f32 %v1044_v16, %v1955_v4  ;;  %vm1242_vm7 = vcmp.lt.f32.partialorder %v1995_v29, 0.0 }
 0x101   : > { %v666_v41 = vmul.f32 0.3275911, %v2007_v35  ;;  %v2019_v44 = vand.u32 2147483647, %v2010_v36  ;;  %v697_v46 = vadd.f32 1.0, %v665_v40  ;;  %3031 = vst [vmem:[#allocation10_spill] sm:$0xff] %v2025_v2  ;;  %v2029_v7 = vadd.f32 %v507_v60, %v1939_v55 }
 0x102   : > { %1616 = vrcp.f32 %v696_v45  ;;  %v2033_v12 = vmul.f32 0.70710677, %v2025_v2  ;;  %v1047_v45 = vsub.f32 0.0, %v1986_v25  ;;  %v1108_v4 = vmul.f32 1.442695, %v1076_v38 }
 0x103   : > { %v698_v59 = vadd.f32 1.0, %v666_v41  ;;  %v667_v0 = vmul.f32 0.3275911, %v2019_v44  ;;  %1618 = vrcp.f32 %v697_v46  ;;  %3032 = vst [vmem:[#allocation11_spill] sm:$0xff] %v2029_v7  ;;  %v2039_v21 = vmul.f32 0.70710677, %v2029_v7 }
 0x104   : > { %3033 = vst [vmem:[#allocation12_spill] sm:$0xff] %v2033_v12  ;;  %v2044_v31 = vand.u32 2147483647, %v2033_v12  ;;  %v1046_v41 = vsub.f32 0.0, %v1973_v18  ;;  %v1079_v38 = vmul.f32 %v1047_v45, %v1986_v25  ;;  %v2079_v2 = vmul.f32 0.5, %v1969_v15  ;;  %v509_v12 = vpop.f32.mrf.mxu0 }
 0x105   : > { %1620 = vrcp.f32 %v698_v59  ;;  %v699_v9 = vadd.f32 1.0, %v667_v0  ;;  %v2051_v40 = vand.u32 2147483647, %v2039_v21  ;;  %v2087_v15 = vmul.f32 0.5, %v1978_v20 }
 0x106   : > { %v2012_v37 = vpop.eup %1608  ;;  %v668_v60 = vmul.f32 0.3275911, %v2044_v31  ;;  %v1078_v16 = vmul.f32 %v1046_v41, %v1973_v18  ;;  %v1114_v45 = vmul.f32 1.442695, %v1079_v38  ;;  %v511_v38 = vpop.f32.mrf.mxu0  ;;  %vm1243_vm8 = vcmp.lt.f32.partialorder %v2010_v36, 0.0 }
 0x107   : > { %v756_v43 = vmul.f32 1.0614054, %v2012_v37  ;;  %1622 = vrcp.f32 %v699_v9  ;;  %v2065_v9 = vmul.f32 0.5, %v1947_v62  ;;  %vm1245_vm9 = vcmp.lt.f32.partialorder %v2039_v21, 0.0 }
 0x108   : > { %v2021_v57 = vpop.eup %1610  ;;  %v700_v7 = vadd.f32 1.0, %v668_v60  ;;  %1624 = vpow2.f32 %v1108_v4  ;;  %v1048_v4 = vsub.f32 0.0, %v2001_v33 }
 0x109   : > { %v788_v63 = vadd.f32 -1.4531521, %v756_v43  ;;  %v757_v5 = vmul.f32 1.0614054, %v2021_v57  ;;  %v1077_v43 = vmul.f32 %v1045_v27, %v1964_v11  ;;  %v2068_v11 = vmul.f32 0.5, %v1952_v3 }
 0x10a   : > { %v2035_v13 = vpop.eup %1612 }
 0x10b   : > { %v820_v8 = vmul.f32 %v2012_v37, %v788_v63  ;;  %v789_v17 = vadd.f32 -1.4531521, %v757_v5  ;;  %v758_v55 = vmul.f32 1.0614054, %v2035_v13  ;;  %v669_v5 = vmul.f32 0.3275911, %v2051_v40 }
 0x10c   : > { %v1110_v27 = vmul.f32 1.442695, %v1077_v43 }
 0x10d   : > { %v852_v24 = vadd.f32 1.4214138, %v820_v8  ;;  %v2046_v32 = vpop.eup %1614  ;;  %v821_v39 = vmul.f32 %v2021_v57, %v789_v17  ;;  %v790_v46 = vadd.f32 -1.4531521, %v758_v55  ;;  %v2074_v55 = vmul.f32 0.5, %v1961_v10 }
 0x10e   : > { %v759_v59 = vmul.f32 1.0614054, %v2046_v32  ;;  %v701_v41 = vadd.f32 1.0, %v669_v5  ;;  %1626 = vpow2.f32 %v1110_v27 }
 0x10f   : > { %v884_v42 = vmul.f32 %v2012_v37, %v852_v24  ;;  %v2059_v63 = vpop.eup %1616  ;;  %v853_v0 = vadd.f32 1.4214138, %v821_v39  ;;  %v822_v39 = vmul.f32 %v2035_v13, %v790_v46  ;;  %1628 = vrcp.f32 %v700_v7 }
 0x110   : > { %v2062_v8 = vpop.eup %1618  ;;  %v791_v62 = vadd.f32 -1.4531521, %v759_v59  ;;  %v760_v18 = vmul.f32 1.0614054, %v2059_v63  ;;  %1630 = vrcp.f32 %v701_v41 }
 0x111   : > { %v916_v24 = vadd.f32 -0.28449672, %v884_v42  ;;  %v885_v3 = vmul.f32 %v2021_v57, %v853_v0  ;;  %v1112_v42 = vmul.f32 1.442695, %v1078_v16  ;;  %v761_v43 = vmul.f32 1.0614054, %v2062_v8 }
 0x112   : > { %v2071_v17 = vpop.eup %1620  ;;  %v854_v59 = vadd.f32 1.4214138, %v822_v39  ;;  %v823_v60 = vmul.f32 %v2046_v32, %v791_v62  ;;  %v792_v5 = vadd.f32 -1.4531521, %v760_v18  ;;  %v2094_v16 = vadd.f32 %v509_v12, %v1945_v61 }
 0x113   : > { %v762_v10 = vmul.f32 1.0614054, %v2071_v17  ;;  %v948_v25 = vmul.f32 %v2012_v37, %v916_v24  ;;  %v917_v0 = vadd.f32 -0.28449672, %v885_v3  ;;  %1632 = vpow2.f32 %v1112_v42 }
 0x114   : > { %v2089_v46 = vpop.eup %1622  ;;  %3034 = vst [vmem:[#allocation13_spill] sm:$0xff] %v2094_v16  ;;  %v2097_v24 = vmul.f32 0.5, %v1980_v22  ;;  %v793_v20 = vadd.f32 -1.4531521, %v761_v43  ;;  %v1049_v39 = vsub.f32 0.0, %v2004_v34  ;;  %v2101_v62 = vmul.f32 0.5, %v1982_v23 }
 0x115   : > { %v794_v27 = vadd.f32 -1.4531521, %v762_v10  ;;  %v980_v48 = vadd.f32 0.2548296, %v948_v25  ;;  %v763_v7 = vmul.f32 1.0614054, %v2089_v46  ;;  %v886_v3 = vmul.f32 %v2035_v13, %v854_v59  ;;  %v515_v59 = vpop.f32.mrf.mxu0 }
 0x116   : > { %v855_v18 = vadd.f32 1.4214138, %v823_v60  ;;  %1634 = vpow2.f32 %v1114_v45  ;;  %v1080_v12 = vmul.f32 %v1048_v4, %v2001_v33  ;;  %v949_v22 = vmul.f32 %v2021_v57, %v917_v0 }
 0x117   : > { %v824_v41 = vmul.f32 %v2059_v63, %v792_v5  ;;  %v1050_v42 = vsub.f32 0.0, %v2007_v35  ;;  %v2110_v43 = vmul.f32 0.70710677, %v2094_v16  ;;  %v825_v23 = vmul.f32 %v2062_v8, %v793_v20 }
 0x118   : > { %v826_v10 = vmul.f32 %v2071_v17, %v794_v27  ;;  %v2115_v25 = vmul.f32 0.5, %v1997_v30  ;;  %v1051_v45 = vsub.f32 0.0, %v2019_v44  ;;  %v1012_v33 = vmul.f32 %v2012_v37, %v980_v48  ;;  %v1625_v48 = vpop.eup %1624 }
 0x119   : > { %3035 = vst [vmem:[#allocation14_spill] sm:$0xff] %v2110_v43  ;;  %v1081_v60 = vmul.f32 %v1049_v39, %v2004_v34  ;;  %v795_v4 = vadd.f32 -1.4531521, %v763_v7  ;;  %v2121_v0 = vadd.f32 %v511_v38, %v1945_v61  ;;  %v918_v5 = vadd.f32 -0.28449672, %v886_v3  ;;  %v517_v38 = vpop.f32.mrf.mxu0 }
 0x11a   : > { %v887_v16 = vmul.f32 %v2046_v32, %v855_v18  ;;  %v1116_v20 = vmul.f32 1.442695, %v1080_v12  ;;  %v1052_v27 = vsub.f32 0.0, %v2044_v31  ;;  %v981_v47 = vadd.f32 0.2548296, %v949_v22 }
 0x11b   : > { %3036 = vst [vmem:[#allocation15_spill] sm:$0xff] %v2121_v0  ;;  %v856_v30 = vadd.f32 1.4214138, %v824_v41  ;;  %v1082_v52 = vmul.f32 %v1050_v42, %v2007_v35  ;;  %v2127_v50 = vand.u32 2147483647, %v2110_v43  ;;  %v1083_v39 = vmul.f32 %v1051_v45, %v2019_v44  ;;  %v1627_v35 = vpop.eup %1626 }
 0x11c   : > { %v857_v37 = vadd.f32 1.4214138, %v825_v23  ;;  %v858_v34 = vadd.f32 1.4214138, %v826_v10  ;;  %v2131_v61 = vadd.f32 %v515_v59, %v1935_v53  ;;  %v1172_v7 = vmul.f32 %v1625_v48, %v1012_v33  ;;  %v2139_v23 = vpop.eup %1628 }
 0x11d   : > { %v1118_v3 = vmul.f32 1.442695, %v1081_v60  ;;  %v827_v18 = vmul.f32 %v2089_v46, %v795_v4  ;;  %v2135_v12 = vmul.f32 0.70710677, %v2121_v0  ;;  %v950_v22 = vmul.f32 %v2035_v13, %v918_v5  ;;  %v2144_v33 = vpop.eup %1630  ;;  %v519_v5 = vpop.f32.mrf.mxu0 }
 0x11e   : > { %3037 = vst [vmem:[#allocation16_spill] sm:$0xff] %v2131_v61  ;;  %v919_v41 = vadd.f32 -0.28449672, %v887_v16  ;;  %1636 = vpow2.f32 %v1116_v20  ;;  %v1084_v42 = vmul.f32 %v1052_v27, %v2044_v31  ;;  %v1013_v44 = vmul.f32 %v2021_v57, %v981_v47 }
 0x11f   : > { %3038 = vst [vmem:[#allocation17_spill] sm:$0xff] %v2135_v12  ;;  %v888_v10 = vmul.f32 %v2059_v63, %v856_v30  ;;  %v1120_v45 = vmul.f32 1.442695, %v1082_v52  ;;  %v670_v59 = vmul.f32 0.3275911, %v2127_v50  ;;  %v889_v60 = vmul.f32 %v2062_v8, %v857_v37 }
 0x120   : > { %v890_v16 = vmul.f32 %v2071_v17, %v858_v34  ;;  %v1122_v4 = vmul.f32 1.442695, %v1083_v39  ;;  %v2150_v31 = vmul.f32 0.70710677, %v2131_v61  ;;  %v1633_v20 = vpop.eup %1632  ;;  %v1204_v47 = vsub.f32 1.0, %v1172_v7 }
 0x121   : > { %1638 = vpow2.f32 %v1118_v3  ;;  %v859_v57 = vadd.f32 1.4214138, %v827_v18  ;;  %v2153_v52 = vand.u32 2147483647, %v2135_v12  ;;  %v982_v27 = vadd.f32 0.2548296, %v950_v22  ;;  %v521_v3 = vpop.f32.mrf.mxu0 }
 0x122   : > { %3039 = vst [vmem:[#allocation18_spill] sm:$0xff] %v2150_v31  ;;  %v951_v30 = vmul.f32 %v2046_v32, %v919_v41  ;;  %v764_v48 = vmul.f32 1.0614054, %v2139_v23  ;;  %v1124_v37 = vmul.f32 1.442695, %v1084_v42  ;;  %v1173_v34 = vmul.f32 %v1627_v35, %v1013_v44 }
 0x123   : > { %v1635_v0 = vpop.eup %1634  ;;  %v920_v39 = vadd.f32 -0.28449672, %v888_v10  ;;  %v765_v61 = vmul.f32 1.0614054, %v2144_v33  ;;  %v702_v43 = vadd.f32 1.0, %v670_v59  ;;  %1640 = vpow2.f32 %v1120_v45 }
 0x124   : > { %v921_v54 = vadd.f32 -0.28449672, %v889_v60  ;;  %v922_v49 = vadd.f32 -0.28449672, %v890_v16  ;;  %v2159_v7 = vand.u32 2147483647, %v2150_v31  ;;  %v891_v22 = vmul.f32 %v2089_v46, %v859_v57 }
 0x125   : > { %v1268_v18 = vsub.f32 0.0, %v1204_v47  ;;  %v671_v41 = vmul.f32 0.3275911, %v2153_v52  ;;  %v2164_v42 = vadd.f32 %v517_v38, %v1935_v53  ;;  %v1014_v35 = vmul.f32 %v2035_v13, %v982_v27  ;;  %v525_v38 = vpop.f32.mrf.mxu0 }
 0x126   : > { %v983_v44 = vadd.f32 0.2548296, %v951_v30  ;;  %1642 = vpow2.f32 %v1122_v4  ;;  %v796_v10 = vadd.f32 -1.4531521, %v764_v48  ;;  %v1205_v45 = vsub.f32 1.0, %v1173_v34 }
 0x127   : > { %v952_v59 = vmul.f32 %v2059_v63, %v920_v39  ;;  %v797_v60 = vadd.f32 -1.4531521, %v765_v61  ;;  %1644 = vrcp.f32 %v702_v43  ;;  %v953_v16 = vmul.f32 %v2062_v8, %v921_v54 }
 0x128   : > { %v954_v57 = vmul.f32 %v2071_v17, %v922_v49  ;;  %1646 = vpow2.f32 %v1124_v37  ;;  %v672_v53 = vmul.f32 0.3275911, %v2159_v7  ;;  %v1300_v31 = vsel %vm1236_vm1, %v1268_v18, %v1204_v47 }
 0x129   : > { %v923_v13 = vadd.f32 -0.28449672, %v891_v22  ;;  %v703_v27 = vadd.f32 1.0, %v671_v41  ;;  %v2175_v4 = vmul.f32 0.70710677, %v2164_v42  ;;  %v2177_v30 = vmul.f32 %v1633_v20, %v1014_v35  ;;  %v527_v20 = vpop.f32.mrf.mxu0 }
 0x12a   : > { %v828_v43 = vmul.f32 %v2139_v23, %v796_v10  ;;  %v1053_v54 = vsub.f32 0.0, %v2051_v40  ;;  %v2182_v49 = vadd.f32 %v519_v5, %v1943_v58  ;;  %v1269_v48 = vsub.f32 0.0, %v1205_v45 }
 0x12b   : > { %3040 = vst [vmem:[#allocation19_spill] sm:$0xff] %v2175_v4  ;;  %v1637_v61 = vpop.eup %1636  ;;  %v1015_v37 = vmul.f32 %v2046_v32, %v983_v44  ;;  %v984_v1 = vadd.f32 0.2548296, %v952_v59  ;;  %v829_v47 = vmul.f32 %v2144_v33, %v797_v60  ;;  %v1332_v34 = vadd.f32 1.0, %v1300_v31 }
 0x12c   : > { %3041 = vst [vmem:[#allocation20_spill] sm:$0xff] %v2182_v49  ;;  %v985_v39 = vadd.f32 0.2548296, %v953_v16  ;;  %v986_v18 = vadd.f32 0.2548296, %v954_v57  ;;  %v704_v22 = vadd.f32 1.0, %v672_v53  ;;  %v955_v41 = vmul.f32 %v2089_v46, %v923_v13 }
 0x12d   : > { %1648 = vrcp.f32 %v703_v27  ;;  %v2188_v35 = vand.u32 2147483647, %v2175_v4  ;;  %v2191_v5 = vadd.f32 %v521_v3, %v1943_v58  ;;  %v1206_v32 = vsub.f32 1.0, %v2177_v30 }
 0x12e   : > { %v1639_v10 = vpop.eup %1638  ;;  %v860_v44 = vadd.f32 1.4214138, %v828_v43  ;;  %v2196_v31 = vmul.f32 0.70710677, %v2182_v49  ;;  %v2199_v59 = vadd.f32 %v525_v38, %v1931_v51  ;;  %v1301_v60 = vsel %vm1237_vm2, %v1269_v48, %v1205_v45  ;;  %v529_v45 = vpop.f32.mrf.mxu0 }
 0x12f   : > { %3042 = vst [vmem:[#allocation21_spill] sm:$0xff] %v2191_v5  ;;  %v2203_v16 = vmul.f32 %v1635_v0, %v1015_v37  ;;  %v861_v57 = vadd.f32 1.4214138, %v829_v47  ;;  %v2206_v58 = vadd.f32 %v527_v20, %v1931_v51  ;;  %v1016_v3 = vmul.f32 %v2059_v63, %v984_v1 }
 0x130   : > { %3043 = vst [vmem:[#allocation22_spill] sm:$0xff] %v2196_v31  ;;  %3044 = vst [vmem:[#allocation23_spill] sm:$0xff] %v2199_v59  ;;  %v1017_v53 = vmul.f32 %v2062_v8, %v985_v39  ;;  %v1085_v13 = vmul.f32 %v1053_v54, %v2051_v40  ;;  %1650 = vrcp.f32 %v704_v22  ;;  %v1641_v27 = vpop.eup %1640  ;;  %v1018_v38 = vmul.f32 %v2071_v17, %v986_v18 }
 0x131   : > { %v987_v30 = vadd.f32 0.2548296, %v955_v41  ;;  %v673_v6 = vmul.f32 0.3275911, %v2188_v35  ;;  %v2214_v0 = vmul.f32 0.70710677, %v2191_v5  ;;  %v892_v51 = vmul.f32 %v2139_v23, %v860_v44 }
 0x132   : > { %v1270_v43 = vsub.f32 0.0, %v1206_v32  ;;  %v2218_v63 = vand.u32 2147483647, %v2196_v31  ;;  %v2221_v8 = vmul.f32 0.70710677, %v2199_v59  ;;  %v2223_v54 = vadd.f32 1.0, %v1301_v60 }
 0x133   : > { %3045 = vst [vmem:[#allocation24_spill] sm:$0xff] %v2214_v0  ;;  %v1643_v40 = vpop.eup %1642  ;;  %v1207_v17 = vsub.f32 1.0, %v2203_v16  ;;  %v893_v48 = vmul.f32 %v2144_v33, %v861_v57  ;;  %v2228_v37 = vmul.f32 0.70710677, %v2206_v58  ;;  %v1176_v47 = vmul.f32 %v1637_v61, %v1016_v3 }
 0x134   : > { %3046 = vst [vmem:[#allocation25_spill] sm:$0xff] %v2221_v8  ;;  %v2230_v1 = vpop.eup %1644  ;;  %v1177_v39 = vmul.f32 %v1639_v10, %v1017_v53  ;;  %v1126_v18 = vmul.f32 1.442695, %v1085_v13  ;;  %v2233_v22 = vadd.f32 %v529_v45, %v1941_v56  ;;  %v1178_v41 = vmul.f32 %v1641_v27, %v1018_v38 }
 0x135   : > { %v2235_v20 = vpop.eup %1646  ;;  %v1019_v44 = vmul.f32 %v2089_v46, %v987_v30  ;;  %v705_v60 = vadd.f32 1.0, %v673_v6  ;;  %v2239_v16 = vand.u32 2147483647, %v2214_v0  ;;  %v2242_v57 = vmul.f32 %v1332_v34, %v2065_v9  ;;  %v531_v9 = vpop.f32.mrf.mxu0 }
 0x136   : > { %3047 = vst [vmem:[#allocation26_spill] sm:$0xff] %v2233_v22  ;;  %v924_v49 = vadd.f32 -0.28449672, %v892_v51  ;;  %v674_v61 = vmul.f32 0.3275911, %v2218_v63  ;;  %v1302_v3 = vsel %vm1238_vm3, %v1270_v43, %v1206_v32  ;;  %v1208_v34 = vsub.f32 1.0, %v1176_v47 }
 0x137   : > { %3048 = vst [vmem:[#allocation27_spill] sm:$0xff] %v2242_v57  ;;  %v2246_v10 = vand.u32 2147483647, %v2221_v8  ;;  %v925_v46 = vadd.f32 -0.28449672, %v893_v48  ;;  %v1209_v27 = vsub.f32 1.0, %v1177_v39  ;;  %1652 = vpow2.f32 %v1126_v18 }
 0x138   : > { %v766_v53 = vmul.f32 1.0614054, %v2230_v1  ;;  %v2254_v13 = vand.u32 2147483647, %v2228_v37  ;;  %v2259_v14 = vmul.f32 0.70710677, %v2233_v22  ;;  %v1179_v38 = vmul.f32 %v1643_v40, %v1019_v44 }
 0x139   : > { %v1210_v32 = vsub.f32 1.0, %v1178_v41  ;;  %1654 = vrcp.f32 %v705_v60  ;;  %v675_v30 = vmul.f32 0.3275911, %v2239_v16  ;;  %v1334_v45 = vadd.f32 1.0, %v1302_v3 }
 0x13a   : > { %3049 = vst [vmem:[#allocation28_spill] sm:$0xff] %v2259_v14  ;;  %v2262_v6 = vpop.eup %1648  ;;  %v706_v43 = vadd.f32 1.0, %v674_v61  ;;  %v676_v51 = vmul.f32 0.3275911, %v2246_v10  ;;  %v2266_v48 = vadd.f32 %v531_v9, %v1941_v56  ;;  %v956_v47 = vmul.f32 %v2139_v23, %v924_v49 }
 0x13b   : > { %v957_v39 = vmul.f32 %v2144_v33, %v925_v46  ;;  %v798_v18 = vadd.f32 -1.4531521, %v766_v53  ;;  %v677_v41 = vmul.f32 0.3275911, %v2254_v13  ;;  %v1271_v40 = vsub.f32 0.0, %v1207_v17 }
 0x13c   : > { %v1272_v44 = vsub.f32 0.0, %v1208_v34  ;;  %v1273_v60 = vsub.f32 0.0, %v1209_v27  ;;  %v2272_v59 = vand.u32 2147483647, %v2259_v14  ;;  %v1274_v61 = vsub.f32 0.0, %v1210_v32 }
 0x13d   : > { %v2274_v3 = vpop.eup %1650  ;;  %v1211_v5 = vsub.f32 1.0, %v1179_v38  ;;  %v767_v56 = vmul.f32 1.0614054, %v2262_v6  ;;  %v707_v49 = vadd.f32 1.0, %v675_v30  ;;  %v1054_v46 = vsub.f32 0.0, %v2127_v50 }
 0x13e   : > { %1656 = vrcp.f32 %v706_v43  ;;  %v708_v53 = vadd.f32 1.0, %v676_v51  ;;  %v2280_v9 = vmul.f32 0.70710677, %v2266_v48  ;;  %v988_v22 = vadd.f32 0.2548296, %v956_v47 }
 0x13f   : > { %v989_v12 = vadd.f32 0.2548296, %v957_v39  ;;  %v830_v31 = vmul.f32 %v2230_v1, %v798_v18  ;;  %v709_v8 = vadd.f32 1.0, %v677_v41  ;;  %v1303_v38 = vsel %vm1239_vm4, %v1271_v40, %v1207_v17 }
 0x140   : > { %3050 = vst [vmem:[#allocation29_spill] sm:$0xff] %v2280_v9  ;;  %v1304_v4 = vsel %vm1240_vm5, %v1272_v44, %v1208_v34  ;;  %v768_v30 = vmul.f32 1.0614054, %v2274_v3  ;;  %v678_v0 = vmul.f32 0.3275911, %v2272_v59  ;;  %v1305_v43 = vsel %vm1241_vm6, %v1273_v60, %v1209_v27 }
 0x141   : > { %v1306_v51 = vsel %vm1242_vm7, %v1274_v61, %v1210_v32  ;;  %v799_v47 = vadd.f32 -1.4531521, %v767_v56  ;;  %1658 = vrcp.f32 %v707_v49  ;;  %v1275_v39 = vsub.f32 0.0, %v1211_v5 }
 0x142   : > { %v1086_v18 = vmul.f32 %v1054_v46, %v2127_v50  ;;  %1660 = vrcp.f32 %v708_v53  ;;  %v2295_v19 = vand.u32 2147483647, %v2280_v9  ;;  %v1020_v26 = vmul.f32 %v2139_v23, %v988_v22  ;;  %v2306_v50 = vpop.f32.mrf.mxu0 }
 0x143   : > { %v1021_v17 = vmul.f32 %v2144_v33, %v989_v12  ;;  %v862_v34 = vadd.f32 1.4214138, %v830_v31  ;;  %1662 = vrcp.f32 %v709_v8  ;;  %v2301_v28 = vmul.f32 %v2223_v54, %v2068_v11 }
 0x144   : > { %v2304_v29 = vmul.f32 %v1334_v45, %v2074_v55  ;;  %v800_v27 = vadd.f32 -1.4531521, %v768_v30  ;;  %v710_v32 = vadd.f32 1.0, %v678_v0  ;;  %v1653_v41 = vpop.eup %1652  ;;  %v1335_v40 = vadd.f32 1.0, %v1303_v38  ;;  %v2322_v36 = vpop.f32.mrf.mxu0 }
 0x145   : > { %v1336_v44 = vadd.f32 1.0, %v1304_v4  ;;  %v1337_v60 = vadd.f32 1.0, %v1305_v43  ;;  %v831_v23 = vmul.f32 %v2262_v6, %v799_v47  ;;  %v1338_v33 = vadd.f32 1.0, %v1306_v51 }
 0x146   : > { %v2309_v12 = vpop.eup %1654  ;;  %v1307_v11 = vsel %vm1243_vm8, %v1275_v39, %v1211_v5  ;;  %v1128_v31 = vmul.f32 1.442695, %v1086_v18  ;;  %v679_v55 = vmul.f32 0.3275911, %v2295_v19  ;;  %v2315_v8 = vmul.f32 %v2235_v20, %v1020_v26 }
 0x147   : > { %v1181_v0 = vmul.f32 %v1653_v41, %v1021_v17  ;;  %v894_v54 = vmul.f32 %v2230_v1, %v862_v34  ;;  %v1055_v4 = vsub.f32 0.0, %v2153_v52  ;;  %v832_v22 = vmul.f32 %v2274_v3, %v800_v27  ;;  %v2345_v17 = vpop.f32.mrf.mxu0 }
 0x148   : > { %3051 = vst [vmem:[#allocation30_spill] sm:$0xff] %v2315_v8  ;;  %v1056_v45 = vsub.f32 0.0, %v2159_v7  ;;  %v1057_v61 = vsub.f32 0.0, %v2188_v35  ;;  %1664 = vrcp.f32 %v710_v32  ;;  %v2325_v5 = vmul.f32 %v1335_v40, %v2079_v2 }
 0x149   : > { %v863_v56 = vadd.f32 1.4214138, %v831_v23  ;;  %v769_v20 = vmul.f32 1.0614054, %v2309_v12  ;;  %v1058_v49 = vsub.f32 0.0, %v2218_v63  ;;  %v2330_v46 = vmul.f32 %v1336_v44, %v2087_v15 }
 0x14a   : > { %v2333_v53 = vmul.f32 %v1337_v60, %v2097_v24  ;;  %v1339_v38 = vadd.f32 1.0, %v1307_v11  ;;  %v711_v30 = vadd.f32 1.0, %v679_v55  ;;  %v2338_v51 = vmul.f32 %v1338_v33, %v2101_v62  ;;  %v2369_v55 = vpop.f32.mrf.mxu0 }
 0x14b   : > { %v2335_v43 = vpop.eup %1656  ;;  %v2984_v2 = vsub.f32 1.0, %v2315_v8  ;;  %v926_v47 = vadd.f32 -0.28449672, %v894_v54  ;;  %v1087_v39 = vmul.f32 %v1055_v4, %v2153_v52  ;;  %v1213_v18 = vsub.f32 1.0, %v1181_v0 }
 0x14c   : > { %v864_v15 = vadd.f32 1.4214138, %v832_v22  ;;  %v1088_v26 = vmul.f32 %v1056_v45, %v2159_v7  ;;  %v1089_v24 = vmul.f32 %v1057_v61, %v2188_v35  ;;  %1666 = vpow2.f32 %v1128_v31 }
 0x14d   : > { %v895_v34 = vmul.f32 %v2262_v6, %v863_v56  ;;  %v801_v62 = vadd.f32 -1.4531521, %v769_v20  ;;  %v1090_v27 = vmul.f32 %v1058_v49, %v2218_v63  ;;  %v2352_v41 = vmul.f32 %v1339_v38, %v2115_v25 }
 0x14e   : > { %v2349_v32 = vpop.eup %1658  ;;  %v770_v52 = vmul.f32 1.0614054, %v2335_v43  ;;  %v1059_v40 = vsub.f32 0.0, %v2239_v16  ;;  %1668 = vrcp.f32 %v711_v30  ;;  %v2360_v35 = vsub.f32 0.0, %v2984_v2 }
 0x14f   : > { %v2356_v7 = vpop.eup %1660  ;;  %v958_v44 = vmul.f32 %v2230_v1, %v926_v47  ;;  %v1130_v60 = vmul.f32 1.442695, %v1087_v39  ;;  %v2364_v63 = vmul.f32 0.5, %v2164_v42  ;;  %v1277_v25 = vsub.f32 0.0, %v1213_v18  ;;  %v3055_v39 = vld [vmem:[#allocation6_spill] sm:$0xff] }
 0x150   : > { %3052 = vst [vmem:[#allocation31_spill] sm:$0xff] %v2360_v35  ;;  %v2366_v23 = vpop.eup %1662  ;;  %v896_v33 = vmul.f32 %v2274_v3, %v864_v15  ;;  %v1132_v11 = vmul.f32 1.442695, %v1088_v26  ;;  %v1134_v31 = vmul.f32 1.442695, %v1089_v24  ;;  %v833_v54 = vmul.f32 %v2309_v12, %v801_v62  ;;  %v2386_v26 = vpop.f32.mrf.mxu0 }
 0x151   : > { %3053 = vst [vmem:[#allocation32_spill] sm:$0xff] %v2364_v63  ;;  %v927_v0 = vadd.f32 -0.28449672, %v895_v34  ;;  %v1136_v4 = vmul.f32 1.442695, %v1090_v27  ;;  %v1060_v22 = vsub.f32 0.0, %v2246_v10  ;;  %v1091_v42 = vmul.f32 %v1059_v40, %v2239_v16 }
 0x152   : > { %v802_v45 = vadd.f32 -1.4531521, %v770_v52  ;;  %v771_v61 = vmul.f32 1.0614054, %v2349_v32  ;;  %v1061_v56 = vsub.f32 0.0, %v2254_v13  ;;  %1670 = vpow2.f32 %v1130_v60 }
 0x153   : > { %v990_v20 = vadd.f32 0.2548296, %v958_v44  ;;  %v772_v49 = vmul.f32 1.0614054, %v2356_v7  ;;  %v773_v38 = vmul.f32 1.0614054, %v2366_v23  ;;  %v2380_v30 = vsel %vm1245_vm9, %v1277_v25, %v1213_v18 }
 0x154   : > { %3054 = vst [vmem:[#allocation33_spill] sm:$0xff] %v2380_v30  ;;  %v928_v47 = vadd.f32 -0.28449672, %v896_v33  ;;  %1672 = vpow2.f32 %v1132_v11  ;;  %v2384_v15 = vadd.f32 %v2306_v50, %v3055_v39  ;;  %v959_v24 = vmul.f32 %v2262_v6, %v927_v0 }
 0x155   : > { %v2388_v16 = vpop.eup %1664  ;;  %v865_v34 = vadd.f32 1.4214138, %v833_v54  ;;  %1674 = vpow2.f32 %v1134_v31  ;;  %v1092_v62 = vmul.f32 %v1060_v22, %v2246_v10  ;;  %v834_v21 = vmul.f32 %v2335_v43, %v802_v45  ;;  %v547_v10 = vpop.f32.mrf.mxu0 }
 0x156   : > { %3056 = vst [vmem:[#allocation6_spill] sm:$0xff] %v2384_v15  ;;  %1676 = vpow2.f32 %v1136_v4  ;;  %v803_v18 = vadd.f32 -1.4531521, %v771_v61  ;;  %v1138_v27 = vmul.f32 1.442695, %v1091_v42  ;;  %v1022_v52 = vmul.f32 %v2230_v1, %v990_v20 }
 0x157   : > { %v804_v40 = vadd.f32 -1.4531521, %v772_v49  ;;  %v805_v50 = vadd.f32 -1.4531521, %v773_v38  ;;  %v1093_v44 = vmul.f32 %v1061_v56, %v2254_v13  ;;  %v960_v60 = vmul.f32 %v2274_v3, %v928_v47 }
 0x158   : > { %v774_v25 = vmul.f32 1.0614054, %v2388_v16  ;;  %v1062_v33 = vsub.f32 0.0, %v2272_v59  ;;  %v2399_v11 = vmul.f32 0.70710677, %v2384_v15  ;;  %v897_v0 = vmul.f32 %v2309_v12, %v865_v34 }
 0x159   : > { %v991_v31 = vadd.f32 0.2548296, %v959_v24  ;;  %v1140_v54 = vmul.f32 1.442695, %v1092_v62  ;;  %v2404_v1 = vadd.f32 %v2322_v36, %v3055_v39  ;;  %v1667_v4 = vpop.eup %1666  ;;  %v866_v13 = vadd.f32 1.4214138, %v834_v21  ;;  %v549_v24 = vpop.f32.mrf.mxu0 }
 0x15a   : > { %3057 = vst [vmem:[#allocation34_spill] sm:$0xff] %v2399_v11  ;;  %v835_v22 = vmul.f32 %v2349_v32, %v803_v18  ;;  %1678 = vpow2.f32 %v1138_v27  ;;  %v2408_v45 = vmul.f32 0.5, %v2206_v58  ;;  %v2412_v42 = vmul.f32 %v1667_v4, %v1022_v52 }
 0x15b   : > { %v2410_v61 = vpop.eup %1668  ;;  %v836_v56 = vmul.f32 %v2356_v7, %v804_v40  ;;  %v837_v20 = vmul.f32 %v2366_v23, %v805_v50  ;;  %v1142_v49 = vmul.f32 1.442695, %v1093_v44  ;;  %v992_v38 = vadd.f32 0.2548296, %v960_v60 }
 0x15c   : > { %3058 = vst [vmem:[#allocation35_spill] sm:$0xff] %v2408_v45  ;;  %3059 = vst [vmem:[#allocation36_spill] sm:$0xff] %v2412_v42  ;;  %v806_v36 = vadd.f32 -1.4531521, %v774_v25  ;;  %v1094_v47 = vmul.f32 %v1062_v33, %v2272_v59  ;;  %v2418_v39 = vand.u32 2147483647, %v2399_v11  ;;  %v1023_v58 = vmul.f32 %v2262_v6, %v991_v31  ;;  %v551_v31 = vpop.f32.mrf.mxu0 }
 0x15d   : > { %v929_v34 = vadd.f32 -0.28449672, %v897_v0  ;;  %1680 = vpow2.f32 %v1140_v54  ;;  %v2422_v62 = vmul.f32 0.70710677, %v2404_v1  ;;  %v898_v21 = vmul.f32 %v2335_v43, %v866_v13  ;;  %v3063_v13 = vld [vmem:[#allocation9_spill] sm:$0xff] }
 0x15e   : > { %v867_v18 = vadd.f32 1.4214138, %v835_v22  ;;  %v2426_v27 = vmul.f32 0.5, %v2266_v48  ;;  %v775_v52 = vmul.f32 1.0614054, %v2410_v61  ;;  %1682 = vpow2.f32 %v1142_v49 }
 0x15f   : > { %3060 = vst [vmem:[#allocation37_spill] sm:$0xff] %v2422_v62  ;;  %v868_v40 = vadd.f32 1.4214138, %v836_v56  ;;  %v869_v50 = vadd.f32 1.4214138, %v837_v20  ;;  %v1671_v44 = vpop.eup %1670  ;;  %v1024_v6 = vmul.f32 %v2274_v3, %v992_v38  ;;  %v838_v60 = vmul.f32 %v2388_v16, %v806_v36 }
 0x160   : > { %3061 = vst [vmem:[#allocation38_spill] sm:$0xff] %v2426_v27  ;;  %v2432_v25 = vmul.f32 1.442695, %v1094_v47  ;;  %v680_v33 = vmul.f32 0.3275911, %v2418_v39  ;;  %v2435_v48 = vmul.f32 %v1671_v44, %v1023_v58  ;;  %v961_v54 = vmul.f32 %v2309_v12, %v929_v34  ;;  %v3065_v34 = vld [vmem:[#allocation7_spill] sm:$0xff] }
 0x161   : > { %v1673_v0 = vpop.eup %1672  ;;  %v2439_v4 = vand.u32 2147483647, %v2422_v62  ;;  %v2443_v22 = vadd.f32 %v2369_v55, %v3063_v13  ;;  %v930_v56 = vadd.f32 -0.28449672, %v898_v21  ;;  %v899_v20 = vmul.f32 %v2349_v32, %v867_v18  ;;  %v3066_v55 = vld [vmem:[#allocation8_spill] sm:$0xff] }
 0x162   : > { %3062 = vst [vmem:[#allocation39_spill] sm:$0xff] %v2435_v48  ;;  %v2445_v3 = vpop.eup %1674  ;;  %v807_v49 = vadd.f32 -1.4531521, %v775_v52  ;;  %v2450_v38 = vadd.f32 %v2345_v17, %v3063_v13  ;;  %v900_v47 = vmul.f32 %v2356_v7, %v868_v40  ;;  %v901_v58 = vmul.f32 %v2366_v23, %v869_v50 }
 0x163   : > { %v2452_v36 = vpop.eup %1676  ;;  %v2457_v44 = vadd.f32 %v547_v10, %v3065_v34  ;;  %v2460_v2 = vadd.f32 %v551_v31, %v3066_v55  ;;  %v2462_v21 = vmul.f32 %v1673_v0, %v1024_v6  ;;  %v870_v18 = vadd.f32 1.4214138, %v838_v60 }
 0x164   : > { %3064 = vst [vmem:[#allocation9_spill] sm:$0xff] %v2450_v38  ;;  %v712_v52 = vadd.f32 1.0, %v680_v33  ;;  %v2465_v59 = vadd.f32 %v549_v24, %v3066_v55  ;;  %v1063_v17 = vsub.f32 0.0, %v2295_v19  ;;  %v681_v13 = vmul.f32 0.3275911, %v2439_v4  ;;  %v555_v33 = vpop.f32.mrf.mxu0 }
 0x165   : > { %3067 = vst [vmem:[#allocation7_spill] sm:$0xff] %v2462_v21  ;;  %v2470_v40 = vmul.f32 0.70710677, %v2443_v22  ;;  %v2474_v10 = vadd.f32 %v2386_v26, %v3065_v34  ;;  %v931_v50 = vadd.f32 -0.28449672, %v899_v20  ;;  %v839_v6 = vmul.f32 %v2410_v61, %v807_v49 }
 0x166   : > { %3068 = vst [vmem:[#allocation8_spill] sm:$0xff] %v2465_v59  ;;  %v2478_v60 = vmul.f32 0.70710677, %v2450_v38  ;;  %v2481_v24 = vmul.f32 0.70710677, %v2460_v2  ;;  %v962_v0 = vmul.f32 %v2335_v43, %v930_v56  ;;  %v902_v26 = vmul.f32 %v2388_v16, %v870_v18 }
 0x167   : > { %3069 = vst [vmem:[#allocation40_spill] sm:$0xff] %v2470_v40  ;;  %3070 = vst [vmem:[#allocation41_spill] sm:$0xff] %v2474_v10  ;;  %v2483_v31 = vpop.eup %1678  ;;  %v932_v55 = vadd.f32 -0.28449672, %v900_v47  ;;  %v933_v63 = vadd.f32 -0.28449672, %v901_v58  ;;  %1684 = vrcp.f32 %v712_v52  ;;  %v963_v18 = vmul.f32 %v2349_v32, %v931_v50 }
 0x168   : > { %3071 = vst [vmem:[#allocation42_spill] sm:$0xff] %v2478_v60  ;;  %v2487_v30 = vmul.f32 0.70710677, %v2457_v44  ;;  %v2491_v20 = vmul.f32 0.70710677, %v2465_v59  ;;  %v713_v34 = vadd.f32 1.0, %v681_v13  ;;  %v1095_v45 = vmul.f32 %v1063_v17, %v2295_v19 }
 0x169   : > { %v2494_v49 = vand.u32 2147483647, %v2481_v24  ;;  %v2497_v35 = vand.u32 2147483647, %v2470_v40  ;;  %v2500_v56 = vmul.f32 0.70710677, %v2474_v10  ;;  %v965_v38 = vmul.f32 %v2366_v23, %v933_v63 }
 0x16a   : > { %3072 = vst [vmem:[#allocation43_spill] sm:$0xff] %v2487_v30  ;;  %3073 = vst [vmem:[#allocation44_spill] sm:$0xff] %v2491_v20  ;;  %v3075_v47 = vld [vmem:[#allocation4_spill] sm:$0xff]  ;;  %v1681_v8 = vpop.eup %1680  ;;  %v871_v52 = vadd.f32 1.4214138, %v839_v6  ;;  %1686 = vrcp.f32 %v713_v34  ;;  %vm1253_vm10 = vcmp.lt.f32.partialorder %v2228_v37, 0.0 }
 0x16b   : > { %3074 = vst [vmem:[#allocation45_spill] sm:$0xff] %v2500_v56  ;;  %v2503_v58 = vadd.f32 %v555_v33, %v3075_v47  ;;  %v2508_v27 = vand.u32 2147483647, %v2478_v60  ;;  %v993_v15 = vadd.f32 0.2548296, %v961_v54  ;;  %v1683_v10 = vpop.eup %1682  ;;  %v964_v33 = vmul.f32 %v2356_v7, %v932_v55 }
 0x16c   : > { %v994_v13 = vadd.f32 0.2548296, %v962_v0  ;;  %v2512_v59 = vand.u32 2147483647, %v2487_v30  ;;  %v934_v14 = vadd.f32 -0.28449672, %v902_v26  ;;  %v903_v6 = vmul.f32 %v2410_v61, %v871_v52 }
 0x16d   : > { %3076 = vst [vmem:[#allocation4_spill] sm:$0xff] %v2503_v58  ;;  %v2516_v11 = vand.u32 2147483647, %v2491_v20  ;;  %v687_v50 = vmul.f32 0.3275911, %v2494_v49  ;;  %1688 = vpow2.f32 %v2432_v25  ;;  %v3011_v25 = vsub.f32 1.0, %v2462_v21 }
 0x16e   : > { %v683_v19 = vmul.f32 0.3275911, %v2497_v35  ;;  %v2521_v54 = vand.u32 2147483647, %v2500_v56  ;;  %v2524_v63 = vmul.f32 0.70710677, %v2503_v58  ;;  %v1026_v40 = vmul.f32 %v2335_v43, %v994_v13 }
 0x16f   : > { %v995_v17 = vadd.f32 0.2548296, %v963_v18  ;;  %v1146_v0 = vmul.f32 1.442695, %v1095_v45  ;;  %v682_v55 = vmul.f32 0.3275911, %v2508_v27  ;;  %v1025_v18 = vmul.f32 %v2309_v12, %v993_v15 }
 0x170   : > { %3077 = vst [vmem:[#allocation46_spill] sm:$0xff] %v2524_v63  ;;  %v997_v26 = vadd.f32 0.2548296, %v965_v38  ;;  %v685_v9 = vmul.f32 0.3275911, %v2512_v59  ;;  %v719_v58 = vadd.f32 1.0, %v687_v50  ;;  %v966_v45 = vmul.f32 %v2388_v16, %v934_v14 }
 0x171   : > { %v2531_v34 = vand.u32 2147483647, %v2524_v63  ;;  %v996_v62 = vadd.f32 0.2548296, %v964_v33  ;;  %v686_v56 = vmul.f32 0.3275911, %v2516_v11  ;;  %1690 = vpow2.f32 %v1146_v0  ;;  %v557_v0 = vpop.f32.mrf.mxu0 }
 0x172   : > { %v715_v52 = vadd.f32 1.0, %v683_v19  ;;  %v684_v38 = vmul.f32 0.3275911, %v2521_v54  ;;  %v935_v20 = vadd.f32 -0.28449672, %v903_v6  ;;  %v714_v63 = vadd.f32 1.0, %v682_v55 }
 0x173   : > { %v1029_v30 = vmul.f32 %v2366_v23, %v997_v26  ;;  %v717_v33 = vadd.f32 1.0, %v685_v9  ;;  %v688_v60 = vmul.f32 0.3275911, %v2531_v34  ;;  %v1027_v50 = vmul.f32 %v2349_v32, %v995_v17 }
 0x174   : > { %v1028_v12 = vmul.f32 %v2356_v7, %v996_v62  ;;  %v718_v14 = vadd.f32 1.0, %v686_v56  ;;  %1692 = vrcp.f32 %v719_v58  ;;  %v2544_v15 = vpop.eup %1684  ;;  %v2547_v19 = vmul.f32 %v2445_v3, %v1025_v18 }
 0x175   : > { %v998_v43 = vadd.f32 0.2548296, %v966_v45  ;;  %1694 = vrcp.f32 %v715_v52  ;;  %v716_v13 = vadd.f32 1.0, %v684_v38  ;;  %v2550_v23 = vmul.f32 %v2452_v36, %v1026_v40 }
 0x176   : > { %3078 = vst [vmem:[#allocation47_spill] sm:$0xff] %v2547_v19  ;;  %v967_v9 = vmul.f32 %v2410_v61, %v935_v20  ;;  %v1064_v6 = vsub.f32 0.0, %v2418_v39  ;;  %1696 = vrcp.f32 %v714_v63  ;;  %v1189_v32 = vmul.f32 %v1683_v10, %v1029_v30 }
 0x177   : > { %3079 = vst [vmem:[#allocation48_spill] sm:$0xff] %v2550_v23  ;;  %v1065_v7 = vsub.f32 0.0, %v2439_v4  ;;  %1698 = vrcp.f32 %v717_v33  ;;  %v720_v62 = vadd.f32 1.0, %v688_v60  ;;  %v2556_v56 = vmul.f32 %v2483_v31, %v1027_v50  ;;  %v2567_v10 = vpop.eup %1686 }
 0x178   : > { %v2558_v3 = vmul.f32 %v1681_v8, %v1028_v12  ;;  %v776_v58 = vmul.f32 1.0614054, %v2544_v15  ;;  %1700 = vrcp.f32 %v718_v14  ;;  %v3082_v36 = vsub.f32 1.0, %v2412_v42 }
 0x179   : > { %3080 = vst [vmem:[#allocation49_spill] sm:$0xff] %v2556_v56  ;;  %v1030_v20 = vmul.f32 %v2388_v16, %v998_v43  ;;  %v1066_v30 = vsub.f32 0.0, %v2508_v27  ;;  %1702 = vrcp.f32 %v716_v13  ;;  %v3084_v60 = vsub.f32 1.0, %v2435_v48 }
 0x17a   : > { %3081 = vst [vmem:[#allocation50_spill] sm:$0xff] %v2558_v3  ;;  %v2563_v40 = vsub.f32 0.0, %v3082_v36  ;;  %v3014_v8 = vsub.f32 1.0, %v2547_v19  ;;  %v999_v63 = vadd.f32 0.2548296, %v967_v9  ;;  %v1096_v17 = vmul.f32 %v1064_v6, %v2418_v39  ;;  %v1689_v18 = vpop.eup %1688 }
 0x17b   : > { %v2571_v31 = vsub.f32 0.0, %v3084_v60  ;;  %v3012_v55 = vsub.f32 1.0, %v2550_v23  ;;  %v1221_v16 = vsub.f32 1.0, %v1189_v32  ;;  %v1097_v26 = vmul.f32 %v1065_v7, %v2439_v4 }
 0x17c   : > { %3083 = vst [vmem:[#allocation51_spill] sm:$0xff] %v2563_v40  ;;  %1704 = vrcp.f32 %v720_v62  ;;  %v2580_v45 = vsub.f32 0.0, %v3011_v25  ;;  %v3015_v52 = vsub.f32 1.0, %v2556_v56  ;;  %v3013_v38 = vsub.f32 1.0, %v2558_v3 }
 0x17d   : > { %3085 = vst [vmem:[#allocation52_spill] sm:$0xff] %v2571_v31  ;;  %v808_v33 = vadd.f32 -1.4531521, %v776_v58  ;;  %v2584_v50 = vmul.f32 %v1689_v18, %v1030_v20  ;;  %v777_v39 = vmul.f32 1.0614054, %v2567_v10  ;;  %v1098_v12 = vmul.f32 %v1066_v30, %v2508_v27  ;;  %v559_v20 = vpop.f32.mrf.mxu0 }
 0x17e   : > { %3086 = vst [vmem:[#allocation53_spill] sm:$0xff] %v2580_v45  ;;  %v2589_v14 = vadd.f32 %v557_v0, %v3075_v47  ;;  %v2593_v4 = vsub.f32 0.0, %v3014_v8  ;;  %v1031_v43 = vmul.f32 %v2410_v61, %v999_v63  ;;  %v1148_v13 = vmul.f32 1.442695, %v1096_v17  ;;  %v1691_v62 = vpop.eup %1690 }
 0x17f   : > { %v1067_v9 = vsub.f32 0.0, %v2497_v35  ;;  %v2599_v6 = vsub.f32 0.0, %v3012_v55  ;;  %v1285_v32 = vsub.f32 0.0, %v1221_v16  ;;  %v1150_v7 = vmul.f32 1.442695, %v1097_v26  ;;  %v561_v8 = vpop.f32.mrf.mxu0 }
 0x180   : > { %3087 = vst [vmem:[#allocation54_spill] sm:$0xff] %v2593_v4  ;;  %v1068_v27 = vsub.f32 0.0, %v2521_v54  ;;  %v2604_v47 = vsub.f32 0.0, %v3015_v52  ;;  %v840_v58 = vmul.f32 %v2544_v15, %v808_v33  ;;  %v2608_v61 = vmul.f32 0.5, %v2404_v1 }
 0x181   : > { %3088 = vst [vmem:[#allocation55_spill] sm:$0xff] %v2599_v6  ;;  %v2611_v36 = vmul.f32 0.70710677, %v2589_v14  ;;  %v2613_v30 = vpop.eup %1692  ;;  %v2617_v60 = vsub.f32 0.0, %v3013_v38  ;;  %v3017_v63 = vsub.f32 1.0, %v2584_v50  ;;  %v2622_v18 = vmul.f32 %v1691_v62, %v1031_v43  ;;  %v3094_v62 = vld [vmem:[#allocation5_spill] sm:$0xff] }
 0x182   : > { %3089 = vst [vmem:[#allocation56_spill] sm:$0xff] %v2604_v47  ;;  %3090 = vst [vmem:[#allocation57_spill] sm:$0xff] %v2608_v61  ;;  %v809_v17 = vadd.f32 -1.4531521, %v777_v39  ;;  %v1152_v0 = vmul.f32 1.442695, %v1098_v12  ;;  %v2620_v26 = vpop.eup %1694  ;;  %1706 = vpow2.f32 %v1148_v13  ;;  %v1099_v1 = vmul.f32 %v1067_v9, %v2497_v35 }
 0x183   : > { %3091 = vst [vmem:[#allocation58_spill] sm:$0xff] %v2617_v60  ;;  %v2626_v33 = vand.u32 2147483647, %v2611_v36  ;;  %v2628_v25 = vpop.eup %1696  ;;  %v2632_v55 = vsel %vm1253_vm10, %v1285_v32, %v1221_v16  ;;  %1708 = vpow2.f32 %v1150_v7  ;;  %v2635_v39 = vmul.f32 0.5, %v2443_v22 }
 0x184   : > { %3092 = vst [vmem:[#allocation59_spill] sm:$0xff] %v2632_v55  ;;  %v1100_v12 = vmul.f32 %v1068_v27, %v2521_v54  ;;  %v2638_v43 = vpop.eup %1698  ;;  %v872_v13 = vadd.f32 1.4214138, %v840_v58  ;;  %v783_v35 = vmul.f32 1.0614054, %v2613_v30  ;;  %v2643_v38 = vadd.f32 %v559_v20, %v3094_v62 }
 0x185   : > { %3093 = vst [vmem:[#allocation60_spill] sm:$0xff] %v2635_v39  ;;  %v689_v9 = vmul.f32 0.3275911, %v2626_v33  ;;  %v2645_v37 = vpop.eup %1700  ;;  %v2649_v16 = vsub.f32 0.0, %v3017_v63  ;;  %v841_v22 = vmul.f32 %v2567_v10, %v809_v17  ;;  %1710 = vpow2.f32 %v1152_v0 }
 0x186   : > { %v779_v54 = vmul.f32 1.0614054, %v2620_v26  ;;  %v2653_v32 = vpop.eup %1702  ;;  %v778_v27 = vmul.f32 1.0614054, %v2628_v25  ;;  %v1154_v58 = vmul.f32 1.442695, %v1099_v1  ;;  %v2660_v63 = vadd.f32 %v561_v8, %v3094_v62 }
 0x187   : > { %3095 = vst [vmem:[#allocation5_spill] sm:$0xff] %v2649_v16  ;;  %v1069_v20 = vsub.f32 0.0, %v2512_v59  ;;  %v1156_v52 = vmul.f32 1.442695, %v1100_v12  ;;  %v781_v40 = vmul.f32 1.0614054, %v2638_v43  ;;  %v904_v0 = vmul.f32 %v2544_v15, %v872_v13 }
 0x188   : > { %v721_v42 = vadd.f32 1.0, %v689_v9  ;;  %v782_v45 = vmul.f32 1.0614054, %v2645_v37  ;;  %v815_v21 = vadd.f32 -1.4531521, %v783_v35  ;;  %v1071_v8 = vsub.f32 0.0, %v2494_v49 }
 0x189   : > { %v2662_v17 = vpop.eup %1704  ;;  %v2667_v7 = vmul.f32 0.70710677, %v2643_v38  ;;  %v873_v1 = vadd.f32 1.4214138, %v841_v22  ;;  %v811_v31 = vadd.f32 -1.4531521, %v779_v54  ;;  %v1101_v9 = vmul.f32 %v1069_v20, %v2512_v59 }
 0x18a   : > { %v780_v12 = vmul.f32 1.0614054, %v2653_v32  ;;  %1712 = vrcp.f32 %v721_v42  ;;  %v810_v48 = vadd.f32 -1.4531521, %v778_v27  ;;  %v813_v13 = vadd.f32 -1.4531521, %v781_v40 }
 0x18b   : > { %v2673_v62 = vand.u32 2147483647, %v2667_v7  ;;  %1714 = vpow2.f32 %v1154_v58  ;;  %v2676_v35 = vmul.f32 0.70710677, %v2660_v63  ;;  %v784_v6 = vmul.f32 1.0614054, %v2662_v17 }
 0x18c   : > { %v936_v22 = vadd.f32 -0.28449672, %v904_v0  ;;  %v814_v54 = vadd.f32 -1.4531521, %v782_v45  ;;  %v847_v23 = vmul.f32 %v2613_v30, %v815_v21  ;;  %v843_v59 = vmul.f32 %v2620_v26, %v811_v31 }
 0x18d   : > { %v690_v42 = vmul.f32 0.3275911, %v2673_v62  ;;  %v812_v27 = vadd.f32 -1.4531521, %v780_v12  ;;  %v1070_v20 = vsub.f32 0.0, %v2516_v11  ;;  %v842_v40 = vmul.f32 %v2628_v25, %v810_v48 }
 0x18e   : > { %v2684_v61 = vand.u32 2147483647, %v2676_v35  ;;  %v1158_v58 = vmul.f32 1.442695, %v1101_v9  ;;  %v816_v60 = vadd.f32 -1.4531521, %v784_v6  ;;  %v845_v45 = vmul.f32 %v2638_v43, %v813_v13 }
 0x18f   : > { %v722_v55 = vadd.f32 1.0, %v690_v42  ;;  %v2687_v3 = vpop.eup %1706  ;;  %v1103_v21 = vmul.f32 %v1071_v8, %v2494_v49  ;;  %v1073_v0 = vsub.f32 0.0, %v2626_v33  ;;  %v846_v4 = vmul.f32 %v2645_v37, %v814_v54 }
 0x190   : > { %v691_v31 = vmul.f32 0.3275911, %v2684_v61  ;;  %v2693_v12 = vpop.eup %1708  ;;  %v879_v19 = vadd.f32 1.4214138, %v847_v23  ;;  %v1072_v48 = vsub.f32 0.0, %v2531_v34  ;;  %v844_v6 = vmul.f32 %v2653_v32, %v812_v27 }
 0x191   : > { %1716 = vrcp.f32 %v722_v55  ;;  %v875_v9 = vadd.f32 1.4214138, %v843_v59  ;;  %v848_v13 = vmul.f32 %v2662_v17, %v816_v60  ;;  %v968_v49 = vmul.f32 %v2544_v15, %v936_v22 }
 0x192   : > { %v723_v42 = vadd.f32 1.0, %v691_v31  ;;  %v2699_v47 = vpop.eup %1710  ;;  %v905_v8 = vmul.f32 %v2567_v10, %v873_v1  ;;  %1718 = vpow2.f32 %v1156_v52  ;;  %v1102_v56 = vmul.f32 %v1070_v20, %v2516_v11 }
 0x193   : > { %v877_v54 = vadd.f32 1.4214138, %v845_v45  ;;  %v1105_v23 = vmul.f32 %v1073_v0, %v2626_v33  ;;  %v880_v55 = vadd.f32 1.4214138, %v848_v13  ;;  %v878_v59 = vadd.f32 1.4214138, %v846_v4 }
 0x194   : > { %1720 = vrcp.f32 %v723_v42  ;;  %v911_v27 = vmul.f32 %v2613_v30, %v879_v19  ;;  %v1104_v60 = vmul.f32 %v1072_v48, %v2531_v34  ;;  %v874_v31 = vadd.f32 1.4214138, %v842_v40 }
 0x195   : > { %1722 = vpow2.f32 %v1158_v58  ;;  %v907_v39 = vmul.f32 %v2620_v26, %v875_v9  ;;  %v876_v22 = vadd.f32 1.4214138, %v844_v6  ;;  %v1162_v16 = vmul.f32 1.442695, %v1103_v21 }
 0x196   : > { %v1074_v11 = vsub.f32 0.0, %v2673_v62  ;;  %v912_v52 = vmul.f32 %v2662_v17, %v880_v55  ;;  %v909_v19 = vmul.f32 %v2638_v43, %v877_v54  ;;  %v1166_v34 = vmul.f32 1.442695, %v1105_v23 }
 0x197   : > { %v2708_v1 = vpop.eup %1712  ;;  %v910_v45 = vmul.f32 %v2645_v37, %v878_v59  ;;  %v943_v21 = vadd.f32 -0.28449672, %v911_v27  ;;  %v1164_v0 = vmul.f32 1.442695, %v1104_v60  ;;  %v906_v9 = vmul.f32 %v2628_v25, %v874_v31 }
 0x198   : > { %v785_v20 = vmul.f32 1.0614054, %v2708_v1  ;;  %v2720_v58 = vpop.eup %1714  ;;  %v1160_v6 = vmul.f32 1.442695, %v1102_v56  ;;  %v1075_v42 = vsub.f32 0.0, %v2684_v61  ;;  %v908_v54 = vmul.f32 %v2653_v32, %v876_v22 }
 0x199   : > { %1724 = vpow2.f32 %v1162_v16  ;;  %v1106_v23 = vmul.f32 %v1074_v11, %v2673_v62  ;;  %v944_v55 = vadd.f32 -0.28449672, %v912_v52  ;;  %v937_v40 = vadd.f32 -0.28449672, %v905_v8 }
 0x19a   : > { %v817_v13 = vadd.f32 -1.4531521, %v785_v20  ;;  %v941_v4 = vadd.f32 -0.28449672, %v909_v19  ;;  %1726 = vpow2.f32 %v1166_v34  ;;  %v939_v27 = vadd.f32 -0.28449672, %v907_v39 }
 0x19b   : > { %v942_v60 = vadd.f32 -0.28449672, %v910_v45  ;;  %v975_v48 = vmul.f32 %v2613_v30, %v943_v21  ;;  %1728 = vpow2.f32 %v1164_v0  ;;  %v938_v31 = vadd.f32 -0.28449672, %v906_v9 }
 0x19c   : > { %v849_v59 = vmul.f32 %v2708_v1, %v817_v13  ;;  %1730 = vpow2.f32 %v1160_v6  ;;  %v1107_v22 = vmul.f32 %v1075_v42, %v2684_v61  ;;  %v940_v20 = vadd.f32 -0.28449672, %v908_v54 }
 0x19d   : > { %v1168_v62 = vmul.f32 1.442695, %v1106_v23  ;;  %v976_v11 = vmul.f32 %v2662_v17, %v944_v55  ;;  %v1000_v39 = vadd.f32 0.2548296, %v968_v49  ;;  %v969_v19 = vmul.f32 %v2567_v10, %v937_v40 }
 0x19e   : > { %v2731_v56 = vpop.eup %1716  ;;  %v881_v16 = vadd.f32 1.4214138, %v849_v59  ;;  %v973_v34 = vmul.f32 %v2638_v43, %v941_v4  ;;  %v971_v61 = vmul.f32 %v2620_v26, %v939_v27  ;;  %v974_v0 = vmul.f32 %v2645_v37, %v942_v60 }
 0x19f   : > { %v786_v8 = vmul.f32 1.0614054, %v2731_v56  ;;  %v2736_v52 = vpop.eup %1718  ;;  %v1007_v9 = vadd.f32 0.2548296, %v975_v48  ;;  %v970_v13 = vmul.f32 %v2628_v25, %v938_v31  ;;  %v1170_v54 = vmul.f32 1.442695, %v1107_v22 }
 0x1a0   : > { %v913_v45 = vmul.f32 %v2708_v1, %v881_v16  ;;  %v972_v40 = vmul.f32 %v2653_v32, %v940_v20  ;;  %1732 = vpow2.f32 %v1168_v62  ;;  %v1008_v55 = vadd.f32 0.2548296, %v976_v11 }
 0x1a1   : > { %v2741_v21 = vpop.eup %1720  ;;  %v818_v6 = vadd.f32 -1.4531521, %v786_v8  ;;  %v1001_v59 = vadd.f32 0.2548296, %v969_v19  ;;  %v1005_v16 = vadd.f32 0.2548296, %v973_v34  ;;  %v1032_v48 = vmul.f32 %v2544_v15, %v1000_v39 }
 0x1a2   : > { %v1723_v42 = vpop.eup %1722  ;;  %v787_v49 = vmul.f32 1.0614054, %v2741_v21  ;;  %v945_v23 = vadd.f32 -0.28449672, %v913_v45  ;;  %v1003_v8 = vadd.f32 0.2548296, %v971_v61  ;;  %v1039_v22 = vmul.f32 %v2613_v30, %v1007_v9 }
 0x1a3   : > { %v850_v4 = vmul.f32 %v2731_v56, %v818_v6  ;;  %v1006_v33 = vadd.f32 0.2548296, %v974_v0  ;;  %1734 = vpow2.f32 %v1170_v54  ;;  %v1002_v62 = vadd.f32 0.2548296, %v970_v13 }
 0x1a4   : > { %v819_v27 = vadd.f32 -1.4531521, %v787_v49  ;;  %v977_v60 = vmul.f32 %v2708_v1, %v945_v23  ;;  %v1004_v57 = vadd.f32 0.2548296, %v972_v40  ;;  %v1040_v19 = vmul.f32 %v2662_v17, %v1008_v55 }
 0x1a5   : > { %v882_v31 = vadd.f32 1.4214138, %v850_v4  ;;  %v1033_v6 = vmul.f32 %v2567_v10, %v1001_v59  ;;  %v1037_v15 = vmul.f32 %v2638_v43, %v1005_v16  ;;  %v1035_v30 = vmul.f32 %v2620_v26, %v1003_v8 }
 0x1a6   : > { %v851_v45 = vmul.f32 %v2741_v21, %v819_v27  ;;  %v1009_v20 = vadd.f32 0.2548296, %v977_v60  ;;  %v1725_v34 = vpop.eup %1724  ;;  %v2760_v9 = vmul.f32 0.5, %v2457_v44  ;;  %v1038_v13 = vmul.f32 %v2645_v37, %v1006_v33 }
 0x1a7   : > { %v914_v11 = vmul.f32 %v2731_v56, %v882_v31  ;;  %v1727_v0 = vpop.eup %1726  ;;  %v3096_v17 = vsub.f32 1.0, %v2622_v18  ;;  %v1199_v10 = vmul.f32 %v1725_v34, %v1039_v22  ;;  %v1036_v26 = vmul.f32 %v2653_v32, %v1004_v57  ;;  %v3100_v34 = vld [vmem:[#allocation4_spill] sm:$0xff] }
 0x1a8   : > { %v883_v39 = vadd.f32 1.4214138, %v851_v45  ;;  %v1041_v61 = vmul.f32 %v2708_v1, %v1009_v20  ;;  %v1729_v49 = vpop.eup %1728  ;;  %v1034_v1 = vmul.f32 %v2628_v25, %v1002_v62  ;;  %v2772_v37 = vmul.f32 %v2687_v3, %v1032_v48  ;;  %v3098_v62 = vld [vmem:[#allocation44_spill] sm:$0xff] }
 0x1a9   : > { %v946_v54 = vadd.f32 -0.28449672, %v914_v11  ;;  %v2765_v23 = vsub.f32 0.0, %v3096_v17  ;;  %v1731_v4 = vpop.eup %1730  ;;  %v1200_v55 = vmul.f32 %v1729_v49, %v1040_v19  ;;  %v2775_v33 = vmul.f32 %v2693_v12, %v1033_v6  ;;  %v3099_v19 = vld [vmem:[#allocation40_spill] sm:$0xff]  ;;  %v3104_v17 = vld [vmem:[#allocation42_spill] sm:$0xff] }
 0x1aa   : > { %v915_v43 = vmul.f32 %v2741_v21, %v883_v39  ;;  %v1201_v40 = vmul.f32 %v1727_v0, %v1041_v61  ;;  %v1197_v59 = vmul.f32 %v1723_v42, %v1037_v15  ;;  %v2778_v27 = vmul.f32 %v2720_v58, %v1035_v30  ;;  %v3097_v42 = vld [vmem:[#allocation43_spill] sm:$0xff]  ;;  %v3102_v61 = vld [vmem:[#allocation46_spill] sm:$0xff] }
 0x1ab   : > { %v978_v44 = vmul.f32 %v2731_v56, %v946_v54  ;;  %v1198_v60 = vmul.f32 %v1731_v4, %v1038_v13  ;;  %v2781_v8 = vmul.f32 0.5, %v2460_v2  ;;  %v1231_v57 = vsub.f32 1.0, %v1199_v10  ;;  %v3103_v54 = vld [vmem:[#allocation37_spill] sm:$0xff] }
 0x1ac   : > { %v947_v16 = vadd.f32 -0.28449672, %v915_v43  ;;  %vm1263_vm11 = vcmp.lt.f32.partialorder %v2481_v24, 0.0  ;;  %v1233_v3 = vsub.f32 1.0, %v1201_v40  ;;  %v2786_v48 = vmul.f32 %v2699_v47, %v1034_v1 }
 0x1ad   : > { %v1010_v25 = vadd.f32 0.2548296, %v978_v44  ;;  %v2789_v12 = vmul.f32 %v2736_v52, %v1036_v26  ;;  %vm1261_vm12 = vcmp.lt.f32.partialorder %v3097_v42, 0.0  ;;  %v1232_v31 = vsub.f32 1.0, %v1200_v55  ;;  %v1733_v2 = vpop.eup %1732  ;;  %v3105_v55 = vld [vmem:[#allocation29_spill] sm:$0xff] }
 0x1ae   : > { %v979_v32 = vmul.f32 %v2741_v21, %v947_v16  ;;  %v1224_v22 = vsub.f32 1.0, %v2772_v37  ;;  %v1225_v45 = vsub.f32 1.0, %v2775_v33  ;;  %v1229_v20 = vsub.f32 1.0, %v1197_v59  ;;  %v3106_v16 = vld [vmem:[#allocation34_spill] sm:$0xff] }
 0x1af   : > { %v1042_v58 = vmul.f32 %v2731_v56, %v1010_v25  ;;  %vm1262_vm13 = vcmp.lt.f32.partialorder %v3098_v62, 0.0  ;;  %v1227_v47 = vsub.f32 1.0, %v2778_v27  ;;  %vm1259_vm14 = vcmp.lt.f32.partialorder %v3099_v19, 0.0  ;;  %v3101_v56 = vld [vmem:[#allocation45_spill] sm:$0xff] }
 0x1b0   : > { %v1011_v11 = vadd.f32 0.2548296, %v979_v32  ;;  %v1230_v52 = vsub.f32 1.0, %v1198_v60  ;;  %v2799_v6 = vmul.f32 0.5, %v3100_v34  ;;  %vm1260_vm15 = vcmp.lt.f32.partialorder %v3101_v56, 0.0  ;;  %v1735_v13 = vpop.eup %1734 }
 0x1b1   : > { %v1202_v15 = vmul.f32 %v1733_v2, %v1042_v58  ;;  %v1295_v39 = vsub.f32 0.0, %v1231_v57  ;;  %vm1264_vm0 = vcmp.lt.f32.partialorder %v3102_v61, 0.0  ;;  %v1297_v30 = vsub.f32 0.0, %v1233_v3  ;;  %v3107_v2 = vld [vmem:[#allocation28_spill] sm:$0xff] }
 0x1b2   : > { %v1043_v0 = vmul.f32 %v2741_v21, %v1011_v11  ;;  %vm1257_vm1 = vcmp.lt.f32.partialorder %v3103_v54, 0.0  ;;  %v1226_v49 = vsub.f32 1.0, %v2786_v48  ;;  %vm1258_vm2 = vcmp.lt.f32.partialorder %v3104_v17, 0.0  ;;  %v3115_v17 = vld [vmem:[#allocation8_spill] sm:$0xff] }
 0x1b3   : > { %v1228_v10 = vsub.f32 1.0, %v2789_v12  ;;  %v1234_v43 = vsub.f32 1.0, %v1202_v15  ;;  %v1296_v40 = vsub.f32 0.0, %v1232_v31  ;;  %v1288_v4 = vsub.f32 0.0, %v1224_v22 }
 0x1b4   : > { %v1289_v1 = vsub.f32 0.0, %v1225_v45  ;;  %v1293_v26 = vsub.f32 0.0, %v1229_v20  ;;  %v1203_v44 = vmul.f32 %v1735_v13, %v1043_v0  ;;  %vm1255_vm3 = vcmp.lt.f32.partialorder %v3105_v55, 0.0 }
 0x1b5   : > { %v1291_v21 = vsub.f32 0.0, %v1227_v47  ;;  %v1294_v33 = vsub.f32 0.0, %v1230_v52  ;;  %vm1265_vm4 = vcmp.lt.f32.partialorder %v2611_v36, 0.0  ;;  %v1298_v59 = vsub.f32 0.0, %v1234_v43 }
 0x1b6   : > { %vm1256_vm5 = vcmp.lt.f32.partialorder %v3106_v16, 0.0  ;;  %v1327_v27 = vsel %vm1263_vm11, %v1295_v39, %v1231_v57  ;;  %vm1266_vm6 = vcmp.lt.f32.partialorder %v2667_v7, 0.0  ;;  %v1235_v60 = vsub.f32 1.0, %v1203_v44  ;;  %v3108_v57 = vld [vmem:[#allocation24_spill] sm:$0xff]  ;;  %v3110_v39 = vld [vmem:[#allocation25_spill] sm:$0xff]  ;;  %v3113_v44 = vld [vmem:[#allocation18_spill] sm:$0xff] }
 0x1b7   : > { %v1329_v25 = vsel %vm1265_vm4, %v1297_v30, %v1233_v3  ;;  %v1290_v32 = vsub.f32 0.0, %v1226_v49  ;;  %v1292_v48 = vsub.f32 0.0, %v1228_v10  ;;  %v1328_v12 = vsel %vm1264_vm0, %v1296_v40, %v1232_v31  ;;  %v3109_v31 = vld [vmem:[#allocation19_spill] sm:$0xff]  ;;  %v3120_v16 = vld [vmem:[#allocation60_spill] sm:$0xff] }
 0x1b8   : > { %v1330_v58 = vsel %vm1266_vm6, %v1298_v59, %v1234_v43  ;;  %vm1254_vm7 = vcmp.lt.f32.partialorder %v3107_v2, 0.0  ;;  %v1325_v36 = vsel %vm1261_vm12, %v1293_v26, %v1229_v20  ;;  %v593_v11 = vmul.f32 0.5, %v2589_v14  ;;  %v3127_v2 = vld [vmem:[#allocation54_spill] sm:$0xff] }
 0x1b9   : > { %v1299_v34 = vsub.f32 0.0, %v1235_v60  ;;  %v1362_v24 = vadd.f32 1.0, %v1330_v58  ;;  %vm1251_vm8 = vcmp.lt.f32.partialorder %v3108_v57, 0.0  ;;  %v1326_v7 = vsel %vm1262_vm13, %v1294_v33, %v1230_v52  ;;  %v3123_v58 = vld [vmem:[#allocation56_spill] sm:$0xff] }
 0x1ba   : > { %v1359_v3 = vadd.f32 1.0, %v1327_v27  ;;  %vm1267_vm9 = vcmp.lt.f32.partialorder %v2676_v35, 0.0  ;;  %v1361_v15 = vadd.f32 1.0, %v1329_v25  ;;  %vm1249_vm10 = vcmp.lt.f32.partialorder %v3109_v31, 0.0  ;;  %v3111_v35 = vld [vmem:[#allocation22_spill] sm:$0xff]  ;;  %v3136_v31 = vld [vmem:[#allocation55_spill] sm:$0xff] }
 0x1bb   : > { %vm1252_vm11 = vcmp.lt.f32.partialorder %v3110_v39, 0.0  ;;  %v1323_v42 = vsel %vm1259_vm14, %v1291_v21, %v1227_v47  ;;  %v594_v14 = vmul.f32 0.5, %v2643_v38  ;;  %v1331_v20 = vsel %vm1267_vm9, %v1299_v34, %v1235_v60  ;;  %v3112_v38 = vld [vmem:[#allocation17_spill] sm:$0xff]  ;;  %v3116_v27 = vld [vmem:[#allocation14_spill] sm:$0xff] }
 0x1bc   : > { %v1360_v61 = vadd.f32 1.0, %v1328_v12  ;;  %v1324_v0 = vsel %vm1260_vm15, %v1292_v48, %v1228_v10  ;;  %v1357_v62 = vadd.f32 1.0, %v1325_v36  ;;  %v595_v52 = vmul.f32 0.5, %v2660_v63  ;;  %v3117_v60 = vld [vmem:[#allocation41_spill] sm:$0xff] }
 0x1bd   : > { %v1363_v30 = vadd.f32 1.0, %v1331_v20  ;;  %vm1250_vm12 = vcmp.lt.f32.partialorder %v3111_v35, 0.0  ;;  %v1321_v13 = vsel %vm1257_vm1, %v1289_v1, %v1225_v45  ;;  %v1322_v19 = vsel %vm1258_vm2, %v1290_v32, %v1226_v49  ;;  %v3119_v48 = vld [vmem:[#allocation5_spill] sm:$0xff]  ;;  %v3130_v20 = vld [vmem:[#allocation58_spill] sm:$0xff] }
 0x1be   : > { %v1358_v47 = vadd.f32 1.0, %v1326_v7  ;;  %v1394_v43 = vmul.f32 %v1362_v24, %v594_v14  ;;  %vm1247_vm13 = vcmp.lt.f32.partialorder %v3112_v38, 0.0  ;;  %v1355_v40 = vadd.f32 1.0, %v1323_v42  ;;  %v3124_v34 = vld [vmem:[#allocation9_spill] sm:$0xff]  ;;  %v3128_v42 = vld [vmem:[#allocation50_spill] sm:$0xff]  ;;  %v3147_v38 = vld [vmem:[#allocation23_spill] sm:$0xff] }
 0x1bf   : > { %v1391_v56 = vmul.f32 %v1359_v3, %v2781_v8  ;;  %v1393_v10 = vmul.f32 %v1361_v15, %v593_v11  ;;  %v1395_v26 = vmul.f32 %v1363_v30, %v595_v52  ;;  %vm1248_vm14 = vcmp.lt.f32.partialorder %v3113_v44, 0.0 }
 0x1c0   : > { %v3114_v63 = vsub.f32 1.0, %v2622_v18  ;;  %v1356_v54 = vadd.f32 1.0, %v1324_v0  ;;  %v590_v49 = vmul.f32 0.5, %v3115_v17  ;;  %v1392_v1 = vmul.f32 %v1360_v61, %v2799_v6  ;;  %v3131_v0 = vld [vmem:[#allocation59_spill] sm:$0xff] }
 0x1c1   : > { %v1320_v8 = vsel %vm1256_vm5, %v1288_v4, %v1224_v22  ;;  %v1353_v21 = vadd.f32 1.0, %v1321_v13  ;;  %v1389_v33 = vmul.f32 %v1357_v62, %v2760_v9  ;;  %v1411_v59 = vpack.c.bf16 %v1395_v26, %v1393_v10  ;;  %v3121_v9 = vld [vmem:[#allocation49_spill] sm:$0xff]  ;;  %v3133_v13 = vld [vmem:[#allocation6_spill] sm:$0xff] }
 0x1c2   : > { %v1319_v45 = vsel %vm1255_vm3, %v2765_v23, %v3114_v63  ;;  %vm1246_vm15 = vcmp.lt.f32.partialorder %v3116_v27, 0.0  ;;  %v1354_v18 = vadd.f32 1.0, %v1322_v19  ;;  %v588_v55 = vmul.f32 0.5, %v3117_v60  ;;  %v3132_v62 = vld [vmem:[#allocation57_spill] sm:$0xff]  ;;  %v3137_v63 = vld [vmem:[#allocation38_spill] sm:$0xff]  ;;  %v3158_v27 = vld [vmem:[#allocation32_spill] sm:$0xff] }
 0x1c3   : > { %v1390_v23 = vmul.f32 %v1358_v47, %v590_v49  ;;  %v1410_v25 = vpack.c.bf16 %v1394_v43, %v1392_v1  ;;  %v3118_v32 = vsub.f32 1.0, %v2584_v50  ;;  %v1351_v6 = vadd.f32 1.0, %v1319_v45  ;;  %1423 = vmatprep.subr.bf16.mxu1 %v1411_v59  ;;  %v3125_v50 = vld [vmem:[#allocation47_spill] sm:$0xff]  ;;  %v3140_v49 = vld [vmem:[#allocation52_spill] sm:$0xff] }
 0x1c4   : > { %v1387_v22 = vmul.f32 %v1355_v40, %v3120_v16  ;;  %v1409_v4 = vpack.c.bf16 %v1391_v56, %v1389_v33  ;;  %v3122_v12 = vsub.f32 1.0, %v3121_v9  ;;  %v1352_v11 = vadd.f32 1.0, %v1320_v8  ;;  %v3134_v40 = vld [vmem:[#allocation48_spill] sm:$0xff] }
 0x1c5   : > { %v1318_v37 = vsel %vm1254_vm7, %v3119_v48, %v3118_v32  ;;  %v586_v24 = vmul.f32 0.5, %v3124_v34  ;;  %v1388_v7 = vmul.f32 %v1356_v54, %v588_v55  ;;  %1424 = vmatpush1.bf16.msra.mxu1 %v1410_v25  ;;  %v3126_v3 = vsub.f32 1.0, %v3125_v50  ;;  %v3138_v54 = vld [vmem:[#allocation39_spill] sm:$0xff]  ;;  %v3144_v55 = vld [vmem:[#allocation53_spill] sm:$0xff]  ;;  %v3148_v9 = vld [vmem:[#allocation36_spill] sm:$0xff] }
 0x1c6   : > { %v1315_v36 = vsel %vm1251_vm8, %v3123_v58, %v3122_v12  ;;  %v3129_v14 = vsub.f32 1.0, %v3128_v42  ;;  %v1349_v57 = vadd.f32 1.0, %v3131_v0  ;;  %v1385_v52 = vmul.f32 %v1353_v21, %v3132_v62  ;;  %1425 = vmatprep.subr.bf16.mxu1 %v1409_v4  ;;  %v3141_v21 = vld [vmem:[#allocation26_spill] sm:$0xff]  ;;  %v3145_v25 = vld [vmem:[#allocation21_spill] sm:$0xff]  ;;  %v3146_v48 = vld [vmem:[#allocation35_spill] sm:$0xff] }
 0x1c7   : > { %v1313_v15 = vsel %vm1249_vm10, %v3127_v2, %v3126_v3  ;;  %v1350_v30 = vadd.f32 1.0, %v1318_v37  ;;  %v584_v19 = vmul.f32 0.5, %v3133_v13  ;;  %v1386_v47 = vmul.f32 %v1354_v18, %v586_v24  ;;  %v3142_v18 = vld [vmem:[#allocation7_spill] sm:$0xff]  ;;  %v3151_v24 = vld [vmem:[#allocation12_spill] sm:$0xff] }
 0x1c8   : > { %v1316_v61 = vsel %vm1252_vm11, %v3130_v20, %v3129_v14  ;;  %v1408_v43 = vpack.c.bf16 %v1390_v23, %v1388_v7  ;;  %v3135_v56 = vsub.f32 1.0, %v3134_v40  ;;  %v1347_v26 = vadd.f32 1.0, %v1315_v36  ;;  %v3150_v58 = vld [vmem:[#allocation51_spill] sm:$0xff]  ;;  %v3152_v50 = vld [vmem:[#allocation20_spill] sm:$0xff] }
 0x1c9   : > { %v1383_v39 = vmul.f32 %v1351_v6, %v3137_v63  ;;  %v1407_v45 = vpack.c.bf16 %v1387_v22, %v1385_v52  ;;  %v3139_v17 = vsub.f32 1.0, %v3138_v54  ;;  %v1348_v8 = vadd.f32 1.0, %v1316_v61  ;;  %v3155_v14 = vld [vmem:[#allocation31_spill] sm:$0xff]  ;;  %v3156_v61 = vld [vmem:[#allocation33_spill] sm:$0xff]  ;;  %v3159_v13 = vld [vmem:[#allocation16_spill] sm:$0xff] }
 0x1ca   : > { %v1314_v10 = vsel %vm1250_vm12, %v3136_v31, %v3135_v56  ;;  %v582_v33 = vmul.f32 0.5, %v3141_v21  ;;  %v1384_v59 = vmul.f32 %v1352_v11, %v584_v19  ;;  %1426 = vmatpush1.bf16.msra.mxu1 %v1408_v43  ;;  %v3143_v60 = vsub.f32 1.0, %v3142_v18  ;;  %v3160_v40 = vld [vmem:[#allocation11_spill] sm:$0xff]  ;;  %v3161_v63 = vld [vmem:[#allocation13_spill] sm:$0xff] }
 0x1cb   : > { %v1311_v1 = vsel %vm1247_vm13, %v3140_v49, %v3139_v17  ;;  %v1345_v23 = vadd.f32 1.0, %v1313_v15  ;;  %v579_v32 = vmul.f32 0.5, %v3145_v25  ;;  %v1381_v37 = vmul.f32 %v1349_v57, %v3146_v48  ;;  %1427 = vmatprep.subr.bf16.mxu1 %v1407_v45  ;;  %v3153_v15 = vld [vmem:[#allocation30_spill] sm:$0xff]  ;;  %v3157_v57 = vld [vmem:[#allocation15_spill] sm:$0xff] }
 0x1cc   : > { %v1312_v35 = vsel %vm1248_vm14, %v3144_v55, %v3143_v60  ;;  %v1346_v6 = vadd.f32 1.0, %v1314_v10  ;;  %v580_v16 = vmul.f32 0.5, %v3147_v38  ;;  %v1382_v22 = vmul.f32 %v1350_v30, %v582_v33  ;;  %v3162_v17 = vld [vmem:[#allocation10_spill] sm:$0xff]  ;;  %v1412_v25 = vld [vmem:[%s2951_s3] sm:$0x1] }
 0x1cd   : > { %v1406_v4 = vpack.c.bf16 %v1386_v47, %v1384_v59  ;;  %v3149_v12 = vsub.f32 1.0, %v3148_v9  ;;  %v1343_v11 = vadd.f32 1.0, %v1311_v1  ;;  %v1379_v44 = vmul.f32 %v1347_v26, %v579_v32 }
 0x1ce   : > { %v1405_v34 = vpack.c.bf16 %v1383_v39, %v1381_v37  ;;  %vm1244_vm0 = vcmp.lt.f32.partialorder %v3151_v24, 0.0  ;;  %v1344_v7 = vadd.f32 1.0, %v1312_v35  ;;  %v578_v3 = vmul.f32 0.5, %v3152_v50  ;;  %v3166_v35 = vld [vmem:[#allocation27_spill] sm:$0xff] }
 0x1cf   : > { %v1310_v36 = vsel %vm1246_vm15, %v3150_v58, %v3149_v12  ;;  %v1380_v2 = vmul.f32 %v1348_v8, %v580_v16  ;;  %1428 = vmatpush1.bf16.msra.mxu1 %v1406_v4  ;;  %v3154_v42 = vsub.f32 1.0, %v3153_v15  ;;  %v1341_v0 = vadd.f32 1.0, %v3156_v61 }
 0x1d0   : > { %v575_v62 = vmul.f32 0.5, %v3157_v57  ;;  %v1377_v52 = vmul.f32 %v1345_v23, %v3158_v27  ;;  %1429 = vmatprep.subr.bf16.mxu1 %v1405_v34  ;;  %v1342_v30 = vadd.f32 1.0, %v1310_v36  ;;  %v576_v19 = vmul.f32 0.5, %v3159_v13 }
 0x1d1   : > { %v1308_v20 = vsel %vm1244_vm0, %v3155_v14, %v3154_v42  ;;  %v1378_v47 = vmul.f32 %v1346_v6, %v578_v3  ;;  %v1404_v43 = vpack.c.bf16 %v1382_v22, %v1380_v2  ;;  %v573_v56 = vmul.f32 0.5, %v3160_v40 }
 0x1d2   : > { %v1375_v31 = vmul.f32 %v1343_v11, %v575_v62  ;;  %v1403_v10 = vpack.c.bf16 %v1379_v44, %v1377_v52  ;;  %v1340_v26 = vadd.f32 1.0, %v1308_v20  ;;  %v574_v39 = vmul.f32 0.5, %v3161_v63 }
 0x1d3   : > { %v1376_v45 = vmul.f32 %v1344_v7, %v576_v19  ;;  %1430 = vmatpush1.bf16.msra.mxu1 %v1404_v43  ;;  %v1373_v54 = vmul.f32 %v1341_v0, %v573_v56  ;;  %v572_v49 = vmul.f32 0.5, %v3162_v17  ;;  %v3163_v18 = vpack.c.bf16 %v2352_v41, %v2333_v53 }
 0x1d4   : > { %1431 = vmatprep.subr.bf16.mxu1 %v1403_v10  ;;  %v1374_v1 = vmul.f32 %v1342_v30, %v574_v39  ;;  %v3164_v60 = vpack.c.bf16 %v2338_v51, %v2330_v46  ;;  %v3165_v55 = vpack.c.bf16 %v2325_v5, %v2301_v28  ;;  %v3167_v23 = vpack.c.bf16 %v2304_v29, %v3166_v35  ;;  %v1417_v46 = vpop.permute.xlu0 %1416 }
 0x1d5   : > { %v1402_v8 = vpack.c.bf16 %v1378_v47, %v1376_v45  ;;  %v1401_v21 = vpack.c.bf16 %v1375_v31, %v1373_v54  ;;  %v1372_v33 = vmul.f32 %v1340_v26, %v572_v49  ;;  %v1419_v32 = vlaneseq }
 0x1d6   : > { %v1761_v41 = vmov 1966171168  }
 0x1d7   : > { %1432 = vmatpush1.bf16.msra.mxu1 %v1402_v8  ;;  %v1400_v59 = vpack.c.bf16 %v1374_v1, %v1372_v33  ;;  %v1420_v53 = vshrl.u32 %v1419_v32, 7  ;;  %v1468_v48 = vunpack.c.l.s4 %v1761_v41  ;;  %vm1484_vm1 = vcmp.lt.s32.totalorder %v1419_v32, 256 }
 0x1d8   : > { %1433 = vmatprep.subr.bf16.mxu1 %v1401_v21 }
 0x1d9   : > { %v1421_v37 = vsub.s32 0, %v1420_v53  ;;  %v1469_v51 = vunpack.c.0.s8 %v1468_v48 }
 0x1db   : > { %1434 = vmatpush1.bf16.msra.mxu1 %v1400_v59  ;;  %v1422_v5 = vrot.slane %v1417_v46, %v1421_v37  ;;  %v1472_v16 = vsub.s32 %v1469_v51, %v1420_v53 }
 0x1dc   : > { %1435 = vmatprep.subr.bf16.mxu1 %v3163_v18 }
 0x1df   : > { %1436 = vmatpush1.bf16.msra.mxu1 %v3164_v60 }
 0x1e0   : > { %1437 = vmatprep.subr.bf16.mxu1 %v3165_v55 }
 0x1e3   : > { %1438 = vmatpush1.bf16.msra.mxu1 %v3167_v23 }
 0x1e6   : > { %1456 = vmatmul.mubr.bf16.vlgmr.msra.gmra.mxu1 %v1412_v25 }
 0x2a6   : > { %v1457_v28 = vpop.f32.mrf.mxu1 }
 0x2a7   : > { %v1458_v29 = vadd.f32 %v1457_v28, %v1422_v5 }
 0x2a8   : > { %v1459_v6 = vpop.f32.mrf.mxu1 }
 0x2a9   : > { %v1460_v38 = vadd.f32 %v1459_v6, %v1422_v5 }
 0x2aa   : > { %v1461_v22 = vpop.f32.mrf.mxu1 }
 0x2ab   : > { %v1466_v4 = vcombine.low %v1458_v29, %v1460_v38 }
 0x2ac   : > { %v1462_v9 = vpop.f32.mrf.mxu1 }
 0x2ad   : > { %v1473_v12 = vrot.slane %v1466_v4, %v1472_v16 }
 0x2af   : > { %v1480_v58 = vrot.slane %v1473_v12, %v1472_v16 }
 0x2b1   : > { %1486 = vst.msk [vmem:[%s259_s22] sm:$0x3] %vm1484_vm1, %v1480_v58 }
 0x2b2 PF: > { %p14_p9 = scmp.ge.s32.totalorder %s1812_s23, 4   ;;  %s3168_s20 = smov %s1754_s21 }
 0x2b3   : > { %s3169_s21 = smov %s1821_s26  ;;  %s3170_s22 = smov %s1812_s23 }
 0x2b4   :  { %16 = sbr.rel (!%p14_p9) target bundleno = 5 (0x5), region = 98 }

</bundles_post_ra>
